<compile_context>
chip_gen: v7x
topology: tpu7x:2x2x1
jax: 0.10.0
libtpu: 0.0.40
codegen_flags: <defaults>
</compile_context>

<pallas_src>
import functools

import jax
import jax.numpy as jnp
from jax.experimental import pallas as pl
from jax.experimental.pallas import tpu as pltpu

EPS = 1e-5


# ----------------------------- kernels --------------------------------------

def _conv3x3_stats_kernel(xh_ref, w_ref, y_ref, psum_ref, psq_ref, *, th, tw):
    # xh_ref : (th+2, tw+2, cin) bf16  zero-padded halo tile
    # w_ref  : (9*cin, cout)     bf16  taps stacked along K (dy-major, dx-minor)
    # y_ref  : (th*tw, cout)     f32   conv output tile (pre-BN)
    # psum_ref, psq_ref : (1, cout) f32   per-tile partial sum / sum of squares
    cin = xh_ref.shape[-1]
    taps = []
    for dy in range(3):
        for dx in range(3):
            taps.append(xh_ref[dy:dy + th, dx:dx + tw, :].reshape(th * tw, cin))
    x9 = jnp.concatenate(taps, axis=-1)                       # (th*tw, 9*cin)
    y = jnp.dot(x9, w_ref[...], preferred_element_type=jnp.float32)  # deep-K MXU
    y_ref[...] = y
    psum_ref[...] = jnp.sum(y, axis=0, keepdims=True)
    psq_ref[...] = jnp.sum(y * y, axis=0, keepdims=True)


def _bn_scale_shift(sum_ref, sq_ref, g_ref, b_ref, inv_m):
    # Fold BN into one per-channel scale/shift (f32).  Var = E[y^2]-E[y]^2.
    mean = sum_ref[...] * inv_m
    var = sq_ref[...] * inv_m - mean * mean
    s = g_ref[...] * jax.lax.rsqrt(var + EPS)
    t = b_ref[...] - mean * s
    return s, t


def _bn_relu_kernel(y_ref, sum_ref, sq_ref, g_ref, b_ref, o_ref, *, inv_m):
    s, t = _bn_scale_shift(sum_ref, sq_ref, g_ref, b_ref, inv_m)
    o_ref[...] = jnp.maximum(y_ref[...] * s + t, 0.0).astype(o_ref.dtype)


def _bn_relu_pool_kernel(y_ref, sum_ref, sq_ref, g_ref, b_ref,
                         down_ref, pool_ref, rp_ref, *, inv_m, th, tw):
    s, t = _bn_scale_shift(sum_ref, sq_ref, g_ref, b_ref, inv_m)
    d = jnp.maximum(y_ref[...] * s + t, 0.0)                  # (th*tw, cout) f32
    down_ref[...] = d
    cout = d.shape[-1]
    # 2x2 MaxPool fused in the epilogue.
    # Rows (H pairs): split the leading/flattened axis only (layout friendly).
    rp = jnp.max(d.reshape(th // 2, 2, tw, cout), axis=1)     # (th//2, tw, cout)
    rp_ref[...] = rp.reshape((th // 2) * tw, cout)
    # Columns (W pairs): even/odd flat rows via stride-2 ref reads.
    npool = (th // 2) * (tw // 2)
    pool_ref[...] = jnp.maximum(rp_ref[pl.ds(0, npool, 2), :],
                                rp_ref[pl.ds(1, npool, 2), :])


# --------------------------- pallas_call wrappers ----------------------------

def _conv3x3_tiles(xh, w_flat):
    n, hb, thp2, twp2, cin = xh.shape
    th, tw = thp2 - 2, twp2 - 2
    m_tile = th * tw
    cout = w_flat.shape[1]

    def tile_spec(rows):
        return pl.BlockSpec((None, None, rows, cout), lambda i, j: (i, j, 0, 0))

    return pl.pallas_call(
        functools.partial(_conv3x3_stats_kernel, th=th, tw=tw),
        grid=(n, hb),
        in_specs=[
            pl.BlockSpec((None, None, thp2, twp2, cin),
                         lambda i, j: (i, j, 0, 0, 0)),
            pl.BlockSpec((9 * cin, cout), lambda i, j: (0, 0)),  # VMEM-resident
        ],
        out_specs=(tile_spec(m_tile), tile_spec(1), tile_spec(1)),
        out_shape=(
            jax.ShapeDtypeStruct((n, hb, m_tile, cout), jnp.float32),
            jax.ShapeDtypeStruct((n, hb, 1, cout), jnp.float32),
            jax.ShapeDtypeStruct((n, hb, 1, cout), jnp.float32),
        ),
        compiler_params=pltpu.CompilerParams(
            dimension_semantics=("parallel", "parallel")),
    )(xh, w_flat)


def _bn_relu_apply(y, ssum, ssq, gamma, beta, m_total, out_dtype):
    n, hb, m_tile, cout = y.shape
    vec = pl.BlockSpec((1, cout), lambda i, j: (0, 0))
    tile = pl.BlockSpec((None, None, m_tile, cout), lambda i, j: (i, j, 0, 0))
    return pl.pallas_call(
        functools.partial(_bn_relu_kernel, inv_m=1.0 / m_total),
        grid=(n, hb),
        in_specs=[tile, vec, vec, vec, vec],
        out_specs=tile,
        out_shape=jax.ShapeDtypeStruct((n, hb, m_tile, cout), out_dtype),
        compiler_params=pltpu.CompilerParams(
            dimension_semantics=("parallel", "parallel")),
    )(y, ssum, ssq, gamma, beta)


def _bn_relu_pool(y, ssum, ssq, gamma, beta, m_total, th, tw):
    n, hb, m_tile, cout = y.shape
    npool = (th // 2) * (tw // 2)
    vec = pl.BlockSpec((1, cout), lambda i, j: (0, 0))
    tile = pl.BlockSpec((None, None, m_tile, cout), lambda i, j: (i, j, 0, 0))
    ptile = pl.BlockSpec((None, None, npool, cout), lambda i, j: (i, j, 0, 0))
    return pl.pallas_call(
        functools.partial(_bn_relu_pool_kernel, inv_m=1.0 / m_total, th=th, tw=tw),
        grid=(n, hb),
        in_specs=[tile, vec, vec, vec, vec],
        out_specs=(tile, ptile),
        out_shape=(jax.ShapeDtypeStruct((n, hb, m_tile, cout), jnp.float32),
                   jax.ShapeDtypeStruct((n, hb, npool, cout), jnp.float32)),
        scratch_shapes=[pltpu.VMEM(((th // 2) * tw, cout), jnp.float32)],
        compiler_params=pltpu.CompilerParams(
            dimension_semantics=("parallel", "parallel")),
    )(y, ssum, ssq, gamma, beta)


# ------------------------------ glue (plain JAX) -----------------------------

def _halo_windows(x_nhwc, tile_h):
    """(N, H, W, C) -> (N, H//tile_h, tile_h+2, W+2, C), zero pad, 1-row halo."""
    n, h, w, c = x_nhwc.shape
    xp = jnp.pad(x_nhwc, ((0, 0), (1, 1), (1, 1), (0, 0)))
    hb = h // tile_h
    wins = [xp[:, i * tile_h:i * tile_h + tile_h + 2] for i in range(hb)]
    return jnp.stack(wins, axis=1)


def _pick_tile_h(h, w, cin, cout, budget_bytes=4 << 20):
    """Largest even row-tile with a modest double-buffered VMEM footprint
    (conservative so the same tiling also fits v7x's 64 MiB VMEM)."""
    best = 2
    for th in range(2, h + 1, 2):
        if h % th:
            continue
        fp = ((th + 2) * (w + 2) * cin * 2      # bf16 halo tile
              + th * w * cout * 4 * 3)          # f32 y tile + apply out + scratch
        if 2 * fp <= budget_bytes:              # x2 for double buffering
            best = th
    return best


def downsample_forward(x_nchw, params, tile_h=None):
    """Returns (down, pool), both NCHW, matching DownSample.forward
    (training-mode BatchNorm statistics, the nn.BatchNorm2d default)."""
    n, cin, h, w = x_nchw.shape
    assert h % 2 == 0 and w % 2 == 0, "MaxPool2d(2,2) needs even H, W"
    c1 = params["w1"].shape[-1]
    c2 = params["w2"].shape[-1]
    if tile_h is None:
        tile_h = _pick_tile_h(h, w, max(cin, c1), max(c1, c2))
    assert h % tile_h == 0 and tile_h % 2 == 0

    x = jnp.transpose(x_nchw, (0, 2, 3, 1)).astype(jnp.float32)   # NHWC
    m_total = n * h * w

    # Conv bias is omitted on purpose: training-mode BN subtracts the batch
    # mean, which cancels a per-channel constant exactly.
    w1f = params["w1"].reshape(9 * cin, c1).astype(jnp.bfloat16)
    w2f = params["w2"].reshape(9 * c1, c2).astype(jnp.bfloat16)

    # ---- conv1 + BN stats, then BN/ReLU apply (h1 stored bf16 for next MXU) ----
    xh = _halo_windows(x, tile_h).astype(jnp.bfloat16)
    y1, ps1, pq1 = _conv3x3_tiles(xh, w1f)
    s1 = jnp.sum(ps1, axis=(0, 1))        # (1, c1) tiny cross-tile combine (glue)
    q1 = jnp.sum(pq1, axis=(0, 1))
    h1 = _bn_relu_apply(y1, s1, q1, params["g1"], params["beta1"],
                        m_total, jnp.bfloat16)
    h1 = h1.reshape(n, h, w, c1)          # contiguous -> free reshape

    # ---- conv2 + BN stats, then fused BN/ReLU + MaxPool2d(2,2) ----
    hh = _halo_windows(h1, tile_h)
    y2, ps2, pq2 = _conv3x3_tiles(hh, w2f)
    s2 = jnp.sum(ps2, axis=(0, 1))
    q2 = jnp.sum(pq2, axis=(0, 1))
    down_t, pool_t = _bn_relu_pool(y2, s2, q2, params["g2"], params["beta2"],
                                   m_total, tile_h, w)
    down = down_t.reshape(n, h, w, c2)
    pool = pool_t.reshape(n, h // 2, w // 2, c2)
    return (jnp.transpose(down, (0, 3, 1, 2)),
            jnp.transpose(pool, (0, 3, 1, 2)))


def init_params(key, in_channels, out_channels):
    k1, k2, k3, k4 = jax.random.split(key, 4)
    w1 = jax.random.normal(k1, (3, 3, in_channels, out_channels), jnp.float32)
    w1 = w1 / jnp.sqrt(9.0 * in_channels)
    w2 = jax.random.normal(k3, (3, 3, out_channels, out_channels), jnp.float32)
    w2 = w2 / jnp.sqrt(9.0 * out_channels)
    return dict(
        w1=w1.reshape(9, in_channels, out_channels),
        b1=0.1 * jax.random.normal(k2, (1, out_channels), jnp.float32),
        g1=jnp.ones((1, out_channels), jnp.float32),       # BN weight init
        beta1=jnp.zeros((1, out_channels), jnp.float32),   # BN bias init
        w2=w2.reshape(9, out_channels, out_channels),
        b2=0.1 * jax.random.normal(k4, (1, out_channels), jnp.float32),
        g2=jnp.ones((1, out_channels), jnp.float32),
        beta2=jnp.zeros((1, out_channels), jnp.float32),
    )


# ------------------------------ pure-JAX reference ---------------------------

def _reference(x_nchw, params):
    def conv(x, w9, b):
        cin, cout = w9.shape[1], w9.shape[2]
        w = w9.reshape(3, 3, cin, cout)  # HWIO
        y = jax.lax.conv_general_dilated(
            x, w, window_strides=(1, 1), padding="SAME",
            dimension_numbers=("NHWC", "HWIO", "NHWC"))
        return y + b.reshape(1, 1, 1, cout)

    def bn_relu(y, g, beta):
        mean = jnp.mean(y, axis=(0, 1, 2), keepdims=True)
        var = jnp.mean((y - mean) ** 2, axis=(0, 1, 2), keepdims=True)
        yhat = (y - mean) * jax.lax.rsqrt(var + EPS)
        return jnp.maximum(yhat * g.reshape(1, 1, 1, -1)
                           + beta.reshape(1, 1, 1, -1), 0.0)

    x = jnp.transpose(x_nchw, (0, 2, 3, 1)).astype(jnp.float32)
    h = bn_relu(conv(x, params["w1"], params["b1"]), params["g1"], params["beta1"])
    d = bn_relu(conv(h, params["w2"], params["b2"]), params["g2"], params["beta2"])
    n, hh, ww, c = d.shape
    p = jnp.max(d.reshape(n, hh // 2, 2, ww // 2, 2, c), axis=(2, 4))
    return jnp.transpose(d, (0, 3, 1, 2)), jnp.transpose(p, (0, 3, 1, 2))


# ---------------------------------- main -------------------------------------

if __name__ == "__main__":
    N, CIN, COUT, H, W = 2, 4, 8, 16, 16
    key = jax.random.PRNGKey(0)
    kx, kp = jax.random.split(key)
    x = jax.random.normal(kx, (N, CIN, H, W), jnp.float32)
    params = init_params(kp, CIN, COUT)

    fwd = jax.jit(functools.partial(downsample_forward, tile_h=8))
    down, pool = fwd(x, params)
    down = jax.block_until_ready(down)
    pool = jax.block_until_ready(pool)

    assert down.shape == (N, COUT, H, W)
    assert pool.shape == (N, COUT, H // 2, W // 2)

    ref_down, ref_pool = _reference(x, params)
    # bf16 MXU operands vs. a pure-f32 reference -> compare at bf16-level tolerance.
    assert jnp.allclose(down, ref_down, atol=5e-2, rtol=5e-2), "down mismatch"
    assert jnp.allclose(pool, ref_pool, atol=5e-2, rtol=5e-2), "pool mismatch"

    print("KERNEL_OK")
</pallas_src>

<mosaic_0001>
module attributes {stable_mosaic.version = 11 : i64} {
  func.func @_conv3x3_stats_kernel(%arg0: i32, %arg1: i32, %arg2: memref<1x1x10x18x4xbf16, #tpu.memory_space<vmem>>, %arg3: memref<36x8xbf16, #tpu.memory_space<vmem>>, %arg4: memref<1x1x128x8xf32, #tpu.memory_space<vmem>>, %arg5: memref<1x1x1x8xf32, #tpu.memory_space<vmem>>, %arg6: memref<1x1x1x8xf32, #tpu.memory_space<vmem>>) attributes {dimension_semantics = [#tpu.dimension_semantics<parallel>, #tpu.dimension_semantics<parallel>], iteration_bounds = array<i64: 2, 2>, scalar_prefetch = 0 : i64, scratch_operands = 0 : i64, tpu.core_type = #tpu.core_type<tc>, window_params = [{transform_indices = @transform_0, window_bounds = array<i64: 1, 1, 10, 18, 4>}, {pipeline_mode = #tpu.pipeline_mode<synchronous>, transform_indices = @transform_1, window_bounds = array<i64: 36, 8>}, {transform_indices = @transform_2, window_bounds = array<i64: 1, 1, 128, 8>}, {transform_indices = @transform_3, window_bounds = array<i64: 1, 1, 1, 8>}, {transform_indices = @transform_4, window_bounds = array<i64: 1, 1, 1, 8>}]} {
    %c0 = arith.constant 0 : index
    %c0_0 = arith.constant 0 : index
    %c0_1 = arith.constant 0 : index
    %c0_2 = arith.constant 0 : index
    %c0_3 = arith.constant 0 : index
    %0 = vector.load %arg2[%c0, %c0_0, %c0_1, %c0_2, %c0_3] : memref<1x1x10x18x4xbf16, #tpu.memory_space<vmem>>, vector<1x1x8x16x4xbf16>
    %1 = vector.shape_cast %0 : vector<1x1x8x16x4xbf16> to vector<8x16x4xbf16>
    %2 = vector.shape_cast %1 : vector<8x16x4xbf16> to vector<128x4xbf16>
    %c0_4 = arith.constant 0 : index
    %c0_5 = arith.constant 0 : index
    %c0_6 = arith.constant 0 : index
    %c1 = arith.constant 1 : index
    %c0_7 = arith.constant 0 : index
    %3 = vector.load %arg2[%c0_4, %c0_5, %c0_6, %c1, %c0_7] : memref<1x1x10x18x4xbf16, #tpu.memory_space<vmem>>, vector<1x1x8x16x4xbf16>
    %4 = vector.shape_cast %3 : vector<1x1x8x16x4xbf16> to vector<8x16x4xbf16>
    %5 = vector.shape_cast %4 : vector<8x16x4xbf16> to vector<128x4xbf16>
    %c0_8 = arith.constant 0 : index
    %c0_9 = arith.constant 0 : index
    %c0_10 = arith.constant 0 : index
    %c2 = arith.constant 2 : index
    %c0_11 = arith.constant 0 : index
    %6 = vector.load %arg2[%c0_8, %c0_9, %c0_10, %c2, %c0_11] : memref<1x1x10x18x4xbf16, #tpu.memory_space<vmem>>, vector<1x1x8x16x4xbf16>
    %7 = vector.shape_cast %6 : vector<1x1x8x16x4xbf16> to vector<8x16x4xbf16>
    %8 = vector.shape_cast %7 : vector<8x16x4xbf16> to vector<128x4xbf16>
    %c0_12 = arith.constant 0 : index
    %c0_13 = arith.constant 0 : index
    %c1_14 = arith.constant 1 : index
    %c0_15 = arith.constant 0 : index
    %c0_16 = arith.constant 0 : index
    %9 = vector.load %arg2[%c0_12, %c0_13, %c1_14, %c0_15, %c0_16] : memref<1x1x10x18x4xbf16, #tpu.memory_space<vmem>>, vector<1x1x8x16x4xbf16>
    %10 = vector.shape_cast %9 : vector<1x1x8x16x4xbf16> to vector<8x16x4xbf16>
    %11 = vector.shape_cast %10 : vector<8x16x4xbf16> to vector<128x4xbf16>
    %c0_17 = arith.constant 0 : index
    %c0_18 = arith.constant 0 : index
    %c1_19 = arith.constant 1 : index
    %c1_20 = arith.constant 1 : index
    %c0_21 = arith.constant 0 : index
    %12 = vector.load %arg2[%c0_17, %c0_18, %c1_19, %c1_20, %c0_21] : memref<1x1x10x18x4xbf16, #tpu.memory_space<vmem>>, vector<1x1x8x16x4xbf16>
    %13 = vector.shape_cast %12 : vector<1x1x8x16x4xbf16> to vector<8x16x4xbf16>
    %14 = vector.shape_cast %13 : vector<8x16x4xbf16> to vector<128x4xbf16>
    %c0_22 = arith.constant 0 : index
    %c0_23 = arith.constant 0 : index
    %c1_24 = arith.constant 1 : index
    %c2_25 = arith.constant 2 : index
    %c0_26 = arith.constant 0 : index
    %15 = vector.load %arg2[%c0_22, %c0_23, %c1_24, %c2_25, %c0_26] : memref<1x1x10x18x4xbf16, #tpu.memory_space<vmem>>, vector<1x1x8x16x4xbf16>
    %16 = vector.shape_cast %15 : vector<1x1x8x16x4xbf16> to vector<8x16x4xbf16>
    %17 = vector.shape_cast %16 : vector<8x16x4xbf16> to vector<128x4xbf16>
    %c0_27 = arith.constant 0 : index
    %c0_28 = arith.constant 0 : index
    %c2_29 = arith.constant 2 : index
    %c0_30 = arith.constant 0 : index
    %c0_31 = arith.constant 0 : index
    %18 = vector.load %arg2[%c0_27, %c0_28, %c2_29, %c0_30, %c0_31] : memref<1x1x10x18x4xbf16, #tpu.memory_space<vmem>>, vector<1x1x8x16x4xbf16>
    %19 = vector.shape_cast %18 : vector<1x1x8x16x4xbf16> to vector<8x16x4xbf16>
    %20 = vector.shape_cast %19 : vector<8x16x4xbf16> to vector<128x4xbf16>
    %c0_32 = arith.constant 0 : index
    %c0_33 = arith.constant 0 : index
    %c2_34 = arith.constant 2 : index
    %c1_35 = arith.constant 1 : index
    %c0_36 = arith.constant 0 : index
    %21 = vector.load %arg2[%c0_32, %c0_33, %c2_34, %c1_35, %c0_36] : memref<1x1x10x18x4xbf16, #tpu.memory_space<vmem>>, vector<1x1x8x16x4xbf16>
    %22 = vector.shape_cast %21 : vector<1x1x8x16x4xbf16> to vector<8x16x4xbf16>
    %23 = vector.shape_cast %22 : vector<8x16x4xbf16> to vector<128x4xbf16>
    %c0_37 = arith.constant 0 : index
    %c0_38 = arith.constant 0 : index
    %c2_39 = arith.constant 2 : index
    %c2_40 = arith.constant 2 : index
    %c0_41 = arith.constant 0 : index
    %24 = vector.load %arg2[%c0_37, %c0_38, %c2_39, %c2_40, %c0_41] : memref<1x1x10x18x4xbf16, #tpu.memory_space<vmem>>, vector<1x1x8x16x4xbf16>
    %25 = vector.shape_cast %24 : vector<1x1x8x16x4xbf16> to vector<8x16x4xbf16>
    %26 = vector.shape_cast %25 : vector<8x16x4xbf16> to vector<128x4xbf16>
    %27 = tpu.concatenate %2, %5, %8, %11, %14, %17, %20, %23, %26 in 1 : vector<128x4xbf16>, vector<128x4xbf16>, vector<128x4xbf16>, vector<128x4xbf16>, vector<128x4xbf16>, vector<128x4xbf16>, vector<128x4xbf16>, vector<128x4xbf16>, vector<128x4xbf16> -> vector<128x36xbf16>
    %c0_42 = arith.constant 0 : index
    %c0_43 = arith.constant 0 : index
    %28 = vector.load %arg3[%c0_42, %c0_43] : memref<36x8xbf16, #tpu.memory_space<vmem>>, vector<36x8xbf16>
    %cst = arith.constant dense<0.000000e+00> : vector<128x8xf32>
    %29 = tpu.matmul %27, %28, %cst {dimension_numbers = #tpu.dot_dimension_numbers<[1], [0], [0], [1], [0, 0, 1, 1], [], []>} : vector<128x36xbf16>, vector<36x8xbf16>, vector<128x8xf32> -> vector<128x8xf32>
    %c0_44 = arith.constant 0 : index
    %c0_45 = arith.constant 0 : index
    %c0_46 = arith.constant 0 : index
    %c0_47 = arith.constant 0 : index
    %30 = vector.load %arg4[%c0_44, %c0_45, %c0_46, %c0_47] : memref<1x1x128x8xf32, #tpu.memory_space<vmem>>, vector<1x1x128x8xf32>
    %31 = vector.shape_cast %30 : vector<1x1x128x8xf32> to vector<128x8xf32>
    %32 = vector.shape_cast %29 : vector<128x8xf32> to vector<1x1x128x8xf32>
    tpu.vector_store %arg4[%c0_44, %c0_45, %c0_46, %c0_47], %32 {strides = array<i32>} : memref<1x1x128x8xf32, #tpu.memory_space<vmem>>, vector<1x1x128x8xf32>,
    %cst_48 = arith.constant dense<0.000000e+00> : vector<8xf32>
    %33 = vector.multi_reduction <add>, %29, %cst_48 [0] : vector<128x8xf32> to vector<8xf32>
    %34 = vector.shape_cast %33 : vector<8xf32> to vector<1x8xf32>
    %c0_49 = arith.constant 0 : index
    %c0_50 = arith.constant 0 : index
    %c0_51 = arith.constant 0 : index
    %c0_52 = arith.constant 0 : index
    %35 = vector.load %arg5[%c0_49, %c0_50, %c0_51, %c0_52] : memref<1x1x1x8xf32, #tpu.memory_space<vmem>>, vector<1x1x1x8xf32>
    %36 = vector.shape_cast %35 : vector<1x1x1x8xf32> to vector<1x8xf32>
    %37 = vector.shape_cast %34 : vector<1x8xf32> to vector<1x1x1x8xf32>
    tpu.vector_store %arg5[%c0_49, %c0_50, %c0_51, %c0_52], %37 {strides = array<i32>} : memref<1x1x1x8xf32, #tpu.memory_space<vmem>>, vector<1x1x1x8xf32>,
    %38 = arith.mulf %29, %29 : vector<128x8xf32>
    %cst_53 = arith.constant dense<0.000000e+00> : vector<8xf32>
    %39 = vector.multi_reduction <add>, %38, %cst_53 [0] : vector<128x8xf32> to vector<8xf32>
    %40 = vector.shape_cast %39 : vector<8xf32> to vector<1x8xf32>
    %c0_54 = arith.constant 0 : index
    %c0_55 = arith.constant 0 : index
    %c0_56 = arith.constant 0 : index
    %c0_57 = arith.constant 0 : index
    %41 = vector.load %arg6[%c0_54, %c0_55, %c0_56, %c0_57] : memref<1x1x1x8xf32, #tpu.memory_space<vmem>>, vector<1x1x1x8xf32>
    %42 = vector.shape_cast %41 : vector<1x1x1x8xf32> to vector<1x8xf32>
    %43 = vector.shape_cast %40 : vector<1x8xf32> to vector<1x1x1x8xf32>
    tpu.vector_store %arg6[%c0_54, %c0_55, %c0_56, %c0_57], %43 {strides = array<i32>} : memref<1x1x1x8xf32, #tpu.memory_space<vmem>>, vector<1x1x1x8xf32>,
    return
  }
  func.func @transform_0(%arg0: i32, %arg1: i32) -> (i32, i32, i32, i32, i32) {
    %c0_i32 = arith.constant 0 : i32
    %c0_i32_0 = arith.constant 0 : i32
    %c0_i32_1 = arith.constant 0 : i32
    %c0_i32_2 = arith.constant 0 : i32
    return %arg0, %arg1, %c0_i32, %c0_i32_0, %c0_i32_1 : i32, i32, i32, i32, i32
  }
  func.func @transform_1(%arg0: i32, %arg1: i32) -> (i32, i32) {
    %c0_i32 = arith.constant 0 : i32
    %c0_i32_0 = arith.constant 0 : i32
    %c0_i32_1 = arith.constant 0 : i32
    return %c0_i32, %c0_i32_0 : i32, i32
  }
  func.func @transform_2(%arg0: i32, %arg1: i32) -> (i32, i32, i32, i32) {
    %c0_i32 = arith.constant 0 : i32
    %c0_i32_0 = arith.constant 0 : i32
    %c0_i32_1 = arith.constant 0 : i32
    return %arg0, %arg1, %c0_i32, %c0_i32_0 : i32, i32, i32, i32
  }
  func.func @transform_3(%arg0: i32, %arg1: i32) -> (i32, i32, i32, i32) {
    %c0_i32 = arith.constant 0 : i32
    %c0_i32_0 = arith.constant 0 : i32
    %c0_i32_1 = arith.constant 0 : i32
    return %arg0, %arg1, %c0_i32, %c0_i32_0 : i32, i32, i32, i32
  }
  func.func @transform_4(%arg0: i32, %arg1: i32) -> (i32, i32, i32, i32) {
    %c0_i32 = arith.constant 0 : i32
    %c0_i32_0 = arith.constant 0 : i32
    %c0_i32_1 = arith.constant 0 : i32
    return %arg0, %arg1, %c0_i32, %c0_i32_0 : i32, i32, i32, i32
  }
}

module attributes {stable_mosaic.version = 11 : i64} {
  func.func @_bn_relu_kernel(%arg0: i32, %arg1: i32, %arg2: memref<1x1x128x8xf32, #tpu.memory_space<vmem>>, %arg3: memref<1x8xf32, #tpu.memory_space<vmem>>, %arg4: memref<1x8xf32, #tpu.memory_space<vmem>>, %arg5: memref<1x8xf32, #tpu.memory_space<vmem>>, %arg6: memref<1x8xf32, #tpu.memory_space<vmem>>, %arg7: memref<1x1x128x8xbf16, #tpu.memory_space<vmem>>) attributes {dimension_semantics = [#tpu.dimension_semantics<parallel>, #tpu.dimension_semantics<parallel>], iteration_bounds = array<i64: 2, 2>, scalar_prefetch = 0 : i64, scratch_operands = 0 : i64, tpu.core_type = #tpu.core_type<tc>, window_params = [{transform_indices = @transform_0, window_bounds = array<i64: 1, 1, 128, 8>}, {pipeline_mode = #tpu.pipeline_mode<synchronous>, transform_indices = @transform_1, window_bounds = array<i64: 1, 8>}, {pipeline_mode = #tpu.pipeline_mode<synchronous>, transform_indices = @transform_2, window_bounds = array<i64: 1, 8>}, {pipeline_mode = #tpu.pipeline_mode<synchronous>, transform_indices = @transform_3, window_bounds = array<i64: 1, 8>}, {pipeline_mode = #tpu.pipeline_mode<synchronous>, transform_indices = @transform_4, window_bounds = array<i64: 1, 8>}, {transform_indices = @transform_5, window_bounds = array<i64: 1, 1, 128, 8>}]} {
    %c0 = arith.constant 0 : index
    %c0_0 = arith.constant 0 : index
    %0 = vector.load %arg3[%c0, %c0_0] : memref<1x8xf32, #tpu.memory_space<vmem>>, vector<1x8xf32>
    %cst = arith.constant 0.001953125 : f32
    %1 = vector.broadcast %cst : f32 to vector<1x8xf32>
    %2 = arith.mulf %0, %1 : vector<1x8xf32>
    %c0_1 = arith.constant 0 : index
    %c0_2 = arith.constant 0 : index
    %3 = vector.load %arg4[%c0_1, %c0_2] : memref<1x8xf32, #tpu.memory_space<vmem>>, vector<1x8xf32>
    %cst_3 = arith.constant 0.001953125 : f32
    %4 = vector.broadcast %cst_3 : f32 to vector<1x8xf32>
    %5 = arith.mulf %3, %4 : vector<1x8xf32>
    %6 = arith.mulf %2, %2 : vector<1x8xf32>
    %7 = arith.subf %5, %6 : vector<1x8xf32>
    %c0_4 = arith.constant 0 : index
    %c0_5 = arith.constant 0 : index
    %8 = vector.load %arg5[%c0_4, %c0_5] : memref<1x8xf32, #tpu.memory_space<vmem>>, vector<1x8xf32>
    %cst_6 = arith.constant 9.99999974E-6 : f32
    %9 = vector.broadcast %cst_6 : f32 to vector<1x8xf32>
    %10 = arith.addf %7, %9 : vector<1x8xf32>
    %11 = math.rsqrt %10 : vector<1x8xf32>
    %12 = arith.mulf %8, %11 : vector<1x8xf32>
    %c0_7 = arith.constant 0 : index
    %c0_8 = arith.constant 0 : index
    %13 = vector.load %arg6[%c0_7, %c0_8] : memref<1x8xf32, #tpu.memory_space<vmem>>, vector<1x8xf32>
    %14 = arith.mulf %2, %12 : vector<1x8xf32>
    %15 = arith.subf %13, %14 : vector<1x8xf32>
    %c0_9 = arith.constant 0 : index
    %c0_10 = arith.constant 0 : index
    %c0_11 = arith.constant 0 : index
    %c0_12 = arith.constant 0 : index
    %16 = vector.load %arg2[%c0_9, %c0_10, %c0_11, %c0_12] : memref<1x1x128x8xf32, #tpu.memory_space<vmem>>, vector<1x1x128x8xf32>
    %17 = vector.shape_cast %16 : vector<1x1x128x8xf32> to vector<128x8xf32>
    %18 = vector.broadcast %12 : vector<1x8xf32> to vector<128x8xf32>
    %19 = arith.mulf %17, %18 : vector<128x8xf32>
    %20 = vector.broadcast %15 : vector<1x8xf32> to vector<128x8xf32>
    %21 = arith.addf %19, %20 : vector<128x8xf32>
    %cst_13 = arith.constant 0.000000e+00 : f32
    %22 = vector.broadcast %cst_13 : f32 to vector<128x8xf32>
    %23 = arith.maximumf %21, %22 : vector<128x8xf32>
    %24 = arith.truncf %23 : vector<128x8xf32> to vector<128x8xbf16>
    %c0_14 = arith.constant 0 : index
    %c0_15 = arith.constant 0 : index
    %c0_16 = arith.constant 0 : index
    %c0_17 = arith.constant 0 : index
    %25 = vector.load %arg7[%c0_14, %c0_15, %c0_16, %c0_17] : memref<1x1x128x8xbf16, #tpu.memory_space<vmem>>, vector<1x1x128x8xbf16>
    %26 = vector.shape_cast %25 : vector<1x1x128x8xbf16> to vector<128x8xbf16>
    %27 = vector.shape_cast %24 : vector<128x8xbf16> to vector<1x1x128x8xbf16>
    tpu.vector_store %arg7[%c0_14, %c0_15, %c0_16, %c0_17], %27 {strides = array<i32>} : memref<1x1x128x8xbf16, #tpu.memory_space<vmem>>, vector<1x1x128x8xbf16>,
    return
  }
  func.func @transform_0(%arg0: i32, %arg1: i32) -> (i32, i32, i32, i32) {
    %c0_i32 = arith.constant 0 : i32
    %c0_i32_0 = arith.constant 0 : i32
    %c0_i32_1 = arith.constant 0 : i32
    return %arg0, %arg1, %c0_i32, %c0_i32_0 : i32, i32, i32, i32
  }
  func.func @transform_1(%arg0: i32, %arg1: i32) -> (i32, i32) {
    %c0_i32 = arith.constant 0 : i32
    %c0_i32_0 = arith.constant 0 : i32
    %c0_i32_1 = arith.constant 0 : i32
    return %c0_i32, %c0_i32_0 : i32, i32
  }
  func.func @transform_2(%arg0: i32, %arg1: i32) -> (i32, i32) {
    %c0_i32 = arith.constant 0 : i32
    %c0_i32_0 = arith.constant 0 : i32
    %c0_i32_1 = arith.constant 0 : i32
    return %c0_i32, %c0_i32_0 : i32, i32
  }
  func.func @transform_3(%arg0: i32, %arg1: i32) -> (i32, i32) {
    %c0_i32 = arith.constant 0 : i32
    %c0_i32_0 = arith.constant 0 : i32
    %c0_i32_1 = arith.constant 0 : i32
    return %c0_i32, %c0_i32_0 : i32, i32
  }
  func.func @transform_4(%arg0: i32, %arg1: i32) -> (i32, i32) {
    %c0_i32 = arith.constant 0 : i32
    %c0_i32_0 = arith.constant 0 : i32
    %c0_i32_1 = arith.constant 0 : i32
    return %c0_i32, %c0_i32_0 : i32, i32
  }
  func.func @transform_5(%arg0: i32, %arg1: i32) -> (i32, i32, i32, i32) {
    %c0_i32 = arith.constant 0 : i32
    %c0_i32_0 = arith.constant 0 : i32
    %c0_i32_1 = arith.constant 0 : i32
    return %arg0, %arg1, %c0_i32, %c0_i32_0 : i32, i32, i32, i32
  }
}

module attributes {stable_mosaic.version = 11 : i64} {
  func.func @_conv3x3_stats_kernel(%arg0: i32, %arg1: i32, %arg2: memref<1x1x10x18x8xbf16, #tpu.memory_space<vmem>>, %arg3: memref<72x8xbf16, #tpu.memory_space<vmem>>, %arg4: memref<1x1x128x8xf32, #tpu.memory_space<vmem>>, %arg5: memref<1x1x1x8xf32, #tpu.memory_space<vmem>>, %arg6: memref<1x1x1x8xf32, #tpu.memory_space<vmem>>) attributes {dimension_semantics = [#tpu.dimension_semantics<parallel>, #tpu.dimension_semantics<parallel>], iteration_bounds = array<i64: 2, 2>, scalar_prefetch = 0 : i64, scratch_operands = 0 : i64, tpu.core_type = #tpu.core_type<tc>, window_params = [{transform_indices = @transform_0, window_bounds = array<i64: 1, 1, 10, 18, 8>}, {pipeline_mode = #tpu.pipeline_mode<synchronous>, transform_indices = @transform_1, window_bounds = array<i64: 72, 8>}, {transform_indices = @transform_2, window_bounds = array<i64: 1, 1, 128, 8>}, {transform_indices = @transform_3, window_bounds = array<i64: 1, 1, 1, 8>}, {transform_indices = @transform_4, window_bounds = array<i64: 1, 1, 1, 8>}]} {
    %c0 = arith.constant 0 : index
    %c0_0 = arith.constant 0 : index
    %c0_1 = arith.constant 0 : index
    %c0_2 = arith.constant 0 : index
    %c0_3 = arith.constant 0 : index
    %0 = vector.load %arg2[%c0, %c0_0, %c0_1, %c0_2, %c0_3] : memref<1x1x10x18x8xbf16, #tpu.memory_space<vmem>>, vector<1x1x8x16x8xbf16>
    %1 = vector.shape_cast %0 : vector<1x1x8x16x8xbf16> to vector<8x16x8xbf16>
    %2 = vector.shape_cast %1 : vector<8x16x8xbf16> to vector<128x8xbf16>
    %c0_4 = arith.constant 0 : index
    %c0_5 = arith.constant 0 : index
    %c0_6 = arith.constant 0 : index
    %c1 = arith.constant 1 : index
    %c0_7 = arith.constant 0 : index
    %3 = vector.load %arg2[%c0_4, %c0_5, %c0_6, %c1, %c0_7] : memref<1x1x10x18x8xbf16, #tpu.memory_space<vmem>>, vector<1x1x8x16x8xbf16>
    %4 = vector.shape_cast %3 : vector<1x1x8x16x8xbf16> to vector<8x16x8xbf16>
    %5 = vector.shape_cast %4 : vector<8x16x8xbf16> to vector<128x8xbf16>
    %c0_8 = arith.constant 0 : index
    %c0_9 = arith.constant 0 : index
    %c0_10 = arith.constant 0 : index
    %c2 = arith.constant 2 : index
    %c0_11 = arith.constant 0 : index
    %6 = vector.load %arg2[%c0_8, %c0_9, %c0_10, %c2, %c0_11] : memref<1x1x10x18x8xbf16, #tpu.memory_space<vmem>>, vector<1x1x8x16x8xbf16>
    %7 = vector.shape_cast %6 : vector<1x1x8x16x8xbf16> to vector<8x16x8xbf16>
    %8 = vector.shape_cast %7 : vector<8x16x8xbf16> to vector<128x8xbf16>
    %c0_12 = arith.constant 0 : index
    %c0_13 = arith.constant 0 : index
    %c1_14 = arith.constant 1 : index
    %c0_15 = arith.constant 0 : index
    %c0_16 = arith.constant 0 : index
    %9 = vector.load %arg2[%c0_12, %c0_13, %c1_14, %c0_15, %c0_16] : memref<1x1x10x18x8xbf16, #tpu.memory_space<vmem>>, vector<1x1x8x16x8xbf16>
    %10 = vector.shape_cast %9 : vector<1x1x8x16x8xbf16> to vector<8x16x8xbf16>
    %11 = vector.shape_cast %10 : vector<8x16x8xbf16> to vector<128x8xbf16>
    %c0_17 = arith.constant 0 : index
    %c0_18 = arith.constant 0 : index
    %c1_19 = arith.constant 1 : index
    %c1_20 = arith.constant 1 : index
    %c0_21 = arith.constant 0 : index
    %12 = vector.load %arg2[%c0_17, %c0_18, %c1_19, %c1_20, %c0_21] : memref<1x1x10x18x8xbf16, #tpu.memory_space<vmem>>, vector<1x1x8x16x8xbf16>
    %13 = vector.shape_cast %12 : vector<1x1x8x16x8xbf16> to vector<8x16x8xbf16>
    %14 = vector.shape_cast %13 : vector<8x16x8xbf16> to vector<128x8xbf16>
    %c0_22 = arith.constant 0 : index
    %c0_23 = arith.constant 0 : index
    %c1_24 = arith.constant 1 : index
    %c2_25 = arith.constant 2 : index
    %c0_26 = arith.constant 0 : index
    %15 = vector.load %arg2[%c0_22, %c0_23, %c1_24, %c2_25, %c0_26] : memref<1x1x10x18x8xbf16, #tpu.memory_space<vmem>>, vector<1x1x8x16x8xbf16>
    %16 = vector.shape_cast %15 : vector<1x1x8x16x8xbf16> to vector<8x16x8xbf16>
    %17 = vector.shape_cast %16 : vector<8x16x8xbf16> to vector<128x8xbf16>
    %c0_27 = arith.constant 0 : index
    %c0_28 = arith.constant 0 : index
    %c2_29 = arith.constant 2 : index
    %c0_30 = arith.constant 0 : index
    %c0_31 = arith.constant 0 : index
    %18 = vector.load %arg2[%c0_27, %c0_28, %c2_29, %c0_30, %c0_31] : memref<1x1x10x18x8xbf16, #tpu.memory_space<vmem>>, vector<1x1x8x16x8xbf16>
    %19 = vector.shape_cast %18 : vector<1x1x8x16x8xbf16> to vector<8x16x8xbf16>
    %20 = vector.shape_cast %19 : vector<8x16x8xbf16> to vector<128x8xbf16>
    %c0_32 = arith.constant 0 : index
    %c0_33 = arith.constant 0 : index
    %c2_34 = arith.constant 2 : index
    %c1_35 = arith.constant 1 : index
    %c0_36 = arith.constant 0 : index
    %21 = vector.load %arg2[%c0_32, %c0_33, %c2_34, %c1_35, %c0_36] : memref<1x1x10x18x8xbf16, #tpu.memory_space<vmem>>, vector<1x1x8x16x8xbf16>
    %22 = vector.shape_cast %21 : vector<1x1x8x16x8xbf16> to vector<8x16x8xbf16>
    %23 = vector.shape_cast %22 : vector<8x16x8xbf16> to vector<128x8xbf16>
    %c0_37 = arith.constant 0 : index
    %c0_38 = arith.constant 0 : index
    %c2_39 = arith.constant 2 : index
    %c2_40 = arith.constant 2 : index
    %c0_41 = arith.constant 0 : index
    %24 = vector.load %arg2[%c0_37, %c0_38, %c2_39, %c2_40, %c0_41] : memref<1x1x10x18x8xbf16, #tpu.memory_space<vmem>>, vector<1x1x8x16x8xbf16>
    %25 = vector.shape_cast %24 : vector<1x1x8x16x8xbf16> to vector<8x16x8xbf16>
    %26 = vector.shape_cast %25 : vector<8x16x8xbf16> to vector<128x8xbf16>
    %27 = tpu.concatenate %2, %5, %8, %11, %14, %17, %20, %23, %26 in 1 : vector<128x8xbf16>, vector<128x8xbf16>, vector<128x8xbf16>, vector<128x8xbf16>, vector<128x8xbf16>, vector<128x8xbf16>, vector<128x8xbf16>, vector<128x8xbf16>, vector<128x8xbf16> -> vector<128x72xbf16>
    %c0_42 = arith.constant 0 : index
    %c0_43 = arith.constant 0 : index
    %28 = vector.load %arg3[%c0_42, %c0_43] : memref<72x8xbf16, #tpu.memory_space<vmem>>, vector<72x8xbf16>
    %cst = arith.constant dense<0.000000e+00> : vector<128x8xf32>
    %29 = tpu.matmul %27, %28, %cst {dimension_numbers = #tpu.dot_dimension_numbers<[1], [0], [0], [1], [0, 0, 1, 1], [], []>} : vector<128x72xbf16>, vector<72x8xbf16>, vector<128x8xf32> -> vector<128x8xf32>
    %c0_44 = arith.constant 0 : index
    %c0_45 = arith.constant 0 : index
    %c0_46 = arith.constant 0 : index
    %c0_47 = arith.constant 0 : index
    %30 = vector.load %arg4[%c0_44, %c0_45, %c0_46, %c0_47] : memref<1x1x128x8xf32, #tpu.memory_space<vmem>>, vector<1x1x128x8xf32>
    %31 = vector.shape_cast %30 : vector<1x1x128x8xf32> to vector<128x8xf32>
    %32 = vector.shape_cast %29 : vector<128x8xf32> to vector<1x1x128x8xf32>
    tpu.vector_store %arg4[%c0_44, %c0_45, %c0_46, %c0_47], %32 {strides = array<i32>} : memref<1x1x128x8xf32, #tpu.memory_space<vmem>>, vector<1x1x128x8xf32>,
    %cst_48 = arith.constant dense<0.000000e+00> : vector<8xf32>
    %33 = vector.multi_reduction <add>, %29, %cst_48 [0] : vector<128x8xf32> to vector<8xf32>
    %34 = vector.shape_cast %33 : vector<8xf32> to vector<1x8xf32>
    %c0_49 = arith.constant 0 : index
    %c0_50 = arith.constant 0 : index
    %c0_51 = arith.constant 0 : index
    %c0_52 = arith.constant 0 : index
    %35 = vector.load %arg5[%c0_49, %c0_50, %c0_51, %c0_52] : memref<1x1x1x8xf32, #tpu.memory_space<vmem>>, vector<1x1x1x8xf32>
    %36 = vector.shape_cast %35 : vector<1x1x1x8xf32> to vector<1x8xf32>
    %37 = vector.shape_cast %34 : vector<1x8xf32> to vector<1x1x1x8xf32>
    tpu.vector_store %arg5[%c0_49, %c0_50, %c0_51, %c0_52], %37 {strides = array<i32>} : memref<1x1x1x8xf32, #tpu.memory_space<vmem>>, vector<1x1x1x8xf32>,
    %38 = arith.mulf %29, %29 : vector<128x8xf32>
    %cst_53 = arith.constant dense<0.000000e+00> : vector<8xf32>
    %39 = vector.multi_reduction <add>, %38, %cst_53 [0] : vector<128x8xf32> to vector<8xf32>
    %40 = vector.shape_cast %39 : vector<8xf32> to vector<1x8xf32>
    %c0_54 = arith.constant 0 : index
    %c0_55 = arith.constant 0 : index
    %c0_56 = arith.constant 0 : index
    %c0_57 = arith.constant 0 : index
    %41 = vector.load %arg6[%c0_54, %c0_55, %c0_56, %c0_57] : memref<1x1x1x8xf32, #tpu.memory_space<vmem>>, vector<1x1x1x8xf32>
    %42 = vector.shape_cast %41 : vector<1x1x1x8xf32> to vector<1x8xf32>
    %43 = vector.shape_cast %40 : vector<1x8xf32> to vector<1x1x1x8xf32>
    tpu.vector_store %arg6[%c0_54, %c0_55, %c0_56, %c0_57], %43 {strides = array<i32>} : memref<1x1x1x8xf32, #tpu.memory_space<vmem>>, vector<1x1x1x8xf32>,
    return
  }
  func.func @transform_0(%arg0: i32, %arg1: i32) -> (i32, i32, i32, i32, i32) {
    %c0_i32 = arith.constant 0 : i32
    %c0_i32_0 = arith.constant 0 : i32
    %c0_i32_1 = arith.constant 0 : i32
    %c0_i32_2 = arith.constant 0 : i32
    return %arg0, %arg1, %c0_i32, %c0_i32_0, %c0_i32_1 : i32, i32, i32, i32, i32
  }
  func.func @transform_1(%arg0: i32, %arg1: i32) -> (i32, i32) {
    %c0_i32 = arith.constant 0 : i32
    %c0_i32_0 = arith.constant 0 : i32
    %c0_i32_1 = arith.constant 0 : i32
    return %c0_i32, %c0_i32_0 : i32, i32
  }
  func.func @transform_2(%arg0: i32, %arg1: i32) -> (i32, i32, i32, i32) {
    %c0_i32 = arith.constant 0 : i32
    %c0_i32_0 = arith.constant 0 : i32
    %c0_i32_1 = arith.constant 0 : i32
    return %arg0, %arg1, %c0_i32, %c0_i32_0 : i32, i32, i32, i32
  }
  func.func @transform_3(%arg0: i32, %arg1: i32) -> (i32, i32, i32, i32) {
    %c0_i32 = arith.constant 0 : i32
    %c0_i32_0 = arith.constant 0 : i32
    %c0_i32_1 = arith.constant 0 : i32
    return %arg0, %arg1, %c0_i32, %c0_i32_0 : i32, i32, i32, i32
  }
  func.func @transform_4(%arg0: i32, %arg1: i32) -> (i32, i32, i32, i32) {
    %c0_i32 = arith.constant 0 : i32
    %c0_i32_0 = arith.constant 0 : i32
    %c0_i32_1 = arith.constant 0 : i32
    return %arg0, %arg1, %c0_i32, %c0_i32_0 : i32, i32, i32, i32
  }
}

module attributes {stable_mosaic.version = 11 : i64} {
  func.func @_bn_relu_pool_kernel(%arg0: i32, %arg1: i32, %arg2: memref<1x1x128x8xf32, #tpu.memory_space<vmem>>, %arg3: memref<1x8xf32, #tpu.memory_space<vmem>>, %arg4: memref<1x8xf32, #tpu.memory_space<vmem>>, %arg5: memref<1x8xf32, #tpu.memory_space<vmem>>, %arg6: memref<1x8xf32, #tpu.memory_space<vmem>>, %arg7: memref<1x1x128x8xf32, #tpu.memory_space<vmem>>, %arg8: memref<1x1x32x8xf32, #tpu.memory_space<vmem>>, %arg9: memref<64x8xf32, #tpu.memory_space<vmem>>) attributes {dimension_semantics = [#tpu.dimension_semantics<parallel>, #tpu.dimension_semantics<parallel>], iteration_bounds = array<i64: 2, 2>, scalar_prefetch = 0 : i64, scratch_operands = 1 : i64, tpu.core_type = #tpu.core_type<tc>, window_params = [{transform_indices = @transform_0, window_bounds = array<i64: 1, 1, 128, 8>}, {pipeline_mode = #tpu.pipeline_mode<synchronous>, transform_indices = @transform_1, window_bounds = array<i64: 1, 8>}, {pipeline_mode = #tpu.pipeline_mode<synchronous>, transform_indices = @transform_2, window_bounds = array<i64: 1, 8>}, {pipeline_mode = #tpu.pipeline_mode<synchronous>, transform_indices = @transform_3, window_bounds = array<i64: 1, 8>}, {pipeline_mode = #tpu.pipeline_mode<synchronous>, transform_indices = @transform_4, window_bounds = array<i64: 1, 8>}, {transform_indices = @transform_5, window_bounds = array<i64: 1, 1, 128, 8>}, {transform_indices = @transform_6, window_bounds = array<i64: 1, 1, 32, 8>}]} {
    %c0 = arith.constant 0 : index
    %c0_0 = arith.constant 0 : index
    %0 = vector.load %arg3[%c0, %c0_0] : memref<1x8xf32, #tpu.memory_space<vmem>>, vector<1x8xf32>
    %cst = arith.constant 0.001953125 : f32
    %1 = vector.broadcast %cst : f32 to vector<1x8xf32>
    %2 = arith.mulf %0, %1 : vector<1x8xf32>
    %c0_1 = arith.constant 0 : index
    %c0_2 = arith.constant 0 : index
    %3 = vector.load %arg4[%c0_1, %c0_2] : memref<1x8xf32, #tpu.memory_space<vmem>>, vector<1x8xf32>
    %cst_3 = arith.constant 0.001953125 : f32
    %4 = vector.broadcast %cst_3 : f32 to vector<1x8xf32>
    %5 = arith.mulf %3, %4 : vector<1x8xf32>
    %6 = arith.mulf %2, %2 : vector<1x8xf32>
    %7 = arith.subf %5, %6 : vector<1x8xf32>
    %c0_4 = arith.constant 0 : index
    %c0_5 = arith.constant 0 : index
    %8 = vector.load %arg5[%c0_4, %c0_5] : memref<1x8xf32, #tpu.memory_space<vmem>>, vector<1x8xf32>
    %cst_6 = arith.constant 9.99999974E-6 : f32
    %9 = vector.broadcast %cst_6 : f32 to vector<1x8xf32>
    %10 = arith.addf %7, %9 : vector<1x8xf32>
    %11 = math.rsqrt %10 : vector<1x8xf32>
    %12 = arith.mulf %8, %11 : vector<1x8xf32>
    %c0_7 = arith.constant 0 : index
    %c0_8 = arith.constant 0 : index
    %13 = vector.load %arg6[%c0_7, %c0_8] : memref<1x8xf32, #tpu.memory_space<vmem>>, vector<1x8xf32>
    %14 = arith.mulf %2, %12 : vector<1x8xf32>
    %15 = arith.subf %13, %14 : vector<1x8xf32>
    %c0_9 = arith.constant 0 : index
    %c0_10 = arith.constant 0 : index
    %c0_11 = arith.constant 0 : index
    %c0_12 = arith.constant 0 : index
    %16 = vector.load %arg2[%c0_9, %c0_10, %c0_11, %c0_12] : memref<1x1x128x8xf32, #tpu.memory_space<vmem>>, vector<1x1x128x8xf32>
    %17 = vector.shape_cast %16 : vector<1x1x128x8xf32> to vector<128x8xf32>
    %18 = vector.broadcast %12 : vector<1x8xf32> to vector<128x8xf32>
    %19 = arith.mulf %17, %18 : vector<128x8xf32>
    %20 = vector.broadcast %15 : vector<1x8xf32> to vector<128x8xf32>
    %21 = arith.addf %19, %20 : vector<128x8xf32>
    %cst_13 = arith.constant 0.000000e+00 : f32
    %22 = vector.broadcast %cst_13 : f32 to vector<128x8xf32>
    %23 = arith.maximumf %21, %22 : vector<128x8xf32>
    %c0_14 = arith.constant 0 : index
    %c0_15 = arith.constant 0 : index
    %c0_16 = arith.constant 0 : index
    %c0_17 = arith.constant 0 : index
    %24 = vector.load %arg7[%c0_14, %c0_15, %c0_16, %c0_17] : memref<1x1x128x8xf32, #tpu.memory_space<vmem>>, vector<1x1x128x8xf32>
    %25 = vector.shape_cast %24 : vector<1x1x128x8xf32> to vector<128x8xf32>
    %26 = vector.shape_cast %23 : vector<128x8xf32> to vector<1x1x128x8xf32>
    tpu.vector_store %arg7[%c0_14, %c0_15, %c0_16, %c0_17], %26 {strides = array<i32>} : memref<1x1x128x8xf32, #tpu.memory_space<vmem>>, vector<1x1x128x8xf32>,
    %27 = vector.shape_cast %23 : vector<128x8xf32> to vector<4x2x16x8xf32>
    %cst_18 = arith.constant dense<0xFF800000> : vector<4x16x8xf32>
    %28 = vector.multi_reduction <maximumf>, %27, %cst_18 [1] : vector<4x2x16x8xf32> to vector<4x16x8xf32>
    %29 = vector.shape_cast %28 : vector<4x16x8xf32> to vector<64x8xf32>
    %c0_19 = arith.constant 0 : index
    %c0_20 = arith.constant 0 : index
    %30 = vector.load %arg9[%c0_19, %c0_20] : memref<64x8xf32, #tpu.memory_space<vmem>>, vector<64x8xf32>
    tpu.vector_store %arg9[%c0_19, %c0_20], %29 {strides = array<i32>} : memref<64x8xf32, #tpu.memory_space<vmem>>, vector<64x8xf32>,
    %c0_21 = arith.constant 0 : index
    %c0_22 = arith.constant 0 : index
    %31 = tpu.strided_load %arg9[%c0_21, %c0_22] {strides = array<i32: 2, 1>} : memref<64x8xf32, #tpu.memory_space<vmem>>, vector<32x8xf32>
    %c1 = arith.constant 1 : index
    %c0_23 = arith.constant 0 : index
    %32 = tpu.strided_load %arg9[%c1, %c0_23] {strides = array<i32: 2, 1>} : memref<64x8xf32, #tpu.memory_space<vmem>>, vector<32x8xf32>
    %33 = arith.maximumf %31, %32 : vector<32x8xf32>
    %c0_24 = arith.constant 0 : index
    %c0_25 = arith.constant 0 : index
    %c0_26 = arith.constant 0 : index
    %c0_27 = arith.constant 0 : index
    %34 = vector.load %arg8[%c0_24, %c0_25, %c0_26, %c0_27] : memref<1x1x32x8xf32, #tpu.memory_space<vmem>>, vector<1x1x32x8xf32>
    %35 = vector.shape_cast %34 : vector<1x1x32x8xf32> to vector<32x8xf32>
    %36 = vector.shape_cast %33 : vector<32x8xf32> to vector<1x1x32x8xf32>
    tpu.vector_store %arg8[%c0_24, %c0_25, %c0_26, %c0_27], %36 {strides = array<i32>} : memref<1x1x32x8xf32, #tpu.memory_space<vmem>>, vector<1x1x32x8xf32>,
    return
  }
  func.func @transform_0(%arg0: i32, %arg1: i32) -> (i32, i32, i32, i32) {
    %c0_i32 = arith.constant 0 : i32
    %c0_i32_0 = arith.constant 0 : i32
    %c0_i32_1 = arith.constant 0 : i32
    return %arg0, %arg1, %c0_i32, %c0_i32_0 : i32, i32, i32, i32
  }
  func.func @transform_1(%arg0: i32, %arg1: i32) -> (i32, i32) {
    %c0_i32 = arith.constant 0 : i32
    %c0_i32_0 = arith.constant 0 : i32
    %c0_i32_1 = arith.constant 0 : i32
    return %c0_i32, %c0_i32_0 : i32, i32
  }
  func.func @transform_2(%arg0: i32, %arg1: i32) -> (i32, i32) {
    %c0_i32 = arith.constant 0 : i32
    %c0_i32_0 = arith.constant 0 : i32
    %c0_i32_1 = arith.constant 0 : i32
    return %c0_i32, %c0_i32_0 : i32, i32
  }
  func.func @transform_3(%arg0: i32, %arg1: i32) -> (i32, i32) {
    %c0_i32 = arith.constant 0 : i32
    %c0_i32_0 = arith.constant 0 : i32
    %c0_i32_1 = arith.constant 0 : i32
    return %c0_i32, %c0_i32_0 : i32, i32
  }
  func.func @transform_4(%arg0: i32, %arg1: i32) -> (i32, i32) {
    %c0_i32 = arith.constant 0 : i32
    %c0_i32_0 = arith.constant 0 : i32
    %c0_i32_1 = arith.constant 0 : i32
    return %c0_i32, %c0_i32_0 : i32, i32
  }
  func.func @transform_5(%arg0: i32, %arg1: i32) -> (i32, i32, i32, i32) {
    %c0_i32 = arith.constant 0 : i32
    %c0_i32_0 = arith.constant 0 : i32
    %c0_i32_1 = arith.constant 0 : i32
    return %arg0, %arg1, %c0_i32, %c0_i32_0 : i32, i32, i32, i32
  }
  func.func @transform_6(%arg0: i32, %arg1: i32) -> (i32, i32, i32, i32) {
    %c0_i32 = arith.constant 0 : i32
    %c0_i32_0 = arith.constant 0 : i32
    %c0_i32_1 = arith.constant 0 : i32
    return %arg0, %arg1, %c0_i32, %c0_i32_0 : i32, i32, i32, i32
  }
}

</mosaic_0001>

<bundles_post_ra>
// kernel: downsample_forward.5
= control target key start
LH: loop header
LB: loop body
LE: loop exit
PB: predicated region body
PF: predicated region fallthrough
CT: control target
= control target key end

     0   :  { %s683_s18 = smov 0   ;;  %s685_s19 = smov 0   ;;  %s820_s0 = inlined_call_operand.vmem [shape: f32[2,2,128,8], index: 0, kind: input, shape index: {}]   ;;  %s821_s1 = inlined_call_operand.vmem [shape: f32[1,8], index: 1, kind: input, shape index: {}]   ;;  %s822_s2 = inlined_call_operand.vmem [shape: f32[1,8], index: 2, kind: input, shape index: {}]   ;;  %s823_s3 = inlined_call_operand.vmem [shape: f32[1,8], index: 3, kind: input, shape index: {}]   ;;  %s824_s4 = inlined_call_operand.vmem [shape: f32[1,8], index: 4, kind: input, shape index: {}]   ;;  %s825_s5 = inlined_call_operand.vmem [shape: bf16[2,2,128,8], index: 5, kind: output, shape index: {}]  }
   0x1   :  { %s687_s20 = smov 0   ;;  %s689_s21 = smov 0  }
   0x2   :  { %s691_s22 = smov 0  }
   0x3 LB: > { %s24_s23 = sadd.s32 1, %s643_s20  ;;  %s27_s24 = sadd.s32 1, %s647_s21  ;;  %s651_s22 = sphi %s691_s22, %s15_s22   ;;  %s647_s21 = sphi %s689_s21, %s829_s21   ;;  %s643_s20 = sphi %s687_s20, %s828_s20   ;;  %s639_s19 = sphi %s685_s19, %s827_s19   ;;  %s635_s18 = sphi %s683_s18, %s826_s18  }
   0x4   : > { %p25_p0 = scmp.ge.s32.totalorder %s24_s23, 2  ;;  %p530_p1 = scmp.ge.s32.totalorder %s651_s22, 1 }
   0x5   : > { %p207_p2 = scmp.lt.s32.totalorder %s651_s22, 5 }
   0x6   : > { %s831_s23 = smov (%p25_p0, %s24_s23), 0  ;;  %s833_s24 = smov (!%p25_p0, %s27_s24), %s647_s21 }
   0x7   : > { %p208_p3 = pnand %p530_p1, %p207_p2  ;;  %p29_p4 = scmp.ge.s32.totalorder %s833_s24, 2 }
   0x8   : > { %p243_p5 = scmp.lt.s32.totalorder (!%p208_p3), %s639_s19, 1  ;;  %p245_p6 = scmp.lt.s32.totalorder (!%p208_p3), %s635_s18, 1  ;;  %v261_v0 = vld [vmem:[%s821_s1] sm:$0x1] (!%p208_p3)  ;;  %v291_v7 = vlaneseq (!%p208_p3)  ;;  %vm414_vm0 = vcmask (!%p208_p3), 60416  }
   0x9   : > { %s835_s24 = smov (%p29_p4, %s833_s24), 0  ;;  %211 = sbr.rel (%p208_p3) target bundleno = 54 (0x36), region = 40 }
   0xa   : > { %v263_v1 = vld [vmem:[%s822_s2] sm:$0x1] (!%p208_p3)  ;;  %v262_v2 = vmul.f32 (!%p208_p3), 0.001953125, %v261_v0  ;;  %v292_v8 = vshrl.u32 (!%p208_p3), %v291_v7, 7 }
   0xb   : > { %v264_v3 = vmul.f32 (!%p208_p3), 0.001953125, %v263_v1  ;;  %v267_v9 = vld [vmem:[%s823_s3] sm:$0x1] (!%p208_p3) }
   0xc   : > { %v265_v4 = vmul.f32 (!%p208_p3), %v262_v2, %v262_v2  ;;  %v293_v10 = vsub.s32 (!%p208_p3), 0, %v292_v8  ;;  %v271_v13 = vld [vmem:[%s824_s4] sm:$0x1] (!%p208_p3) }
   0xe   : > { %v266_v5 = vsub.f32 (!%p208_p3), %v264_v3, %v265_v4 }
  0x10   : > { %s837_s19 = smov (!%p243_p5, %s639_s19), 1  ;;  %s839_s18 = smov (!%p245_p6, %s635_s18), 1  ;;  %v268_v6 = vadd.f32 1e-05, %v266_v5 }
  0x11   : > { %s531_s29 = sshll.u32 %s839_s18, 4  ;;  %s532_s30 = sshll.u32 %s837_s19, 5 }
  0x12   : > { %611 = vrsqrt.f32 %v268_v6  ;;  %s719_s6 = sadd.s32 %s532_s30, %s531_s29 }
  0x13   : > { %s533_s7 = sshll.u32 %s719_s6, 3  ;;  %s536_s15 = sshll.u32 %s719_s6, 2 }
  0x14   : > { %s725_s10 = scalar_lea.vmem %s820_s0, %s533_s7  ;;  %s767_s18 = scalar_lea.vmem %s825_s5, %s536_s15 }
  0x15   : > { %v274_v14 = vld [vmem:[%s725_s10] sm:$0xff]  ;;  %v275_v15 = vld [vmem:[%s725_s10 + $0x8] sm:$0xff]  ;;  %v276_v16 = vld [vmem:[%s725_s10 + $0x10] sm:$0xff] }
  0x16   : > { %v277_v17 = vld [vmem:[%s725_s10 + $0x18] sm:$0xff]  ;;  %v278_v18 = vld [vmem:[%s725_s10 + $0x20] sm:$0xff]  ;;  %v279_v21 = vld [vmem:[%s725_s10 + $0x28] sm:$0xff] }
  0x17   : > { %v280_v22 = vld [vmem:[%s725_s10 + $0x30] sm:$0xff]  ;;  %v281_v23 = vld [vmem:[%s725_s10 + $0x38] sm:$0xff]  ;;  %v282_v24 = vld [vmem:[%s725_s10 + $0x40] sm:$0xff] }
  0x18   : > { %v283_v25 = vld [vmem:[%s725_s10 + $0x48] sm:$0xff]  ;;  %v284_v26 = vld [vmem:[%s725_s10 + $0x50] sm:$0xff]  ;;  %v285_v31 = vld [vmem:[%s725_s10 + $0x58] sm:$0xff] }
  0x19   : > { %v286_v32 = vld [vmem:[%s725_s10 + $0x60] sm:$0xff]  ;;  %v287_v33 = vld [vmem:[%s725_s10 + $0x68] sm:$0xff]  ;;  %v289_v3 = vld [vmem:[%s725_s10 + $0x78] sm:$0xff] }
  0x1c   : > { %v612_v11 = vpop.eup %611 }
  0x1d   : > { %v270_v12 = vmul.f32 %v612_v11, %v267_v9 }
  0x1f   : > { %v272_v19 = vmul.f32 %v270_v12, %v262_v2  ;;  %v738_v20 = vrot.slane %v270_v12, %v293_v10  ;;  %v288_v2 = vld [vmem:[%s725_s10 + $0x70] sm:$0xff] }
  0x21   : > { %v273_v27 = vsub.f32 %v271_v13, %v272_v19  ;;  %v296_v28 = vmul.f32 %v738_v20, %v274_v14  ;;  %v297_v29 = vmul.f32 %v738_v20, %v275_v15  ;;  %v298_v30 = vmul.f32 %v738_v20, %v276_v16 }
  0x22   : > { %v299_v34 = vmul.f32 %v738_v20, %v277_v17  ;;  %v300_v35 = vmul.f32 %v738_v20, %v278_v18  ;;  %v301_v36 = vmul.f32 %v738_v20, %v279_v21  ;;  %v302_v37 = vmul.f32 %v738_v20, %v280_v22 }
  0x23   : > { %v316_v38 = vrot.slane %v273_v27, %v293_v10  ;;  %v303_v39 = vmul.f32 %v738_v20, %v281_v23  ;;  %v304_v40 = vmul.f32 %v738_v20, %v282_v24  ;;  %v305_v41 = vmul.f32 %v738_v20, %v283_v25 }
  0x24   : > { %v306_v42 = vmul.f32 %v738_v20, %v284_v26  ;;  %v307_v43 = vmul.f32 %v738_v20, %v285_v31  ;;  %v308_v44 = vmul.f32 %v738_v20, %v286_v32  ;;  %v309_v45 = vmul.f32 %v738_v20, %v287_v33 }
  0x25   : > { %v318_v46 = vadd.f32 %v316_v38, %v296_v28  ;;  %v319_v47 = vadd.f32 %v316_v38, %v297_v29  ;;  %v320_v48 = vadd.f32 %v316_v38, %v298_v30  ;;  %v321_v49 = vadd.f32 %v316_v38, %v299_v34 }
  0x26   : > { %v322_v50 = vadd.f32 %v316_v38, %v300_v35  ;;  %v323_v51 = vadd.f32 %v316_v38, %v301_v36  ;;  %v324_v52 = vadd.f32 %v316_v38, %v302_v37  ;;  %v325_v53 = vadd.f32 %v316_v38, %v303_v39 }
  0x27   : > { %v334_v54 = vmax.f32 %v318_v46, 0.0  ;;  %v335_v55 = vmax.f32 %v319_v47, 0.0  ;;  %v336_v56 = vmax.f32 %v320_v48, 0.0  ;;  %v337_v57 = vmax.f32 %v321_v49, 0.0 }
  0x28   : > { %v338_v58 = vmax.f32 %v322_v50, 0.0  ;;  %v339_v59 = vmax.f32 %v323_v51, 0.0  ;;  %v340_v60 = vmax.f32 %v324_v52, 0.0  ;;  %v341_v61 = vmax.f32 %v325_v53, 0.0 }
  0x29   : > { %v555_v62 = vpack.c.bf16 %v334_v54, %v334_v54  ;;  %v556_v63 = vpack.c.bf16 %v335_v55, %v335_v55  ;;  %v557_v0 = vpack.c.bf16 %v336_v56, %v336_v56  ;;  %v558_v1 = vpack.c.bf16 %v337_v57, %v337_v57 }
  0x2a   : > { %v559_v4 = vpack.c.bf16 %v338_v58, %v338_v58  ;;  %v560_v5 = vpack.c.bf16 %v339_v59, %v339_v59  ;;  %v561_v6 = vpack.c.bf16 %v340_v60, %v340_v60  ;;  %v562_v7 = vpack.c.bf16 %v341_v61, %v341_v61 }
  0x2b   : > { %415 = vst.msk [vmem:[%s767_s18] sm:$0xf] %vm414_vm0, %v555_v62  ;;  %416 = vst.msk [vmem:[%s767_s18 + $0x4] sm:$0xf] %vm414_vm0, %v556_v63  ;;  %v326_v8 = vadd.f32 %v316_v38, %v304_v40  ;;  %v327_v9 = vadd.f32 %v316_v38, %v305_v41  ;;  %v328_v10 = vadd.f32 %v316_v38, %v306_v42 }
  0x2c   : > { %417 = vst.msk [vmem:[%s767_s18 + $0x8] sm:$0xf] %vm414_vm0, %v557_v0  ;;  %418 = vst.msk [vmem:[%s767_s18 + $0xc] sm:$0xf] %vm414_vm0, %v558_v1  ;;  %v329_v11 = vadd.f32 %v316_v38, %v307_v43  ;;  %v330_v12 = vadd.f32 %v316_v38, %v308_v44  ;;  %v331_v13 = vadd.f32 %v316_v38, %v309_v45 }
  0x2d   : > { %419 = vst.msk [vmem:[%s767_s18 + $0x10] sm:$0xf] %vm414_vm0, %v559_v4  ;;  %420 = vst.msk [vmem:[%s767_s18 + $0x14] sm:$0xf] %vm414_vm0, %v560_v5  ;;  %v310_v14 = vmul.f32 %v738_v20, %v288_v2  ;;  %v311_v15 = vmul.f32 %v738_v20, %v289_v3  ;;  %v342_v16 = vmax.f32 %v326_v8, 0.0  ;;  %v343_v17 = vmax.f32 %v327_v9, 0.0 }
  0x2e   : > { %421 = vst.msk [vmem:[%s767_s18 + $0x18] sm:$0xf] %vm414_vm0, %v561_v6  ;;  %422 = vst.msk [vmem:[%s767_s18 + $0x1c] sm:$0xf] %vm414_vm0, %v562_v7  ;;  %v344_v18 = vmax.f32 %v328_v10, 0.0  ;;  %v345_v19 = vmax.f32 %v329_v11, 0.0 }
  0x2f   : > { %v346_v21 = vmax.f32 %v330_v12, 0.0  ;;  %v347_v22 = vmax.f32 %v331_v13, 0.0  ;;  %v332_v23 = vadd.f32 %v316_v38, %v310_v14  ;;  %v333_v24 = vadd.f32 %v316_v38, %v311_v15 }
  0x30   : > { %v563_v25 = vpack.c.bf16 %v342_v16, %v342_v16  ;;  %v564_v26 = vpack.c.bf16 %v343_v17, %v343_v17  ;;  %v565_v27 = vpack.c.bf16 %v344_v18, %v344_v18  ;;  %v566_v20 = vpack.c.bf16 %v345_v19, %v345_v19 }
  0x31   : > { %v567_v28 = vpack.c.bf16 %v346_v21, %v346_v21  ;;  %v568_v29 = vpack.c.bf16 %v347_v22, %v347_v22  ;;  %v348_v30 = vmax.f32 %v332_v23, 0.0  ;;  %v349_v31 = vmax.f32 %v333_v24, 0.0 }
  0x32   : > { %423 = vst.msk [vmem:[%s767_s18 + $0x20] sm:$0xf] %vm414_vm0, %v563_v25  ;;  %424 = vst.msk [vmem:[%s767_s18 + $0x24] sm:$0xf] %vm414_vm0, %v564_v26 }
  0x33   : > { %425 = vst.msk [vmem:[%s767_s18 + $0x28] sm:$0xf] %vm414_vm0, %v565_v27  ;;  %426 = vst.msk [vmem:[%s767_s18 + $0x2c] sm:$0xf] %vm414_vm0, %v566_v20  ;;  %v569_v32 = vpack.c.bf16 %v348_v30, %v348_v30  ;;  %v570_v33 = vpack.c.bf16 %v349_v31, %v349_v31 }
  0x34   : > { %427 = vst.msk [vmem:[%s767_s18 + $0x30] sm:$0xf] %vm414_vm0, %v567_v28  ;;  %428 = vst.msk [vmem:[%s767_s18 + $0x34] sm:$0xf] %vm414_vm0, %v568_v29 }
  0x35   : > { %429 = vst.msk [vmem:[%s767_s18 + $0x38] sm:$0xf] %vm414_vm0, %v569_v32  ;;  %430 = vst.msk [vmem:[%s767_s18 + $0x3c] sm:$0xf] %vm414_vm0, %v570_v33 }
  0x36 PF: > { %s15_s22 = sadd.s32 1, %s651_s22   ;;  %s826_s18 = smov %s643_s20 }
  0x37   : > { %p12_p7 = scmp.ge.s32.totalorder %s15_s22, 6   ;;  %s827_s19 = smov %s647_s21 }
  0x38   : > { %s828_s20 = smov %s831_s23  ;;  %s829_s21 = smov %s835_s24 }
  0x39   :  { %14 = sbr.rel (!%p12_p7) target bundleno = 3 (0x3), region = 70 }

// kernel: downsample_forward.7
= control target key start
LH: loop header
LB: loop body
LE: loop exit
PB: predicated region body
PF: predicated region fallthrough
CT: control target
= control target key end

     0   :  { %s753_s21 = smov 0   ;;  %s755_s22 = smov 0   ;;  %s953_s0 = inlined_call_operand.vmem [shape: f32[2,2,128,8], index: 0, kind: input, shape index: {}]   ;;  %s954_s1 = inlined_call_operand.vmem [shape: f32[1,8], index: 1, kind: input, shape index: {}]   ;;  %s955_s2 = inlined_call_operand.vmem [shape: f32[1,8], index: 2, kind: input, shape index: {}]   ;;  %s956_s3 = inlined_call_operand.vmem [shape: f32[1,8], index: 3, kind: input, shape index: {}]   ;;  %s957_s4 = inlined_call_operand.vmem [shape: f32[1,8], index: 4, kind: input, shape index: {}]   ;;  %s958_s5 = inlined_call_operand.vmem [shape: f32[2,2,128,8], index: 5, kind: output, shape index: {0}]   ;;  %s959_s6 = inlined_call_operand.vmem [shape: f32[2,2,32,8], index: 6, kind: output, shape index: {1}]  }
   0x1   :  { %s757_s23 = smov 0   ;;  %s759_s24 = smov 0  }
   0x2   :  { %s761_s25 = smov 0  }
   0x3 LB: > { %s26_s26 = sadd.s32 1, %s708_s23  ;;  %s29_s27 = sadd.s32 1, %s712_s24  ;;  %s716_s25 = sphi %s761_s25, %s17_s25   ;;  %s712_s24 = sphi %s759_s24, %s963_s24   ;;  %s708_s23 = sphi %s757_s23, %s962_s23   ;;  %s704_s22 = sphi %s755_s22, %s961_s22   ;;  %s700_s21 = sphi %s753_s21, %s960_s21  }
   0x4   : > { %p27_p0 = scmp.ge.s32.totalorder %s26_s26, 2  ;;  %p624_p1 = scmp.ge.s32.totalorder %s716_s25, 1 }
   0x5   : > { %p237_p2 = scmp.lt.s32.totalorder %s716_s25, 5 }
   0x6   : > { %s965_s26 = smov (%p27_p0, %s26_s26), 0  ;;  %s967_s27 = smov (!%p27_p0, %s29_s27), %s712_s24 }
   0x7   : > { %p238_p3 = pnand %p624_p1, %p237_p2  ;;  %p31_p4 = scmp.ge.s32.totalorder %s967_s27, 2 }
   0x8   : > { %p284_p5 = scmp.lt.s32.totalorder (!%p238_p3), %s704_s22, 1  ;;  %p286_p6 = scmp.lt.s32.totalorder (!%p238_p3), %s700_s21, 1  ;;  %v311_v0 = vld [vmem:[%s954_s1] sm:$0x1] (!%p238_p3)  ;;  %v341_v7 = vlaneseq (!%p238_p3)  ;;  %vm400_vm0 = vcmask (!%p238_p3), 64512  }
   0x9   : > { %s969_s27 = smov (%p31_p4, %s967_s27), 0  ;;  %241 = sbr.rel (%p238_p3) target bundleno = 67 (0x43), region = 40 }
   0xa   : > { %v313_v1 = vld [vmem:[%s955_s2] sm:$0x1] (!%p238_p3)  ;;  %v312_v2 = vmul.f32 (!%p238_p3), 0.001953125, %v311_v0  ;;  %v342_v8 = vshrl.u32 (!%p238_p3), %v341_v7, 7 }
   0xb   : > { %v314_v3 = vmul.f32 (!%p238_p3), 0.001953125, %v313_v1  ;;  %v317_v9 = vld [vmem:[%s956_s3] sm:$0x1] (!%p238_p3) }
   0xc   : > { %v315_v4 = vmul.f32 (!%p238_p3), %v312_v2, %v312_v2  ;;  %v343_v10 = vsub.s32 (!%p238_p3), 0, %v342_v8  ;;  %v321_v13 = vld [vmem:[%s957_s4] sm:$0x1] (!%p238_p3) }
   0xe   : > { %v316_v5 = vsub.f32 (!%p238_p3), %v314_v3, %v315_v4 }
  0x10   : > { %s971_s22 = smov (!%p284_p5, %s704_s22), 1  ;;  %s973_s21 = smov (!%p286_p6, %s700_s21), 1  ;;  %v318_v6 = vadd.f32 1e-05, %v316_v5 }
  0x11   : > { %s625_s8 = sshll.u32 %s973_s21, 4  ;;  %s626_s9 = sshll.u32 %s971_s22, 5 }
  0x12   : > { %676 = vrsqrt.f32 %v318_v6  ;;  %s795_s10 = sadd.s32 %s626_s9, %s625_s8  ;;  %s631_s29 = sshll.u32 %s973_s21, 2 }
  0x13   : > { %s627_s11 = sshll.u32 %s795_s10, 3  ;;  %s632_s30 = sshll.u32 %s971_s22, 3 }
  0x14   : > { %s803_s14 = scalar_lea.vmem %s953_s0, %s627_s11  ;;  %s856_s28 = scalar_lea.vmem %s958_s5, %s627_s11 }
  0x15   : > { %v324_v14 = vld [vmem:[%s803_s14] sm:$0xff]  ;;  %v326_v15 = vld [vmem:[%s803_s14 + $0x10] sm:$0xff]  ;;  %v325_v16 = vld [vmem:[%s803_s14 + $0x8] sm:$0xff]  ;;  %s896_s21 = sadd.s32 %s632_s30, %s631_s29 }
  0x16   : > { %v327_v17 = vld [vmem:[%s803_s14 + $0x18] sm:$0xff]  ;;  %v328_v18 = vld [vmem:[%s803_s14 + $0x20] sm:$0xff]  ;;  %v330_v21 = vld [vmem:[%s803_s14 + $0x30] sm:$0xff]  ;;  %s633_s22 = sshll.u32 %s896_s21, 3 }
  0x17   : > { %v329_v22 = vld [vmem:[%s803_s14 + $0x28] sm:$0xff]  ;;  %v331_v23 = vld [vmem:[%s803_s14 + $0x38] sm:$0xff]  ;;  %v332_v24 = vld [vmem:[%s803_s14 + $0x40] sm:$0xff]  ;;  %s310_s9 = scalar_lea.vmem %s959_s6, %s633_s22 }
  0x18   : > { %v334_v25 = vld [vmem:[%s803_s14 + $0x50] sm:$0xff]  ;;  %v333_v26 = vld [vmem:[%s803_s14 + $0x48] sm:$0xff]  ;;  %v335_v31 = vld [vmem:[%s803_s14 + $0x58] sm:$0xff] }
  0x19   : > { %v336_v32 = vld [vmem:[%s803_s14 + $0x60] sm:$0xff]  ;;  %v338_v33 = vld [vmem:[%s803_s14 + $0x70] sm:$0xff]  ;;  %v337_v6 = vld [vmem:[%s803_s14 + $0x68] sm:$0xff] }
  0x1c   : > { %v677_v11 = vpop.eup %676 }
  0x1d   : > { %v320_v12 = vmul.f32 %v677_v11, %v317_v9  ;;  %v339_v11 = vld [vmem:[%s803_s14 + $0x78] sm:$0xff] }
  0x1f   : > { %v322_v19 = vmul.f32 %v320_v12, %v312_v2  ;;  %v816_v20 = vrot.slane %v320_v12, %v343_v10 }
  0x21   : > { %v323_v27 = vsub.f32 %v321_v13, %v322_v19  ;;  %v346_v28 = vmul.f32 %v816_v20, %v324_v14  ;;  %v348_v29 = vmul.f32 %v816_v20, %v326_v15  ;;  %v347_v30 = vmul.f32 %v816_v20, %v325_v16 }
  0x22   : > { %v349_v34 = vmul.f32 %v816_v20, %v327_v17  ;;  %v350_v35 = vmul.f32 %v816_v20, %v328_v18  ;;  %v352_v36 = vmul.f32 %v816_v20, %v330_v21  ;;  %v351_v37 = vmul.f32 %v816_v20, %v329_v22 }
  0x23   : > { %v834_v38 = vrot.slane %v323_v27, %v343_v10  ;;  %v353_v39 = vmul.f32 %v816_v20, %v331_v23  ;;  %v354_v40 = vmul.f32 %v816_v20, %v332_v24  ;;  %v356_v41 = vmul.f32 %v816_v20, %v334_v25 }
  0x24   : > { %v355_v42 = vmul.f32 %v816_v20, %v333_v26  ;;  %v357_v43 = vmul.f32 %v816_v20, %v335_v31  ;;  %v358_v44 = vmul.f32 %v816_v20, %v336_v32  ;;  %v360_v45 = vmul.f32 %v816_v20, %v338_v33 }
  0x25   : > { %v368_v46 = vadd.f32 %v834_v38, %v346_v28  ;;  %v370_v47 = vadd.f32 %v834_v38, %v348_v29  ;;  %v369_v48 = vadd.f32 %v834_v38, %v347_v30  ;;  %v371_v49 = vadd.f32 %v834_v38, %v349_v34 }
  0x26   : > { %v372_v50 = vadd.f32 %v834_v38, %v350_v35  ;;  %v374_v51 = vadd.f32 %v834_v38, %v352_v36  ;;  %v373_v52 = vadd.f32 %v834_v38, %v351_v37  ;;  %v375_v53 = vadd.f32 %v834_v38, %v353_v39 }
  0x27   : > { %v384_v54 = vmax.f32 %v368_v46, 0.0  ;;  %v386_v55 = vmax.f32 %v370_v47, 0.0  ;;  %v385_v56 = vmax.f32 %v369_v48, 0.0  ;;  %v387_v57 = vmax.f32 %v371_v49, 0.0 }
  0x28   : > { %v388_v58 = vmax.f32 %v372_v50, 0.0  ;;  %v390_v59 = vmax.f32 %v374_v51, 0.0  ;;  %v389_v60 = vmax.f32 %v373_v52, 0.0  ;;  %v391_v61 = vmax.f32 %v375_v53, 0.0 }
  0x29   : > { %v417_v62 = vsel %vm400_vm0, %v384_v54, -inf  ;;  %v418_v63 = vsel %vm400_vm0, %v386_v55, -inf  ;;  %v420_v0 = vsel %vm400_vm0, %v385_v56, -inf  ;;  %v421_v1 = vsel %vm400_vm0, %v387_v57, -inf  ;;  %401 = vst.msk [vmem:[%s856_s28] sm:$0xff] %vm400_vm0, %v384_v54  ;;  %402 = vst.msk [vmem:[%s856_s28 + $0x8] sm:$0xff] %vm400_vm0, %v385_v56 }
  0x2a   : > { %403 = vst.msk [vmem:[%s856_s28 + $0x10] sm:$0xff] %vm400_vm0, %v386_v55  ;;  %404 = vst.msk [vmem:[%s856_s28 + $0x18] sm:$0xff] %vm400_vm0, %v387_v57  ;;  %v419_v2 = vmax.f32 %v417_v62, %v418_v63  ;;  %v422_v3 = vmax.f32 %v420_v0, %v421_v1  ;;  %v423_v4 = vsel %vm400_vm0, %v388_v58, -inf  ;;  %v424_v5 = vsel %vm400_vm0, %v390_v59, -inf }
  0x2b   : > { %405 = vst.msk [vmem:[%s856_s28 + $0x20] sm:$0xff] %vm400_vm0, %v388_v58  ;;  %406 = vst.msk [vmem:[%s856_s28 + $0x28] sm:$0xff] %vm400_vm0, %v389_v60  ;;  %v425_v7 = vmax.f32 %v423_v4, %v424_v5  ;;  %v426_v8 = vsel %vm400_vm0, %v389_v60, -inf  ;;  %v427_v9 = vsel %vm400_vm0, %v391_v61, -inf  ;;  %v376_v10 = vadd.f32 %v834_v38, %v354_v40 }
  0x2c   : > { %407 = vst.msk [vmem:[%s856_s28 + $0x30] sm:$0xff] %vm400_vm0, %v390_v59  ;;  %408 = vst.msk [vmem:[%s856_s28 + $0x38] sm:$0xff] %vm400_vm0, %v391_v61  ;;  %v428_v12 = vmax.f32 %v426_v8, %v427_v9  ;;  %v378_v13 = vadd.f32 %v834_v38, %v356_v41  ;;  %v377_v14 = vadd.f32 %v834_v38, %v355_v42 }
  0x2d   : > { %441 = vst.msk [vmem:[#allocation2] sm:$0xff] %vm400_vm0, %v419_v2  ;;  %442 = vst.msk [vmem:[#allocation2 + $0x8] sm:$0xff] %vm400_vm0, %v422_v3  ;;  %v379_v15 = vadd.f32 %v834_v38, %v357_v43  ;;  %v392_v16 = vmax.f32 %v376_v10, 0.0  ;;  %v380_v17 = vadd.f32 %v834_v38, %v358_v44  ;;  %v382_v18 = vadd.f32 %v834_v38, %v360_v45 }
  0x2e   : > { %443 = vst.msk [vmem:[#allocation2 + $0x10] sm:$0xff] %vm400_vm0, %v425_v7  ;;  %v359_v19 = vmul.f32 %v816_v20, %v337_v6  ;;  %444 = vst.msk [vmem:[#allocation2 + $0x18] sm:$0xff] %vm400_vm0, %v428_v12  ;;  %v394_v21 = vmax.f32 %v378_v13, 0.0  ;;  %v393_v22 = vmax.f32 %v377_v14, 0.0  ;;  %v361_v24 = vmul.f32 %v816_v20, %v339_v11 }
  0x2f   : > { %v395_v23 = vmax.f32 %v379_v15, 0.0  ;;  %v429_v25 = vsel %vm400_vm0, %v392_v16, -inf  ;;  %v396_v26 = vmax.f32 %v380_v17, 0.0  ;;  %v398_v27 = vmax.f32 %v382_v18, 0.0  ;;  %409 = vst.msk [vmem:[%s856_s28 + $0x40] sm:$0xff] %vm400_vm0, %v392_v16 }
  0x30   : > { %v381_v28 = vadd.f32 %v834_v38, %v359_v19  ;;  %v430_v29 = vsel %vm400_vm0, %v394_v21, -inf  ;;  %v432_v30 = vsel %vm400_vm0, %v393_v22, -inf  ;;  %v383_v32 = vadd.f32 %v834_v38, %v361_v24  ;;  %410 = vst.msk [vmem:[%s856_s28 + $0x48] sm:$0xff] %vm400_vm0, %v393_v22  ;;  %411 = vst.msk [vmem:[%s856_s28 + $0x50] sm:$0xff] %vm400_vm0, %v394_v21 }
  0x31   : > { %v433_v31 = vsel %vm400_vm0, %v395_v23, -inf  ;;  %412 = vst.msk [vmem:[%s856_s28 + $0x58] sm:$0xff] %vm400_vm0, %v395_v23  ;;  %v431_v20 = vmax.f32 %v429_v25, %v430_v29  ;;  %v435_v34 = vsel %vm400_vm0, %v396_v26, -inf  ;;  %v436_v35 = vsel %vm400_vm0, %v398_v27, -inf  ;;  %413 = vst.msk [vmem:[%s856_s28 + $0x60] sm:$0xff] %vm400_vm0, %v396_v26 }
  0x32   : > { %v434_v33 = vmax.f32 %v432_v30, %v433_v31  ;;  %415 = vst.msk [vmem:[%s856_s28 + $0x70] sm:$0xff] %vm400_vm0, %v398_v27  ;;  %v437_v36 = vmax.f32 %v435_v34, %v436_v35  ;;  %v397_v37 = vmax.f32 %v381_v28, 0.0  ;;  %v399_v38 = vmax.f32 %v383_v32, 0.0 }
  0x33   : > { %445 = vst.msk [vmem:[#allocation2 + $0x20] sm:$0xff] %vm400_vm0, %v431_v20 }
  0x34   : > { %446 = vst.msk [vmem:[#allocation2 + $0x28] sm:$0xff] %vm400_vm0, %v434_v33  ;;  %v449_v39 = vld [vmem:[#allocation2] ss:$2 sm:$0xff]  ;;  %v457_v40 = vld [vmem:[#allocation2 + $0x1] ss:$2 sm:$0xff]  ;;  %447 = vst.msk [vmem:[#allocation2 + $0x30] sm:$0xff] %vm400_vm0, %v437_v36 }
  0x35   : > { %v438_v41 = vsel %vm400_vm0, %v397_v37, -inf  ;;  %v439_v42 = vsel %vm400_vm0, %v399_v38, -inf  ;;  %414 = vst.msk [vmem:[%s856_s28 + $0x68] sm:$0xff] %vm400_vm0, %v397_v37  ;;  %416 = vst.msk [vmem:[%s856_s28 + $0x78] sm:$0xff] %vm400_vm0, %v399_v38  ;;  %v464_v43 = vmax.f32 %v449_v39, %v457_v40  ;;  %v451_v45 = vld [vmem:[#allocation2 + $0x10] ss:$2 sm:$0xff] }
  0x36   : > { %v440_v44 = vmax.f32 %v438_v41, %v439_v42  ;;  %v459_v46 = vld [vmem:[#allocation2 + $0x11] ss:$2 sm:$0xff] }
  0x37   : > { %468 = vst.msk [vmem:[%s310_s9] sm:$0xff] %vm400_vm0, %v464_v43  ;;  %v465_v47 = vmax.f32 %v451_v45, %v459_v46 }
  0x38   : > { %448 = vst.msk [vmem:[#allocation2 + $0x38] sm:$0xff] %vm400_vm0, %v440_v44 }
  0x39   : > { %469 = vst.msk [vmem:[%s310_s9 + $0x8] sm:$0xff] %vm400_vm0, %v465_v47 }
  0x3b   : > { %v453_v48 = vld [vmem:[#allocation2 + $0x20] ss:$2 sm:$0xff]  ;;  %v461_v49 = vld [vmem:[#allocation2 + $0x21] ss:$2 sm:$0xff] }
  0x3c   : > { %v466_v50 = vmax.f32 %v453_v48, %v461_v49 }
  0x3e   : > { %470 = vst.msk [vmem:[%s310_s9 + $0x10] sm:$0xff] %vm400_vm0, %v466_v50 }
  0x3f   : > { %v455_v51 = vld [vmem:[#allocation2 + $0x30] ss:$2 sm:$0xff]  ;;  %v463_v52 = vld [vmem:[#allocation2 + $0x31] ss:$2 sm:$0xff] }
  0x40   : > { %v467_v53 = vmax.f32 %v455_v51, %v463_v52 }
  0x42   : > { %471 = vst.msk [vmem:[%s310_s9 + $0x18] sm:$0xff] %vm400_vm0, %v467_v53 }
  0x43 PF: > { %s17_s25 = sadd.s32 1, %s716_s25   ;;  %s960_s21 = smov %s708_s23 }
  0x44   : > { %p14_p7 = scmp.ge.s32.totalorder %s17_s25, 6   ;;  %s961_s22 = smov %s712_s24 }
  0x45   : > { %s962_s23 = smov %s965_s26  ;;  %s963_s24 = smov %s969_s27 }
  0x46   :  { %16 = sbr.rel (!%p14_p7) target bundleno = 3 (0x3), region = 89 }

// kernel: downsample_forward.4
= control target key start
LH: loop header
LB: loop body
LE: loop exit
PB: predicated region body
PF: predicated region fallthrough
CT: control target
= control target key end

     0   :  { %s2513_s15 = smov 0   ;;  %s2515_s16 = smov 0   ;;  %s3368_s0 = inlined_call_operand.vmem [shape: bf16[2,2,10,18,4], index: 0, kind: input, shape index: {}]   ;;  %s3369_s1 = inlined_call_operand.vmem [shape: bf16[36,8], index: 1, kind: input, shape index: {}]   ;;  %s3370_s2 = inlined_call_operand.vmem [shape: f32[2,2,128,8], index: 2, kind: output, shape index: {0}]   ;;  %s3371_s3 = inlined_call_operand.vmem [shape: f32[2,2,1,8], index: 3, kind: output, shape index: {1}]   ;;  %s3372_s4 = inlined_call_operand.vmem [shape: f32[2,2,1,8], index: 4, kind: output, shape index: {2}]  }
   0x1   :  { %s2517_s17 = smov 0   ;;  %s2519_s18 = smov 0  }
   0x2   :  { %s2521_s19 = smov 0  }
   0x3 LB: > { %s24_s20 = sadd.s32 1, %s2470_s17  ;;  %s27_s21 = sadd.s32 1, %s2474_s18  ;;  %s2478_s19 = sphi %s2521_s19, %s15_s19   ;;  %s2474_s18 = sphi %s2519_s18, %s3380_s18   ;;  %s2470_s17 = sphi %s2517_s17, %s3379_s17   ;;  %s2466_s16 = sphi %s2515_s16, %s3378_s16   ;;  %s2462_s15 = sphi %s2513_s15, %s3377_s15  }
   0x4   : > { %p25_p0 = scmp.ge.s32.totalorder %s24_s20, 2  ;;  %p2132_p1 = scmp.ge.s32.totalorder %s2478_s19, 1 }
   0x5   : > { %p191_p2 = scmp.lt.s32.totalorder %s2478_s19, 5 }
   0x6   : > { %s3382_s20 = smov (%p25_p0, %s24_s20), 0  ;;  %s3384_s21 = smov (!%p25_p0, %s27_s21), %s2474_s18 }
   0x7   : > { %p192_p3 = pnand %p2132_p1, %p191_p2  ;;  %p29_p4 = scmp.ge.s32.totalorder %s3384_s21, 2 }
   0x8   : > { %p239_p5 = scmp.lt.s32.totalorder (!%p192_p3), %s2466_s16, 1  ;;  %p241_p6 = scmp.lt.s32.totalorder (!%p192_p3), %s2462_s15, 1  ;;  %vm523_vm0 = vcmask (!%p192_p3), 1042432   ;;  %vm524_vm1 = vcmask (!%p192_p3), 1046532   ;;  %vm296_vm3 = vsmask.f32 (!%p192_p3), 3328 }
   0x9   : > { %s3386_s21 = smov (%p29_p4, %s3384_s21), 0  ;;  %195 = sbr.rel (%p192_p3) target bundleno = 532 (0x214), region = 28 }
   0xa   : > { %s2480_s29 = smov (!%p192_p3), 12   ;;  %s2481_s30 = smov (!%p192_p3), 24   ;;  %vm2596_vm2 = vmor (!%p192_p3), %vm523_vm0, %vm524_vm1  ;;  %vm297_vm4 = vsmask.f32 (!%p192_p3), 7440  ;;  %vm1560_vm6 = vcmask (!%p192_p3), 31744   ;;  %vm1585_vm7 = vcmask (!%p192_p3), 64512  }
   0xb   : > { %s2482_s5 = smov (!%p192_p3), 20   ;;  %s2483_s6 = smov (!%p192_p3), 8   ;;  %vm2643_vm5 = vmor (!%p192_p3), %vm296_vm3, %vm297_vm4  ;;  %vm1602_vm8 = vcmask (!%p192_p3), 97280   ;;  %vm1619_vm9 = vcmask (!%p192_p3), 130048   ;;  %vm1636_vm10 = vcmask (!%p192_p3), 162816   ;;  %vm1653_vm11 = vcmask (!%p192_p3), 195584  }
   0xc   : > { %s2484_s7 = smov (!%p192_p3), 4   ;;  %s2485_s12 = smov (!%p192_p3), 16   ;;  %vm1741_vm12 = vcmask (!%p192_p3), 1041408   ;;  %vm1670_vm13 = vcmask (!%p192_p3), 228352   ;;  %vm1687_vm14 = vcmask (!%p192_p3), 261120   ;;  %vm1724_vm15 = vcmask (!%p192_p3), 293888  }
   0xd   : > { %s2486_s13 = smov (!%p192_p3), 28   ;;  %s2487_s14 = smov (!%p192_p3), 32   ;;  %vm1895_vm0 = vcmask (!%p192_p3), 57344  }
  0x10   : > { %s3388_s16 = smov (!%p239_p5, %s2466_s16), 1  ;;  %s3390_s15 = smov (!%p241_p6, %s2462_s15), 1 }
  0x11   : > { %s2354_s22 = smul.u32 60, %s3388_s16 }
  0x12   : > { %s2353_s23 = smul.u32 30, %s3390_s15 }
  0x14   : > { %s245_s24 = sadd.s32 %s2354_s22, %s2353_s23 }
  0x15   : > { %s2133_s25 = sshll.u32 %s245_s24, 2  ;;  %s2134_s24 = sshll.u32 %s3390_s15, 4 }
  0x16   : > { %s2552_s28 = scalar_lea.vmem %s3368_s0, %s2133_s25  ;;  %s2135_s25 = sshll.u32 %s3388_s16, 5 }
  0x17   : > { %v2149_v0 = vld [vmem:[%s2552_s28 + $0x18] sm:$0xf]  ;;  %v2556_v1 = vld [vmem:[%s2552_s28 + $0x1c] sm:$0xf]  ;;  %v2147_v2 = vld [vmem:[%s2552_s28 + $0xc] sm:$0xf]  ;;  %s254_s26 = sadd.s32 %s2135_s25, %s2134_s24 }
  0x18   : > { %v641_v3 = vshll.u32 %v2556_v1, 16  ;;  %v645_v4 = vshrl.u32 %v2556_v1, 16  ;;  %v2252_v5 = vcombine.low %v2149_v0, %v2556_v1  ;;  %v632_v6 = vshrl.u32 %v2149_v0, 16  ;;  %v2563_v7 = vld [vmem:[%s2552_s28 + $0x10] sm:$0xf]  ;;  %s2136_s27 = sshll.u32 %s254_s26, 3 }
  0x19   : > { %v635_v8 = vshll.u32 %v2149_v0, 16  ;;  %v617_v9 = vshll.u32 %v2563_v7, 16  ;;  %v621_v10 = vshrl.u32 %v2563_v7, 16  ;;  %v2251_v11 = vcombine.low %v2147_v2, %v2563_v7  ;;  %v2189_v12 = vld [vmem:[%s2552_s28 + $0x24] sm:$0xf] }
  0x1a   : > { %v2569_v13 = vrot.slane %v645_v4, 4  ;;  %1338 = vrot.lane.b32.xlu1 %v2252_v5, %s2480_s29  ;;  %v634_v14 = vrot.slane %v632_v6, 4  ;;  %v608_v15 = vshrl.u32 %v2147_v2, 16  ;;  %v611_v16 = vshll.u32 %v2147_v2, 16  ;;  %v2573_v17 = vld [vmem:[%s2552_s28 + $0x28] sm:$0xf] }
  0x1b   : > { %v637_v18 = vrot.slane %v635_v8, 5  ;;  %v2575_v19 = vrot.slane %v621_v10, 4  ;;  %1336 = vrot.lane.b32.xlu0 %v2251_v11, %s2480_s29  ;;  %v937_v20 = vshrl.u32 %v2189_v12, 16  ;;  %v940_v21 = vshll.u32 %v2189_v12, 16  ;;  %v2187_v22 = vld [vmem:[%s2552_s28 + $0x18] sm:$0xf] }
  0x1c   : > { %v610_v23 = vrot.slane %v608_v15, 4  ;;  %v613_v24 = vrot.slane %v611_v16, 5  ;;  %v950_v25 = vshrl.u32 %v2573_v17, 16  ;;  %v2276_v26 = vcombine.low %v2189_v12, %v2573_v17  ;;  %v2582_v27 = vld [vmem:[%s2552_s28 + $0x1c] sm:$0xf] }
  0x1d   : > { %v638_v28 = vor.u32 %v637_v18, %v634_v14  ;;  %v2584_v29 = vrot.slane %v937_v20, 4  ;;  %v2586_v30 = vrot.slane %v940_v21, 5  ;;  %v913_v31 = vshrl.u32 %v2187_v22, 16  ;;  %v2589_v32 = vld [vmem:[%s2552_s28 + $0x14] sm:$0x1] }
  0x1e   : > { %v614_v33 = vor.u32 %v613_v24, %v610_v23  ;;  %1466 = vrot.lane.b32.xlu1 %v2276_v26, %s2481_s30  ;;  %v916_v34 = vshll.u32 %v2187_v22, 16  ;;  %v926_v35 = vshrl.u32 %v2582_v27, 16  ;;  %v2275_v36 = vcombine.low %v2187_v22, %v2582_v27  ;;  %v2171_v38 = vld [vmem:[%s2552_s28 + $0xc] sm:$0xe]  ;;  %v273_v39 = vld [vmem:[%s2552_s28 + $0x4] sm:$0xf] }
  0x1f   : > { %v2602_v40 = vrot.slane %v638_v28, 4  ;;  %v2604_v41 = vrot.slane %v913_v31, 4  ;;  %v2179_v42 = vrot.slane %v2171_v38, 9  ;;  %v833_v43 = vrot.slane %v2563_v7, 5  ;;  %v288_v44 = vld [vmem:[%s2552_s28 + $0x8] sm:$0x1] }
  0x20   : > { %v2608_v45 = vrot.slane %v614_v33, 4  ;;  %v2610_v46 = vrot.slane %v916_v34, 5  ;;  %1464 = vrot.lane.b32.xlu0 %v2275_v36, %s2481_s30  ;;  %v836_v47 = vrot.slane %v2589_v32, 5  ;;  %v491_v48 = vld [vmem:[%s2552_s28] sm:$0xe]  ;;  %v528_v49 = vrot.slane %v273_v39, 5 }
  0x21   : > { %v834_v50 = vsel %vm2596_vm2, %v2179_v42, %v833_v43  ;;  %v835_v51 = vrot.slane %v833_v43, 4  ;;  %v2139_v52 = vrot.slane %v491_v48, 9  ;;  %v531_v53 = vrot.slane %v288_v44, 5  ;;  %v275_v54 = vld [vmem:[%s2552_s28 + $0x10] sm:$0xf] }
  0x22   : > { %v530_v55 = vrot.slane %v528_v49, 4  ;;  %v289_v56 = vld [vmem:[%s2552_s28 + $0x14] sm:$0x1]  ;;  %v492_v57 = vld [vmem:[%s2552_s28 + $0xc] sm:$0xe]  ;;  %v535_v58 = vrot.slane %v275_v54, 5  ;;  %v943_v59 = vor.u32 %v2586_v30, %v2584_v29  ;;  %v919_v60 = vor.u32 %v2610_v46, %v2604_v41 }
  0x23   : > { %v837_v61 = vsel %vm2596_vm2, %v835_v51, %v836_v47  ;;  %v529_v62 = vsel %vm2596_vm2, %v2139_v52, %v528_v49  ;;  %v2140_v63 = vrot.slane %v492_v57, 9  ;;  %v538_v0 = vrot.slane %v289_v56, 5  ;;  %v272_v2 = vld [vmem:[%s2552_s28] sm:$0xf]  ;;  %v2172_v10 = vld [vmem:[%s2552_s28 + $0x18] sm:$0xe] }
  0x24   : > { %v2267_v4 = vcombine.low %v834_v50, %v837_v61  ;;  %v532_v5 = vsel %vm2596_vm2, %v530_v55, %v531_v53  ;;  %v537_v6 = vrot.slane %v535_v58, 4  ;;  %v300_v8 = vshrl.u32 %v272_v2, 16  ;;  %v2164_v16 = vld [vmem:[%s2552_s28 + $0x20] sm:$0x1]  ;;  %v274_v23 = vld [vmem:[%s2552_s28 + $0xc] sm:$0xf] }
  0x25   : > { %v2243_v11 = vcombine.low %v529_v62, %v532_v5  ;;  %v536_v12 = vsel %vm2596_vm2, %v2140_v63, %v535_v58  ;;  %v303_v14 = vshll.u32 %v272_v2, 16  ;;  %v309_v15 = vshll.u32 %v273_v39, 16  ;;  %v2707_v41 = vld [vmem:[%s2552_s28 + $0x1c] sm:$0xf] }
  0x26   : > { %1416 = vrot.lane.b32.xlu0 %v2267_v4, %s2482_s5  ;;  %v539_v18 = vsel %vm2596_vm2, %v537_v6, %v538_v0  ;;  %v302_v20 = vrot.slane %v300_v8, 4  ;;  %v313_v21 = vshrl.u32 %v273_v39, 16  ;;  %v319_v22 = vshll.u32 %v288_v44, 16  ;;  %v2424_v39 = vld [vmem:[%s3369_s1 + $0x10] ss:$0 sps:$4 sm:$0x33]  }
  0x27   : > { %1288 = vrot.lane.b32.xlu1 %v2243_v11, %s2483_s6  ;;  %v2244_v24 = vcombine.low %v536_v12, %v539_v18  ;;  %v305_v26 = vrot.slane %v303_v14, 5  ;;  %v311_v28 = vrot.slane %v309_v15, 5  ;;  %v2180_v31 = vrot.slane %v2172_v10, 9 }
  0x28   : > { %v315_v33 = vrot.slane %v313_v21, 4  ;;  %v321_v34 = vrot.slane %v319_v22, 5  ;;  %v840_v36 = vrot.slane %v2556_v1, 5  ;;  %v843_v38 = vrot.slane %v2164_v16, 5  ;;  %v2670_v21 = vld [vmem:[%s2552_s28 + $0x2c] sm:$0x1] }
  0x29   : > { %v306_v42 = vor.u32 %v305_v26, %v302_v20  ;;  %v324_v43 = vshrl.u32 %v274_v23, 16  ;;  %v327_v47 = vshll.u32 %v274_v23, 16  ;;  %v333_v48 = vshll.u32 %v275_v54, 16  ;;  %v2421_v23 = vld [vmem:[%s3369_s1] sm:$0xff]  }
  0x2a   : > { %v316_v44 = vor.u32 %v315_v33, %v311_v28  ;;  %v841_v49 = vsel %vm2596_vm2, %v2180_v31, %v840_v36  ;;  %v842_v50 = vrot.slane %v840_v36, 4  ;;  %v337_v51 = vshrl.u32 %v275_v54, 16  ;;  %v2690_v26 = vld [vmem:[%s2552_s28 + $0x20] sm:$0x1]  ;;  %2323 = vmatprep.subr.bf16.mxu0 %v2421_v23  ;;  %2345 = vmatprep.subr.bf16.mxu1 %v2421_v23 }
  0x2b   : > { %1290 = vrot.lane.b32.xlu1 %v2244_v24, %s2483_s6  ;;  %v307_v52 = vrot.slane %v306_v42, 4  ;;  %v326_v53 = vrot.slane %v324_v43, 4  ;;  %v329_v55 = vrot.slane %v327_v47, 5  ;;  %v335_v57 = vrot.slane %v333_v48, 5  ;;  %2324 = vmatpush3.bf16.msra.mxu0 %v2421_v23 }
  0x2c   : > { %v317_v58 = vrot.slane %v316_v44, 4  ;;  %v844_v61 = vsel %vm2596_vm2, %v842_v50, %v843_v38  ;;  %v339_v62 = vrot.slane %v337_v51, 4  ;;  %v343_v63 = vshll.u32 %v289_v56, 16  ;;  %2348 = vmatpush3.bf16.msra.mxu1 %v2421_v23 }
  0x2d   : > { %v312_v0 = vsel %vm2643_vm5, %v307_v52, %v311_v28  ;;  %v2268_v2 = vcombine.low %v841_v49, %v844_v61  ;;  %v330_v4 = vor.u32 %v329_v55, %v326_v53  ;;  %v643_v54 = vrot.slane %v641_v3, 5  ;;  %v276_v28 = vld [vmem:[%s2552_s28 + $0x18] sm:$0xf] }
  0x2e   : > { %v322_v5 = vsel %vm2643_vm5, %v317_v58, %v321_v34  ;;  %v340_v6 = vor.u32 %v339_v62, %v335_v57  ;;  %v345_v8 = vrot.slane %v343_v63, 5  ;;  %v651_v10 = vshll.u32 %v2164_v16, 16  ;;  %v2422_v34 = vld [vmem:[%s3369_s1 + $0x8] sm:$0xff]  }
  0x2f   : > { %v2235_v11 = vcombine.low %v312_v0, %v322_v5  ;;  %1418 = vrot.lane.b32.xlu1 %v2268_v2, %s2482_s5  ;;  %v331_v12 = vrot.slane %v330_v4, 4  ;;  %v644_v56 = vsel %vm2643_vm5, %v2602_v40, %v643_v54  ;;  %v648_v14 = vor.u32 %v2569_v13, %v643_v54  ;;  %2325 = vmatprep.subr.bf16.mxu0 %v2422_v34  ;;  %v278_v0 = vld [vmem:[%s2552_s28 + $0x24] sm:$0xf] }
  0x30   : > { %v341_v15 = vrot.slane %v340_v6, 4  ;;  %v653_v1 = vrot.slane %v651_v10, 5  ;;  %v619_v3 = vrot.slane %v617_v9, 5  ;;  %v627_v18 = vshll.u32 %v2589_v32, 16  ;;  %2346 = vmatprep.subr.bf16.mxu1 %v2422_v34  ;;  %2326 = vmatpush3.bf16.msra.mxu0 %v2422_v34 }
  0x31   : > { %1248 = vrot.lane.b32.xlu0 %v2235_v11, %s2484_s7  ;;  %v336_v16 = vsel %vm2643_vm5, %v331_v12, %v335_v57  ;;  %v649_v20 = vrot.slane %v648_v14, 4  ;;  %v944_v13 = vrot.slane %v943_v59, 4  ;;  %v946_v7 = vshll.u32 %v2573_v17, 16  ;;  %v2211_v57 = vld [vmem:[%s2552_s28 + $0x18] sm:$0xe]  ;;  %2349 = vmatpush3.bf16.msra.mxu1 %v2422_v34 }
  0x32   : > { %v346_v9 = vsel %vm2643_vm5, %v341_v15, %v345_v8  ;;  %v620_v32 = vsel %vm2643_vm5, %v2608_v45, %v619_v3  ;;  %v624_v40 = vor.u32 %v2575_v19, %v619_v3  ;;  %v629_v22 = vrot.slane %v627_v18, 5  ;;  %v279_v15 = vld [vmem:[%s2552_s28 + $0x28] sm:$0xf]  ;;  %2351 = vmatprep.subr.msk.bf16.mxu0 %vm1741_vm12, %v2424_v39  ;;  %2352 = vmatprep.subr.msk.bf16.mxu1 %vm1741_vm12, %v2424_v39 }
  0x33   : > { %v2236_v24 = vcombine.low %v336_v16, %v346_v9  ;;  %v654_v29 = vsel %vm2643_vm5, %v649_v20, %v653_v1  ;;  %v948_v30 = vrot.slane %v946_v7, 5  ;;  %v952_v59 = vrot.slane %v950_v25, 4 }
  0x34   : > { %v2260_v45 = vcombine.low %v644_v56, %v654_v29  ;;  %v625_v31 = vrot.slane %v624_v40, 4  ;;  %v956_v19 = vshll.u32 %v2670_v21, 16  ;;  %v920_v33 = vrot.slane %v919_v60, 4  ;;  %v2212_v40 = vld [vmem:[%s2552_s28 + $0x24] sm:$0xe] }
  0x35   : > { %1250 = vrot.lane.b32.xlu0 %v2236_v24, %s2484_s7  ;;  %v949_v25 = vsel %vm2643_vm5, %v944_v13, %v948_v30  ;;  %v953_v36 = vor.u32 %v952_v59, %v948_v30  ;;  %v922_v38 = vshll.u32 %v2582_v27, 16  ;;  %v928_v42 = vrot.slane %v926_v35, 4  ;;  %v2714_v35 = vld [vmem:[%s2552_s28 + $0x20] sm:$0x1] }
  0x36   : > { %1378 = vrot.lane.b32.xlu1 %v2260_v45, %s2485_s12  ;;  %v630_v46 = vsel %vm2643_vm5, %v625_v31, %v629_v22  ;;  %v958_v60 = vrot.slane %v956_v19, 5  ;;  %v932_v43 = vshll.u32 %v2690_v26, 16  ;;  %v348_v47 = vshrl.u32 %v276_v28, 16  ;;  %v494_v45 = vld [vmem:[%s2552_s28 + $0x24] sm:$0xe] }
  0x37   : > { %v2259_v48 = vcombine.low %v620_v32, %v630_v46  ;;  %v954_v44 = vrot.slane %v953_v36, 4  ;;  %v924_v49 = vrot.slane %v922_v38, 5  ;;  %v351_v50 = vshll.u32 %v276_v28, 16 }
  0x38   : > { %v934_v51 = vrot.slane %v932_v43, 5  ;;  %v350_v52 = vrot.slane %v348_v47, 4  ;;  %v357_v53 = vshll.u32 %v2707_v41, 16  ;;  %v361_v55 = vshrl.u32 %v2707_v41, 16 }
  0x39   : > { %1376 = vrot.lane.b32.xlu0 %v2259_v48, %s2485_s12  ;;  %v959_v58 = vsel %vm2643_vm5, %v954_v44, %v958_v60  ;;  %v925_v61 = vsel %vm2643_vm5, %v920_v33, %v924_v49  ;;  %v929_v62 = vor.u32 %v928_v42, %v924_v49  ;;  %v353_v63 = vrot.slane %v351_v50, 5  ;;  %v2749_v44 = vld [vmem:[%s2552_s28 + $0x30] sm:$0xf] }
  0x3a   : > { %v2284_v2 = vcombine.low %v949_v25, %v959_v58  ;;  %v359_v4 = vrot.slane %v357_v53, 5  ;;  %v363_v54 = vrot.slane %v361_v55, 4  ;;  %v367_v5 = vshll.u32 %v2714_v35, 16  ;;  %v493_v25 = vld [vmem:[%s2552_s28 + $0x18] sm:$0xe] }
  0x3b   : > { %v930_v6 = vrot.slane %v929_v62, 4  ;;  %v354_v8 = vor.u32 %v353_v63, %v350_v52  ;;  %v2219_v10 = vrot.slane %v2211_v57, 9  ;;  %v1138_v11 = vrot.slane %v2582_v27, 5  ;;  %v291_v27 = vld [vmem:[%s2552_s28 + $0x2c] sm:$0x1] }
  0x3c   : > { %1506 = vrot.lane.b32.xlu1 %v2284_v2, %s2486_s13  ;;  %v364_v12 = vor.u32 %v363_v54, %v359_v4  ;;  %v369_v56 = vrot.slane %v367_v5, 5  ;;  %v1141_v14 = vrot.slane %v2690_v26, 5  ;;  %v372_v1 = vshrl.u32 %v278_v0, 16  ;;  %v2154_v62 = vld [vmem:[%s2552_s28 + $0x34] sm:$0xf] }
  0x3d   : > { %v935_v3 = vsel %vm2643_vm5, %v930_v6, %v934_v51  ;;  %v355_v18 = vrot.slane %v354_v8, 4  ;;  %v1139_v16 = vsel %vm2596_vm2, %v2219_v10, %v1138_v11  ;;  %v1140_v20 = vrot.slane %v1138_v11, 4  ;;  %v2772_v5 = vld [vmem:[%s2552_s28 + $0x28] sm:$0xf] }
  0x3e   : > { %v2283_v13 = vcombine.low %v925_v61, %v935_v3  ;;  %v365_v7 = vrot.slane %v364_v12, 4  ;;  %v374_v9 = vrot.slane %v372_v1, 4  ;;  %v375_v32 = vshll.u32 %v278_v0, 16  ;;  %v2151_v0 = vld [vmem:[%s2552_s28 + $0x24] sm:$0xf] }
  0x3f   : > { %v360_v22 = vsel %vm2643_vm5, %v355_v18, %v359_v4  ;;  %v1142_v23 = vsel %vm2596_vm2, %v1140_v20, %v1141_v14  ;;  %v381_v24 = vshll.u32 %v279_v15, 16  ;;  %v385_v29 = vshrl.u32 %v279_v15, 16  ;;  %v2784_v20 = vld [vmem:[%s2552_s28 + $0x2c] sm:$0x1] }
  0x40   : > { %1504 = vrot.lane.b32.xlu0 %v2283_v13, %s2486_s13  ;;  %v370_v30 = vsel %vm2643_vm5, %v365_v7, %v369_v56  ;;  %v2291_v59 = vcombine.low %v1139_v16, %v1142_v23  ;;  %v377_v26 = vrot.slane %v375_v32, 5  ;;  %v391_v28 = vshll.u32 %v291_v27, 16  ;;  %v2174_v32 = vld [vmem:[%s2552_s28 + $0x30] sm:$0xe] }
  0x41   : > { %v2237_v31 = vcombine.low %v360_v22, %v370_v30  ;;  %v383_v19 = vrot.slane %v381_v24, 5  ;;  %v387_v33 = vrot.slane %v385_v29, 4  ;;  %v2220_v34 = vrot.slane %v2212_v40, 9 }
  0x42   : > { %v378_v36 = vor.u32 %v377_v26, %v374_v9  ;;  %v393_v38 = vrot.slane %v391_v28, 5  ;;  %v1145_v42 = vrot.slane %v2573_v17, 5  ;;  %v1148_v46 = vrot.slane %v2670_v21, 5  ;;  %v2173_v28 = vld [vmem:[%s2552_s28 + $0x24] sm:$0xe] }
  0x43   : > { %1252 = vrot.lane.b32.xlu1 %v2237_v31, %s2484_s7  ;;  %v388_v60 = vor.u32 %v387_v33, %v383_v19  ;;  %v2142_v43 = vrot.slane %v494_v45, 9  ;;  %v549_v47 = vrot.slane %v279_v15, 5  ;;  %v552_v48 = vrot.slane %v291_v27, 5  ;;  %v2166_v15 = vld [vmem:[%s2552_s28 + $0x38] sm:$0x1] }
  0x44   : > { %1544 = vrot.lane.b32.xlu0 %v2291_v59, %s2487_s14  ;;  %v379_v49 = vrot.slane %v378_v36, 4  ;;  %v1146_v50 = vsel %vm2596_vm2, %v2220_v34, %v1145_v42  ;;  %v1147_v17 = vrot.slane %v1145_v42, 4  ;;  %v2141_v21 = vrot.slane %v493_v25, 9 }
  0x45   : > { %v389_v51 = vrot.slane %v388_v60, 4  ;;  %v550_v52 = vsel %vm2596_vm2, %v2142_v43, %v549_v47  ;;  %v551_v53 = vrot.slane %v549_v47, 4  ;;  %v542_v55 = vrot.slane %v2707_v41, 5  ;;  %v2793_v47 = vld [vmem:[%s2552_s28 + $0x3c] sm:$0xf] }
  0x46   : > { %v384_v57 = vsel %vm2643_vm5, %v379_v49, %v383_v19  ;;  %v1149_v58 = vsel %vm2596_vm2, %v1147_v17, %v1148_v46  ;;  %v545_v61 = vrot.slane %v2714_v35, 5  ;;  %v680_v63 = vshrl.u32 %v2749_v44, 16 }
  0x47   : > { %v394_v2 = vsel %vm2643_vm5, %v389_v51, %v393_v38  ;;  %v2292_v4 = vcombine.low %v1146_v50, %v1149_v58  ;;  %v553_v41 = vsel %vm2596_vm2, %v551_v53, %v552_v48  ;;  %v543_v54 = vsel %vm2596_vm2, %v2141_v21, %v542_v55 }
  0x48   : > { %v2238_v6 = vcombine.low %v384_v57, %v394_v2  ;;  %v2246_v35 = vcombine.low %v550_v52, %v553_v41  ;;  %v544_v8 = vrot.slane %v542_v55, 4  ;;  %v682_v10 = vrot.slane %v680_v63, 4  ;;  %v2810_v57 = vld [vmem:[%s2552_s28 + $0x40] sm:$0xf]  ;;  %v2820_v41 = vld [vmem:[%s2552_s28 + $0x34] sm:$0xf] }
  0x49   : > { %1546 = vrot.lane.b32.xlu0 %v2292_v4, %s2487_s14  ;;  %v683_v11 = vshll.u32 %v2749_v44, 16  ;;  %v693_v12 = vshrl.u32 %v2154_v62, 16  ;;  %v2254_v56 = vcombine.low %v2749_v44, %v2154_v62  ;;  %v656_v14 = vshrl.u32 %v2151_v0, 16 }
  0x4a   : > { %1254 = vrot.lane.b32.xlu1 %v2238_v6, %s2484_s7  ;;  %v546_v1 = vsel %vm2596_vm2, %v544_v8, %v545_v61  ;;  %v659_v3 = vshll.u32 %v2151_v0, 16  ;;  %v669_v18 = vshrl.u32 %v2772_v5, 16  ;;  %v2253_v16 = vcombine.low %v2151_v0, %v2772_v5 }
  0x4b   : > { %v2245_v27 = vcombine.low %v543_v54, %v546_v1  ;;  %v685_v13 = vrot.slane %v683_v11, 5  ;;  %v658_v7 = vrot.slane %v656_v14, 4  ;;  %v689_v9 = vshll.u32 %v2154_v62, 16 }
  0x4c   : > { %v661_v40 = vrot.slane %v659_v3, 5  ;;  %v695_v22 = vrot.slane %v693_v12, 4  ;;  %v699_v23 = vshll.u32 %v2166_v15, 16  ;;  %v665_v24 = vshll.u32 %v2772_v5, 16 }
  0x4d   : > { %1292 = vrot.lane.b32.xlu0 %v2245_v27, %s2483_s6  ;;  %v686_v29 = vor.u32 %v685_v13, %v682_v10  ;;  %v691_v30 = vrot.slane %v689_v9, 5  ;;  %v671_v59 = vrot.slane %v669_v18, 4  ;;  %v675_v26 = vshll.u32 %v2784_v20, 16  ;;  %v2835_v18 = vld [vmem:[%s2552_s28 + $0x38] sm:$0x1] }
  0x4e   : > { %1294 = vrot.lane.b32.xlu1 %v2246_v35, %s2483_s6  ;;  %v701_v45 = vrot.slane %v699_v23, 5  ;;  %v662_v31 = vor.u32 %v661_v40, %v658_v7  ;;  %v667_v19 = vrot.slane %v665_v24, 5  ;;  %v2182_v33 = vrot.slane %v2174_v32, 9  ;;  %v280_v7 = vld [vmem:[%s2552_s28 + $0x30] sm:$0xf] }
  0x4f   : > { %v687_v34 = vrot.slane %v686_v29, 4  ;;  %v696_v25 = vor.u32 %v695_v22, %v691_v30  ;;  %v677_v36 = vrot.slane %v675_v26, 5  ;;  %v854_v38 = vrot.slane %v2154_v62, 5  ;;  %v2191_v62 = vld [vmem:[%s2552_s28 + $0x30] sm:$0xf] }
  0x50   : > { %v663_v42 = vrot.slane %v662_v31, 4  ;;  %v672_v46 = vor.u32 %v671_v59, %v667_v19  ;;  %v857_v60 = vrot.slane %v2166_v15, 5  ;;  %v2181_v43 = vrot.slane %v2173_v28, 9  ;;  %v2844_v59 = vld [vmem:[%s2552_s28 + $0x34] sm:$0xf] }
  0x51   : > { %1340 = vrot.lane.b32.xlu0 %v2253_v16, %s2480_s29  ;;  %v692_v48 = vsel %vm2643_vm5, %v687_v34, %v691_v30  ;;  %v697_v44 = vrot.slane %v696_v25, 4  ;;  %v855_v49 = vsel %vm2596_vm2, %v2182_v33, %v854_v38  ;;  %v856_v50 = vrot.slane %v854_v38, 4  ;;  %v2213_v38 = vld [vmem:[%s2552_s28 + $0x30] sm:$0xe] }
  0x52   : > { %1342 = vrot.lane.b32.xlu1 %v2254_v56, %s2480_s29  ;;  %v668_v17 = vsel %vm2643_vm5, %v663_v42, %v667_v19  ;;  %v673_v21 = vrot.slane %v672_v46, 4  ;;  %v847_v51 = vrot.slane %v2772_v5, 5  ;;  %v850_v52 = vrot.slane %v2784_v20, 5  ;;  %v2827_v56 = vld [vmem:[%s2552_s28 + $0x44] sm:$0x1] }
  0x53   : > { %v702_v53 = vsel %vm2643_vm5, %v697_v44, %v701_v45  ;;  %v858_v55 = vsel %vm2596_vm2, %v856_v50, %v857_v60  ;;  %v985_v58 = vshrl.u32 %v2793_v47, 16  ;;  %v988_v61 = vshll.u32 %v2793_v47, 16  ;;  %v2848_v45 = vld [vmem:[%s2552_s28 + $0x38] sm:$0x1] }
  0x54   : > { %v2262_v63 = vcombine.low %v692_v48, %v702_v53  ;;  %v678_v0 = vsel %vm2643_vm5, %v673_v21, %v677_v36  ;;  %v2270_v2 = vcombine.low %v855_v49, %v858_v55  ;;  %v848_v4 = vsel %vm2596_vm2, %v2181_v43, %v847_v51 }
  0x55   : > { %v2261_v54 = vcombine.low %v668_v17, %v678_v0  ;;  %v849_v5 = vrot.slane %v847_v51, 4  ;;  %v987_v6 = vrot.slane %v985_v58, 4  ;;  %v990_v35 = vrot.slane %v988_v61, 5 }
  0x56   : > { %1382 = vrot.lane.b32.xlu1 %v2262_v63, %s2485_s12  ;;  %v998_v8 = vshrl.u32 %v2810_v57, 16  ;;  %v2278_v10 = vcombine.low %v2793_v47, %v2810_v57  ;;  %v961_v11 = vshrl.u32 %v2191_v62, 16  ;;  %v964_v12 = vshll.u32 %v2191_v62, 16 }
  0x57   : > { %1380 = vrot.lane.b32.xlu0 %v2261_v54, %s2485_s12  ;;  %v851_v14 = vsel %vm2596_vm2, %v849_v5, %v850_v52  ;;  %v974_v15 = vshrl.u32 %v2820_v41, 16  ;;  %v2277_v1 = vcombine.low %v2191_v62, %v2820_v41  ;;  %v991_v3 = vor.u32 %v990_v35, %v987_v6  ;;  %v2861_v52 = vld [vmem:[%s2552_s28 + $0x3c] sm:$0xf]  ;;  %v2867_v62 = vld [vmem:[%s2552_s28 + $0x40] sm:$0xf] }
  0x58   : > { %v2269_v16 = vcombine.low %v848_v4, %v851_v14  ;;  %v963_v20 = vrot.slane %v961_v11, 4  ;;  %v966_v27 = vrot.slane %v964_v12, 5  ;;  %v994_v13 = vshll.u32 %v2810_v57, 16  ;;  %v293_v54 = vld [vmem:[%s2552_s28 + $0x44] sm:$0x1] }
  0x59   : > { %v992_v9 = vrot.slane %v991_v3, 4  ;;  %v1000_v32 = vrot.slane %v998_v8, 4  ;;  %v1004_v40 = vshll.u32 %v2827_v56, 16  ;;  %v970_v22 = vshll.u32 %v2820_v41, 16  ;;  %v2214_v14 = vld [vmem:[%s2552_s28 + $0x3c] sm:$0xe] }
  0x5a   : > { %1422 = vrot.lane.b32.xlu1 %v2270_v2, %s2482_s5  ;;  %v996_v23 = vrot.slane %v994_v13, 5  ;;  %v967_v24 = vor.u32 %v966_v27, %v963_v20  ;;  %v976_v29 = vrot.slane %v974_v15, 4  ;;  %v980_v30 = vshll.u32 %v2835_v18, 16 }
  0x5b   : > { %1420 = vrot.lane.b32.xlu0 %v2269_v16, %s2482_s5  ;;  %v1006_v26 = vrot.slane %v1004_v40, 5  ;;  %v972_v28 = vrot.slane %v970_v22, 5  ;;  %v396_v31 = vshrl.u32 %v280_v7, 16  ;;  %v399_v19 = vshll.u32 %v280_v7, 16  ;;  %v496_v7 = vld [vmem:[%s2552_s28 + $0x3c] sm:$0xe] }
  0x5c   : > { %v997_v33 = vsel %vm2643_vm5, %v992_v9, %v996_v23  ;;  %v1001_v34 = vor.u32 %v1000_v32, %v996_v23  ;;  %v968_v25 = vrot.slane %v967_v24, 4  ;;  %v982_v36 = vrot.slane %v980_v30, 5  ;;  %v495_v23 = vld [vmem:[%s2552_s28 + $0x30] sm:$0xe] }
  0x5d   : > { %v977_v42 = vor.u32 %v976_v29, %v972_v28  ;;  %v398_v46 = vrot.slane %v396_v31, 4  ;;  %v401_v60 = vrot.slane %v399_v19, 5  ;;  %v405_v43 = vshll.u32 %v2844_v59, 16 }
  0x5e   : > { %1470 = vrot.lane.b32.xlu1 %v2278_v10, %s2481_s30  ;;  %v1002_v47 = vrot.slane %v1001_v34, 4  ;;  %v973_v48 = vsel %vm2643_vm5, %v968_v25, %v972_v28  ;;  %v409_v44 = vshrl.u32 %v2844_v59, 16  ;;  %v415_v49 = vshll.u32 %v2848_v45, 16  ;;  %v2895_v34 = vld [vmem:[%s2552_s28 + $0x48] sm:$0xf] }
  0x5f   : > { %1468 = vrot.lane.b32.xlu0 %v2277_v1, %s2481_s30  ;;  %v978_v50 = vrot.slane %v977_v42, 4  ;;  %v402_v17 = vor.u32 %v401_v60, %v398_v46  ;;  %v407_v21 = vrot.slane %v405_v43, 5  ;;  %v2221_v51 = vrot.slane %v2213_v38, 9 }
  0x60   : > { %v1007_v53 = vsel %vm2643_vm5, %v1002_v47, %v1006_v26  ;;  %v411_v55 = vrot.slane %v409_v44, 4  ;;  %v417_v58 = vrot.slane %v415_v49, 5  ;;  %v1152_v61 = vrot.slane %v2820_v41, 5  ;;  %v2158_v44 = vld [vmem:[%s2552_s28 + $0x4c] sm:$0xf] }
  0x61   : > { %v2286_v63 = vcombine.low %v997_v33, %v1007_v53  ;;  %v983_v0 = vsel %vm2643_vm5, %v978_v50, %v982_v36  ;;  %v403_v2 = vrot.slane %v402_v17, 4  ;;  %v1155_v4 = vrot.slane %v2835_v18, 5  ;;  %v2155_v50 = vld [vmem:[%s2552_s28 + $0x3c] sm:$0xf]  ;;  %v2918_v53 = vld [vmem:[%s2552_s28 + $0x40] sm:$0xf] }
  0x62   : > { %v2285_v5 = vcombine.low %v973_v48, %v983_v0  ;;  %v412_v6 = vor.u32 %v411_v55, %v407_v21  ;;  %v1153_v35 = vsel %vm2596_vm2, %v2221_v51, %v1152_v61  ;;  %v1154_v8 = vrot.slane %v1152_v61, 4 }
  0x63   : > { %1510 = vrot.lane.b32.xlu1 %v2286_v63, %s2486_s13  ;;  %v408_v41 = vsel %vm2643_vm5, %v403_v2, %v407_v21  ;;  %v420_v10 = vshrl.u32 %v2861_v52, 16  ;;  %v423_v11 = vshll.u32 %v2861_v52, 16  ;;  %v429_v12 = vshll.u32 %v2867_v62, 16 }
  0x64   : > { %1508 = vrot.lane.b32.xlu0 %v2285_v5, %s2486_s13  ;;  %v413_v15 = vrot.slane %v412_v6, 4  ;;  %v1156_v1 = vsel %vm2596_vm2, %v1154_v8, %v1155_v4  ;;  %v433_v3 = vshrl.u32 %v2867_v62, 16  ;;  %v439_v18 = vshll.u32 %v293_v54, 16 }
  0x65   : > { %v2293_v16 = vcombine.low %v1153_v35, %v1156_v1  ;;  %v422_v20 = vrot.slane %v420_v10, 4  ;;  %v425_v27 = vrot.slane %v423_v11, 5  ;;  %v431_v13 = vrot.slane %v429_v12, 5 }
  0x66   : > { %v418_v9 = vsel %vm2643_vm5, %v413_v15, %v417_v58  ;;  %v435_v32 = vrot.slane %v433_v3, 4  ;;  %v441_v40 = vrot.slane %v439_v18, 5  ;;  %v2222_v22 = vrot.slane %v2214_v14, 9  ;;  %v2176_v15 = vld [vmem:[%s2552_s28 + $0x48] sm:$0xe] }
  0x67   : > { %v2239_v24 = vcombine.low %v408_v41, %v418_v9  ;;  %v426_v29 = vor.u32 %v425_v27, %v422_v20  ;;  %v1159_v30 = vrot.slane %v2810_v57, 5  ;;  %v1162_v26 = vrot.slane %v2827_v56, 5  ;;  %v2930_v41 = vld [vmem:[%s2552_s28 + $0x44] sm:$0x1]  ;;  %v2175_v9 = vld [vmem:[%s2552_s28 + $0x3c] sm:$0xe] }
  0x68   : > { %1548 = vrot.lane.b32.xlu0 %v2293_v16, %s2487_s14  ;;  %v436_v28 = vor.u32 %v435_v32, %v431_v13  ;;  %v2144_v31 = vrot.slane %v496_v7, 9  ;;  %v563_v19 = vrot.slane %v2867_v62, 5  ;;  %v566_v33 = vrot.slane %v293_v54, 5  ;;  %v2168_v54 = vld [vmem:[%s2552_s28 + $0x50] sm:$0x1] }
  0x69   : > { %1256 = vrot.lane.b32.xlu1 %v2239_v24, %s2484_s7  ;;  %v427_v25 = vrot.slane %v426_v29, 4  ;;  %v1160_v36 = vsel %vm2596_vm2, %v2222_v22, %v1159_v30  ;;  %v1161_v57 = vrot.slane %v1159_v30, 4  ;;  %v2143_v56 = vrot.slane %v495_v23, 9 }
  0x6a   : > { %v437_v38 = vrot.slane %v436_v28, 4  ;;  %v564_v42 = vsel %vm2596_vm2, %v2144_v31, %v563_v19  ;;  %v565_v46 = vrot.slane %v563_v19, 4  ;;  %v556_v60 = vrot.slane %v2844_v59, 5 }
  0x6b   : > { %v432_v43 = vsel %vm2643_vm5, %v427_v25, %v431_v13  ;;  %v1163_v47 = vsel %vm2596_vm2, %v1161_v57, %v1162_v26  ;;  %v559_v48 = vrot.slane %v2848_v45, 5  ;;  %v728_v49 = vshrl.u32 %v2895_v34, 16 }
  0x6c   : > { %v442_v17 = vsel %vm2643_vm5, %v437_v38, %v441_v40  ;;  %v2294_v21 = vcombine.low %v1160_v36, %v1163_v47  ;;  %v567_v59 = vsel %vm2596_vm2, %v565_v46, %v566_v33  ;;  %v557_v51 = vsel %vm2596_vm2, %v2143_v56, %v556_v60 }
  0x6d   : > { %v2240_v55 = vcombine.low %v432_v43, %v442_v17  ;;  %v2248_v45 = vcombine.low %v564_v42, %v567_v59  ;;  %v558_v58 = vrot.slane %v556_v60, 4  ;;  %v730_v61 = vrot.slane %v728_v49, 4 }
  0x6e   : > { %1550 = vrot.lane.b32.xlu0 %v2294_v21, %s2487_s14  ;;  %v731_v63 = vshll.u32 %v2895_v34, 16  ;;  %v741_v0 = vshrl.u32 %v2158_v44, 16  ;;  %v2256_v2 = vcombine.low %v2895_v34, %v2158_v44  ;;  %v704_v4 = vshrl.u32 %v2155_v50, 16  ;;  %v2939_v34 = vld [vmem:[%s2552_s28 + $0x54] sm:$0xf] }
  0x6f   : > { %1258 = vrot.lane.b32.xlu1 %v2240_v55, %s2484_s7  ;;  %v560_v5 = vsel %vm2596_vm2, %v558_v58, %v559_v48  ;;  %v707_v6 = vshll.u32 %v2155_v50, 16  ;;  %v717_v35 = vshrl.u32 %v2918_v53, 16  ;;  %v2255_v8 = vcombine.low %v2155_v50, %v2918_v53  ;;  %v2956_v48 = vld [vmem:[%s2552_s28 + $0x58] sm:$0xf]  ;;  %v2195_v50 = vld [vmem:[%s2552_s28 + $0x48] sm:$0xf] }
  0x70   : > { %v2247_v10 = vcombine.low %v557_v51, %v560_v5  ;;  %v733_v11 = vrot.slane %v731_v63, 5  ;;  %v706_v12 = vrot.slane %v704_v4, 4  ;;  %v737_v14 = vshll.u32 %v2158_v44, 16 }
  0x71   : > { %v709_v1 = vrot.slane %v707_v6, 5  ;;  %v743_v3 = vrot.slane %v741_v0, 4  ;;  %v747_v18 = vshll.u32 %v2168_v54, 16  ;;  %v713_v16 = vshll.u32 %v2918_v53, 16 }
  0x72   : > { %1296 = vrot.lane.b32.xlu0 %v2247_v10, %s2483_s6  ;;  %v734_v20 = vor.u32 %v733_v11, %v730_v61  ;;  %v739_v27 = vrot.slane %v737_v14, 5  ;;  %v719_v13 = vrot.slane %v717_v35, 4  ;;  %v723_v7 = vshll.u32 %v2930_v41, 16 }
  0x73   : > { %1298 = vrot.lane.b32.xlu1 %v2248_v45, %s2483_s6  ;;  %v749_v32 = vrot.slane %v747_v18, 5  ;;  %v710_v40 = vor.u32 %v709_v1, %v706_v12  ;;  %v715_v22 = vrot.slane %v713_v16, 5  ;;  %v2184_v23 = vrot.slane %v2176_v15, 9  ;;  %v2985_v15 = vld [vmem:[%s2552_s28 + $0x48] sm:$0xf] }
  0x74   : > { %v735_v24 = vrot.slane %v734_v20, 4  ;;  %v744_v29 = vor.u32 %v743_v3, %v739_v27  ;;  %v725_v30 = vrot.slane %v723_v7, 5  ;;  %v868_v26 = vrot.slane %v2158_v44, 5 }
  0x75   : > { %v711_v28 = vrot.slane %v710_v40, 4  ;;  %v720_v31 = vor.u32 %v719_v13, %v715_v22  ;;  %v871_v19 = vrot.slane %v2168_v54, 5  ;;  %v2183_v33 = vrot.slane %v2175_v9, 9  ;;  %v2973_v54 = vld [vmem:[%s2552_s28 + $0x5c] sm:$0x1] }
  0x76   : > { %1344 = vrot.lane.b32.xlu0 %v2255_v8, %s2480_s29  ;;  %v740_v25 = vsel %vm2643_vm5, %v735_v24, %v739_v27  ;;  %v745_v36 = vrot.slane %v744_v29, 4  ;;  %v869_v57 = vsel %vm2596_vm2, %v2184_v23, %v868_v26  ;;  %v870_v56 = vrot.slane %v868_v26, 4  ;;  %v2992_v9 = vld [vmem:[%s2552_s28 + $0x4c] sm:$0xf] }
  0x77   : > { %1346 = vrot.lane.b32.xlu1 %v2256_v2, %s2480_s29  ;;  %v716_v38 = vsel %vm2643_vm5, %v711_v28, %v715_v22  ;;  %v721_v42 = vrot.slane %v720_v31, 4  ;;  %v861_v46 = vrot.slane %v2918_v53, 5  ;;  %v864_v60 = vrot.slane %v2930_v41, 5  ;;  %v2966_v53 = vld [vmem:[%s2552_s28 + $0x4c] sm:$0xf] }
  0x78   : > { %v750_v43 = vsel %vm2643_vm5, %v745_v36, %v749_v32  ;;  %v872_v47 = vsel %vm2596_vm2, %v870_v56, %v871_v19  ;;  %v1033_v44 = vshrl.u32 %v2939_v34, 16  ;;  %v1036_v49 = vshll.u32 %v2939_v34, 16  ;;  %v2981_v41 = vld [vmem:[%s2552_s28 + $0x50] sm:$0x1]  ;;  %v2215_v31 = vld [vmem:[%s2552_s28 + $0x48] sm:$0xe] }
  0x79   : > { %v2264_v17 = vcombine.low %v740_v25, %v750_v43  ;;  %v726_v21 = vsel %vm2643_vm5, %v721_v42, %v725_v30  ;;  %v2272_v59 = vcombine.low %v869_v57, %v872_v47  ;;  %v862_v51 = vsel %vm2596_vm2, %v2183_v33, %v861_v46  ;;  %v2996_v22 = vld [vmem:[%s2552_s28 + $0x50] sm:$0x1]  ;;  %v3011_v47 = vld [vmem:[%s2552_s28 + $0x54] sm:$0xf] }
  0x7a   : > { %v2263_v55 = vcombine.low %v716_v38, %v726_v21  ;;  %v863_v45 = vrot.slane %v861_v46, 4  ;;  %v1035_v58 = vrot.slane %v1033_v44, 4  ;;  %v1038_v61 = vrot.slane %v1036_v49, 5  ;;  %v3017_v21 = vld [vmem:[%s2552_s28 + $0x58] sm:$0xf] }
  0x7b   : > { %1386 = vrot.lane.b32.xlu1 %v2264_v17, %s2485_s12  ;;  %v1046_v63 = vshrl.u32 %v2956_v48, 16  ;;  %v2280_v0 = vcombine.low %v2939_v34, %v2956_v48  ;;  %v1009_v2 = vshrl.u32 %v2195_v50, 16  ;;  %v1012_v4 = vshll.u32 %v2195_v50, 16 }
  0x7c   : > { %1384 = vrot.lane.b32.xlu0 %v2263_v55, %s2485_s12  ;;  %v865_v5 = vsel %vm2596_vm2, %v863_v45, %v864_v60  ;;  %v1022_v6 = vshrl.u32 %v2966_v53, 16  ;;  %v2279_v35 = vcombine.low %v2195_v50, %v2966_v53  ;;  %v1039_v8 = vor.u32 %v1038_v61, %v1035_v58  ;;  %v295_v58 = vld [vmem:[%s2552_s28 + $0x5c] sm:$0x1] }
  0x7d   : > { %v2271_v10 = vcombine.low %v862_v51, %v865_v5  ;;  %v1011_v11 = vrot.slane %v1009_v2, 4  ;;  %v1014_v12 = vrot.slane %v1012_v4, 5  ;;  %v1042_v14 = vshll.u32 %v2956_v48, 16 }
  0x7e   : > { %v1040_v1 = vrot.slane %v1039_v8, 4  ;;  %v1048_v3 = vrot.slane %v1046_v63, 4  ;;  %v1052_v18 = vshll.u32 %v2973_v54, 16  ;;  %v1018_v16 = vshll.u32 %v2966_v53, 16 }
  0x7f   : > { %1426 = vrot.lane.b32.xlu1 %v2272_v59, %s2482_s5  ;;  %v1044_v20 = vrot.slane %v1042_v14, 5  ;;  %v1015_v27 = vor.u32 %v1014_v12, %v1011_v11  ;;  %v1024_v13 = vrot.slane %v1022_v6, 4  ;;  %v1028_v7 = vshll.u32 %v2981_v41, 16 }
  0x80   : > { %1424 = vrot.lane.b32.xlu0 %v2271_v10, %s2482_s5  ;;  %v1054_v32 = vrot.slane %v1052_v18, 5  ;;  %v1020_v40 = vrot.slane %v1018_v16, 5  ;;  %v444_v23 = vshrl.u32 %v2985_v15, 16  ;;  %v447_v24 = vshll.u32 %v2985_v15, 16  ;;  %v498_v18 = vld [vmem:[%s2552_s28 + $0x54] sm:$0xe] }
  0x81   : > { %v1045_v29 = vsel %vm2643_vm5, %v1040_v1, %v1044_v20  ;;  %v1049_v30 = vor.u32 %v1048_v3, %v1044_v20  ;;  %v1016_v26 = vrot.slane %v1015_v27, 4  ;;  %v1030_v28 = vrot.slane %v1028_v7, 5  ;;  %v497_v7 = vld [vmem:[%s2552_s28 + $0x48] sm:$0xe] }
  0x82   : > { %v1025_v19 = vor.u32 %v1024_v13, %v1020_v40  ;;  %v446_v33 = vrot.slane %v444_v23, 4  ;;  %v449_v34 = vrot.slane %v447_v24, 5  ;;  %v453_v25 = vshll.u32 %v2992_v9, 16 }
  0x83   : > { %1474 = vrot.lane.b32.xlu1 %v2280_v0, %s2481_s30  ;;  %v1050_v36 = vrot.slane %v1049_v30, 4  ;;  %v1021_v57 = vsel %vm2643_vm5, %v1016_v26, %v1020_v40  ;;  %v457_v56 = vshrl.u32 %v2992_v9, 16  ;;  %v463_v38 = vshll.u32 %v2996_v22, 16 }
  0x84   : > { %1472 = vrot.lane.b32.xlu0 %v2279_v35, %s2481_s30  ;;  %v1026_v42 = vrot.slane %v1025_v19, 4  ;;  %v450_v46 = vor.u32 %v449_v34, %v446_v33  ;;  %v455_v60 = vrot.slane %v453_v25, 5  ;;  %v2223_v43 = vrot.slane %v2215_v31, 9  ;;  %v2216_v35 = vld [vmem:[%s2552_s28 + $0x54] sm:$0xe] }
  0x85   : > { %v1055_v44 = vsel %vm2643_vm5, %v1050_v36, %v1054_v32  ;;  %v459_v49 = vrot.slane %v457_v56, 4  ;;  %v465_v50 = vrot.slane %v463_v38, 5  ;;  %v1166_v17 = vrot.slane %v2966_v53, 5  ;;  %v3045_v31 = vld [vmem:[%s2552_s28 + $0x60] sm:$0xf] }
  0x86   : > { %v2288_v59 = vcombine.low %v1045_v29, %v1055_v44  ;;  %v1031_v51 = vsel %vm2643_vm5, %v1026_v42, %v1030_v28  ;;  %v451_v55 = vrot.slane %v450_v46, 4  ;;  %v1169_v45 = vrot.slane %v2981_v41, 5  ;;  %v2159_v44 = vld [vmem:[%s2552_s28 + $0x54] sm:$0xf] }
  0x87   : > { %v2287_v61 = vcombine.low %v1021_v57, %v1031_v51  ;;  %v460_v63 = vor.u32 %v459_v49, %v455_v60  ;;  %v1167_v0 = vsel %vm2596_vm2, %v2223_v43, %v1166_v17  ;;  %v1168_v2 = vrot.slane %v1166_v17, 4  ;;  %v3070_v51 = vld [vmem:[%s2552_s28 + $0x58] sm:$0xf] }
  0x88   : > { %1514 = vrot.lane.b32.xlu1 %v2288_v59, %s2486_s13  ;;  %v456_v53 = vsel %vm2643_vm5, %v451_v55, %v455_v60  ;;  %v468_v4 = vshrl.u32 %v3011_v47, 16  ;;  %v471_v5 = vshll.u32 %v3011_v47, 16  ;;  %v477_v6 = vshll.u32 %v3017_v21, 16  ;;  %v2162_v60 = vld [vmem:[%s2552_s28 + $0x64] sm:$0xf] }
  0x89   : > { %1512 = vrot.lane.b32.xlu0 %v2287_v61, %s2486_s13  ;;  %v461_v8 = vrot.slane %v460_v63, 4  ;;  %v1170_v41 = vsel %vm2596_vm2, %v1168_v2, %v1169_v45  ;;  %v481_v10 = vshrl.u32 %v3017_v21, 16  ;;  %v487_v11 = vshll.u32 %v295_v58, 16 }
  0x8a   : > { %v2295_v12 = vcombine.low %v1167_v0, %v1170_v41  ;;  %v470_v14 = vrot.slane %v468_v4, 4  ;;  %v473_v1 = vrot.slane %v471_v5, 5  ;;  %v479_v3 = vrot.slane %v477_v6, 5  ;;  %v2170_v4 = vld [vmem:[%s2552_s28 + $0x68] sm:$0x1] }
  0x8b   : > { %v466_v16 = vsel %vm2643_vm5, %v461_v8, %v465_v50  ;;  %v483_v20 = vrot.slane %v481_v10, 4  ;;  %v489_v27 = vrot.slane %v487_v11, 5  ;;  %v2224_v13 = vrot.slane %v2216_v35, 9  ;;  %v3086_v10 = vld [vmem:[%s2552_s28 + $0x5c] sm:$0x1] }
  0x8c   : > { %v2241_v32 = vcombine.low %v456_v53, %v466_v16  ;;  %v474_v40 = vor.u32 %v473_v1, %v470_v14  ;;  %v1173_v23 = vrot.slane %v2956_v48, 5  ;;  %v1176_v24 = vrot.slane %v2973_v54, 5  ;;  %v3047_v19 = vpop.permute.xlu1 %1338 }
  0x8d   : > { %1552 = vrot.lane.b32.xlu0 %v2295_v12, %s2487_s14  ;;  %v484_v29 = vor.u32 %v483_v20, %v479_v3  ;;  %v2146_v30 = vrot.slane %v498_v18, 9  ;;  %v577_v26 = vrot.slane %v3017_v21, 5  ;;  %v580_v28 = vrot.slane %v295_v58, 5  ;;  %v3072_v55 = vpop.permute.xlu0 %1336 }
  0x8e   : > { %1260 = vrot.lane.b32.xlu1 %v2241_v32, %s2484_s7  ;;  %v475_v33 = vrot.slane %v474_v40, 4  ;;  %v1174_v48 = vsel %vm2596_vm2, %v2224_v13, %v1173_v23  ;;  %v1175_v54 = vrot.slane %v1173_v23, 4  ;;  %v2145_v34 = vrot.slane %v497_v7, 9  ;;  %v2177_v23 = vld [vmem:[%s2552_s28 + $0x54] sm:$0xe] }
  0x8f   : > { %v485_v25 = vrot.slane %v484_v29, 4  ;;  %v578_v36 = vsel %vm2596_vm2, %v2146_v30, %v577_v26  ;;  %v579_v57 = vrot.slane %v577_v26, 4  ;;  %v570_v56 = vrot.slane %v2992_v9, 5 }
  0x90   : > { %v480_v38 = vsel %vm2643_vm5, %v475_v33, %v479_v3  ;;  %v1177_v42 = vsel %vm2596_vm2, %v1175_v54, %v1176_v24  ;;  %v573_v46 = vrot.slane %v2996_v22, 5  ;;  %v776_v43 = vshrl.u32 %v3045_v31, 16  ;;  %v3078_v5 = vpop.permute.xlu1 %1466  ;;  %v2178_v3 = vld [vmem:[%s2552_s28 + $0x60] sm:$0xe] }
  0x91   : > { %v490_v49 = vsel %vm2643_vm5, %v485_v25, %v489_v27  ;;  %v2296_v50 = vcombine.low %v1174_v48, %v1177_v42  ;;  %v581_v17 = vsel %vm2596_vm2, %v579_v57, %v580_v28  ;;  %v571_v59 = vsel %vm2596_vm2, %v2145_v34, %v570_v56 }
  0x92   : > { %v2242_v22 = vcombine.low %v480_v38, %v490_v49  ;;  %v2250_v45 = vcombine.low %v578_v36, %v581_v17  ;;  %v572_v58 = vrot.slane %v570_v56, 4  ;;  %v778_v61 = vrot.slane %v776_v43, 4  ;;  %v3093_v24 = vpop.permute.xlu0 %1464  ;;  %v3099_v38 = vld [vmem:[%s2552_s28 + $0x6c] sm:$0xf] }
  0x93   : > { %1554 = vrot.lane.b32.xlu0 %v2296_v50, %s2487_s14  ;;  %v779_v63 = vshll.u32 %v3045_v31, 16  ;;  %v789_v0 = vshrl.u32 %v2162_v60, 16  ;;  %v2258_v2 = vcombine.low %v3045_v31, %v2162_v60  ;;  %v752_v53 = vshrl.u32 %v2159_v44, 16 }
  0x94   : > { %1262 = vrot.lane.b32.xlu1 %v2242_v22, %s2484_s7  ;;  %v574_v6 = vsel %vm2596_vm2, %v572_v58, %v573_v46  ;;  %v755_v35 = vshll.u32 %v2159_v44, 16  ;;  %v765_v8 = vshrl.u32 %v3070_v51, 16  ;;  %v2257_v41 = vcombine.low %v2159_v44, %v3070_v51 }
  0x95   : > { %v2249_v11 = vcombine.low %v571_v59, %v574_v6  ;;  %v781_v12 = vrot.slane %v779_v63, 5  ;;  %v754_v14 = vrot.slane %v752_v53, 4  ;;  %v785_v1 = vshll.u32 %v2162_v60, 16  ;;  %v2199_v63 = vld [vmem:[%s2552_s28 + $0x60] sm:$0xf] }
  0x96   : > { %v757_v18 = vrot.slane %v755_v35, 5  ;;  %v791_v16 = vrot.slane %v789_v0, 4  ;;  %v795_v20 = vshll.u32 %v2170_v4, 16  ;;  %v761_v27 = vshll.u32 %v3070_v51, 16 }
  0x97   : > { %1300 = vrot.lane.b32.xlu0 %v2249_v11, %s2483_s6  ;;  %v782_v13 = vor.u32 %v781_v12, %v778_v61  ;;  %v787_v7 = vrot.slane %v785_v1, 5  ;;  %v767_v32 = vrot.slane %v765_v8, 4  ;;  %v771_v40 = vshll.u32 %v3086_v10, 16 }
  0x98   : > { %1302 = vrot.lane.b32.xlu1 %v2250_v45, %s2483_s6  ;;  %v797_v29 = vrot.slane %v795_v20, 5  ;;  %v758_v30 = vor.u32 %v757_v18, %v754_v14  ;;  %v763_v26 = vrot.slane %v761_v27, 5  ;;  %v2186_v28 = vrot.slane %v2178_v3, 9  ;;  %v2202_v45 = vld [vmem:[%s2552_s28 + $0x70] sm:$0xf]  ;;  %v3119_v0 = vpop.permute.xlu0 %1416 }
  0x99   : > { %v783_v31 = vrot.slane %v782_v13, 4  ;;  %v792_v33 = vor.u32 %v791_v16, %v787_v7  ;;  %v773_v48 = vrot.slane %v771_v40, 5  ;;  %v882_v54 = vrot.slane %v2162_v60, 5  ;;  %v3096_v34 = vpop.permute.xlu1 %1288  ;;  %v2210_v3 = vld [vmem:[%s2552_s28 + $0x74] sm:$0x1] }
  0x9a   : > { %v759_v25 = vrot.slane %v758_v30, 4  ;;  %v768_v36 = vor.u32 %v767_v32, %v763_v26  ;;  %v885_v57 = vrot.slane %v2170_v4, 5  ;;  %v2185_v56 = vrot.slane %v2177_v23, 9  ;;  %v3126_v4 = vld [vmem:[%s2552_s28 + $0x64] sm:$0xf] }
  0x9b   : > { %1348 = vrot.lane.b32.xlu0 %v2257_v41, %s2480_s29  ;;  %v788_v42 = vsel %vm2643_vm5, %v783_v31, %v787_v7  ;;  %v793_v46 = vrot.slane %v792_v33, 4  ;;  %v883_v43 = vsel %vm2596_vm2, %v2186_v28, %v882_v54  ;;  %v884_v60 = vrot.slane %v882_v54, 4  ;;  %v2209_v13 = vld [vmem:[%s2552_s28 + $0x68] sm:$0x1] }
  0x9c   : > { %1350 = vrot.lane.b32.xlu1 %v2258_v2, %s2480_s29  ;;  %v764_v44 = vsel %vm2643_vm5, %v759_v25, %v763_v26  ;;  %v769_v49 = vrot.slane %v768_v36, 4  ;;  %v875_v50 = vrot.slane %v3070_v51, 5  ;;  %v878_v17 = vrot.slane %v3086_v10, 5 }
  0x9d   : > { %v798_v59 = vsel %vm2643_vm5, %v793_v46, %v797_v29  ;;  %v886_v22 = vsel %vm2596_vm2, %v884_v60, %v885_v57  ;;  %v1081_v58 = vshrl.u32 %v3099_v38, 16  ;;  %v1084_v61 = vshll.u32 %v3099_v38, 16  ;;  %v3128_v6 = vpop.permute.xlu1 %1290  ;;  %v2218_v29 = vld [vmem:[%s2552_s28 + $0x6c] sm:$0xe] }
  0x9e   : > { %v2266_v2 = vcombine.low %v788_v42, %v798_v59  ;;  %v774_v51 = vsel %vm2643_vm5, %v769_v49, %v773_v48  ;;  %v876_v53 = vsel %vm2596_vm2, %v2185_v56, %v875_v50  ;;  %v877_v8 = vrot.slane %v875_v50, 4 }
  0x9f   : > { %v2265_v35 = vcombine.low %v764_v44, %v774_v51  ;;  %v1083_v41 = vrot.slane %v1081_v58, 4  ;;  %v1086_v10 = vrot.slane %v1084_v61, 5  ;;  %v2274_v11 = vcombine.low %v883_v43, %v886_v22  ;;  %v2217_v43 = vld [vmem:[%s2552_s28 + $0x60] sm:$0xe] }
  0xa0   : > { %1390 = vrot.lane.b32.xlu1 %v2266_v2, %s2485_s12  ;;  %v1094_v12 = vshrl.u32 %v2202_v45, 16  ;;  %v1057_v14 = vshrl.u32 %v2199_v63, 16  ;;  %v1060_v1 = vshll.u32 %v2199_v63, 16  ;;  %v879_v18 = vsel %vm2596_vm2, %v877_v8, %v878_v17 }
  0xa1   : > { %1388 = vrot.lane.b32.xlu0 %v2265_v35, %s2485_s12  ;;  %v2282_v16 = vcombine.low %v3099_v38, %v2202_v45  ;;  %v1070_v20 = vshrl.u32 %v3126_v4, 16  ;;  %v1087_v27 = vor.u32 %v1086_v10, %v1083_v41  ;;  %v2273_v7 = vcombine.low %v876_v53, %v879_v18  ;;  %v3141_v57 = vpop.permute.xlu1 %1418  ;;  %v2430_v41 = vld [vmem:[%s2552_s28 + $0x4] sm:$0xf]  ;;  %v2431_v10 = vld [vmem:[%s2552_s28] sm:$0xf] }
  0xa2   : > { %v1059_v32 = vrot.slane %v1057_v14, 4  ;;  %v1062_v40 = vrot.slane %v1060_v1, 5  ;;  %v1090_v23 = vshll.u32 %v2202_v45, 16  ;;  %v1096_v26 = vrot.slane %v1094_v12, 4 }
  0xa3   : > { %v1088_v30 = vrot.slane %v1087_v27, 4  ;;  %v1100_v28 = vshll.u32 %v2210_v3, 16  ;;  %v1066_v31 = vshll.u32 %v3126_v4, 16  ;;  %v1249_v33 = vpop.permute.xlu0 %1248  ;;  %v1072_v25 = vrot.slane %v1070_v20, 4 }
  0xa4   : > { %1430 = vrot.lane.b32.xlu1 %v2274_v11, %s2482_s5  ;;  %v1092_v48 = vrot.slane %v1090_v23, 5  ;;  %v1063_v54 = vor.u32 %v1062_v40, %v1059_v32  ;;  %v1076_v36 = vshll.u32 %v2209_v13, 16  ;;  %v2281_v56 = vcombine.low %v2199_v63, %v3126_v4  ;;  %v2433_v32 = vld [vmem:[%s2552_s28 + $0xc] sm:$0xf] }
  0xa5   : > { %1428 = vrot.lane.b32.xlu0 %v2273_v7, %s2482_s5  ;;  %v1068_v38 = vrot.slane %v1066_v31, 5  ;;  %v2226_v42 = vrot.slane %v2218_v29, 9  ;;  %v1187_v46 = vrot.slane %v2202_v45, 5  ;;  %v1102_v49 = vrot.slane %v1100_v28, 5  ;;  %v2432_v7 = vld [vmem:[%s2552_s28 + $0x10] sm:$0xf] }
  0xa6   : > { %v1093_v60 = vsel %vm2643_vm5, %v1088_v30, %v1092_v48  ;;  %v1097_v44 = vor.u32 %v1096_v26, %v1092_v48  ;;  %v1064_v50 = vrot.slane %v1063_v54, 4  ;;  %v1078_v59 = vrot.slane %v1076_v36, 5  ;;  %s2137_s5 = sshll.u32 %s3388_s16, 1 }
  0xa7   : > { %v1073_v17 = vor.u32 %v1072_v25, %v1068_v38  ;;  %v1189_v22 = vrot.slane %v1187_v46, 4  ;;  %v1190_v58 = vrot.slane %v2210_v3, 5  ;;  %v1251_v61 = vpop.permute.xlu0 %1250  ;;  %v1188_v45 = vsel %vm2596_vm2, %v2226_v42, %v1187_v46  ;;  %s262_s6 = sadd.s32 %s2137_s5, %s3390_s15 }
  0xa8   : > { %1478 = vrot.lane.b32.xlu1 %v2282_v16, %s2481_s30  ;;  %v1098_v63 = vrot.slane %v1097_v44, 4  ;;  %v2225_v2 = vrot.slane %v2217_v43, 9  ;;  %v1180_v51 = vrot.slane %v3126_v4, 5  ;;  %v1069_v53 = vsel %vm2643_vm5, %v1064_v50, %v1068_v38  ;;  %v1379_v3 = vpop.permute.xlu1 %1378  ;;  %s263_s9 = scalar_lea.vmem %s3371_s3, %s262_s6  ;;  %s270_s12 = scalar_lea.vmem %s3372_s4, %s262_s6 }
  0xa9   : > { %1476 = vrot.lane.b32.xlu0 %v2281_v56, %s2481_s30  ;;  %v1074_v35 = vrot.slane %v1073_v17, 4  ;;  %v1183_v8 = vrot.slane %v2209_v13, 5  ;;  %v2227_v11 = vcombine.low %v2431_v10, %v2430_v41  ;;  %v1191_v14 = vsel %vm2596_vm2, %v1189_v22, %v1190_v58  ;;  %s3279_s30 = scalar_lea.vmem %s3370_s2, %s2136_s27 }
  0xaa   : > { %v1103_v12 = vsel %vm2643_vm5, %v1098_v63, %v1102_v49  ;;  %v1181_v4 = vsel %vm2596_vm2, %v2225_v2, %v1180_v51  ;;  %v1182_v1 = vrot.slane %v1180_v51, 4  ;;  %v2228_v40 = vcombine.low %v2433_v32, %v2432_v7  ;;  %v2435_v2 = vld [vmem:[%s2552_s28 + $0x1c] sm:$0xf] }
  0xab   : > { %v2290_v18 = vcombine.low %v1093_v60, %v1103_v12  ;;  %v1079_v16 = vsel %vm2643_vm5, %v1074_v35, %v1078_v59  ;;  %v1563_v13 = vsel %vm1560_vm6, %v2227_v11, %v1249_v33  ;;  %v1377_v23 = vpop.permute.xlu0 %1376  ;;  %v2298_v29 = vcombine.low %v1188_v45, %v1191_v14  ;;  %v2434_v45 = vld [vmem:[%s2552_s28 + $0x18] sm:$0xf]  ;;  %v2436_v11 = vld [vmem:[%s2552_s28 + $0x24] sm:$0xf]  ;;  %v2437_v12 = vld [vmem:[%s2552_s28 + $0x28] sm:$0xf] }
  0xac   : > { %v2289_v20 = vcombine.low %v1069_v53, %v1079_v16  ;;  %v1184_v27 = vsel %vm2596_vm2, %v1182_v1, %v1183_v8  ;;  %v1587_v30 = vsel %vm1585_vm7, %v1563_v13, %v3096_v34  ;;  %v1566_v26 = vsel %vm1560_vm6, %v2228_v40, %v1251_v61 }
  0xad   : > { %1518 = vrot.lane.b32.xlu1 %v2290_v18, %s2486_s13  ;;  %v2297_v37 = vcombine.low %v1181_v4, %v1184_v27  ;;  %v1604_v28 = vsel %vm1602_vm8, %v1587_v30, %v3072_v55  ;;  %v1589_v31 = vsel %vm1585_vm7, %v1566_v26, %v3128_v6  ;;  %v1743_v25 = vsel %vm1741_vm12, %v2424_v39, 0 }
  0xae   : > { %1516 = vrot.lane.b32.xlu0 %v2289_v20, %s2486_s13  ;;  %v1621_v34 = vsel %vm1619_vm9, %v1604_v28, %v1377_v23  ;;  %v1606_v33 = vsel %vm1602_vm8, %v1589_v31, %v3047_v19  ;;  %v1507_v54 = vpop.permute.xlu1 %1506  ;;  %2328 = vmatpush3.bf16.msra.mxu0 %v1743_v25  ;;  %v2234_v36 = vcombine.low %v3011_v47, %v3017_v21 }
  0xaf   : > { %v1638_v48 = vsel %vm1636_vm10, %v1621_v34, %v3119_v0  ;;  %v1623_v55 = vsel %vm1619_vm9, %v1606_v33, %v1379_v3  ;;  %v2233_v0 = vcombine.low %v2985_v15, %v2992_v9  ;;  %2350 = vmatpush3.bf16.msra.mxu1 %v1743_v25  ;;  %v2229_v51 = vcombine.low %v2434_v45, %v2435_v2 }
  0xb0   : > { %v1655_v19 = vsel %vm1653_vm11, %v1638_v48, %v3093_v24  ;;  %v1640_v56 = vsel %vm1636_vm10, %v1623_v55, %v3141_v57  ;;  %v2230_v14 = vcombine.low %v2436_v11, %v2437_v12 }
  0xb1   : > { %1558 = vrot.lane.b32.xlu1 %v2298_v29, %s2487_s14  ;;  %v1657_v24 = vsel %vm1653_vm11, %v1640_v56, %v3078_v5  ;;  %v2438_v56 = vld [vmem:[%s2552_s28 + $0x30] sm:$0xf] }
  0xb2   : > { %1556 = vrot.lane.b32.xlu0 %v2297_v37, %s2487_s14  ;;  %v1505_v6 = vpop.permute.xlu0 %1504  ;;  %v1674_v60 = vsel %vm1670_vm13, %v1657_v24, %v1507_v54 }
  0xb3   : > { %v1672_v38 = vsel %vm1670_vm13, %v1655_v19, %v1505_v6 }
  0xb5   : > { %v1253_v42 = vpop.permute.xlu1 %1252 }
  0xb6   : > { %v1545_v46 = vpop.permute.xlu0 %1544  ;;  %v1569_v8 = vsel %vm1560_vm6, %v2229_v51, %v1253_v42 }
  0xb7   : > { %v1689_v43 = vsel %vm1687_vm14, %v1672_v38, %v1545_v46  ;;  %v2439_v38 = vld [vmem:[%s2552_s28 + $0x34] sm:$0xf] }
  0xb8   : > { %2329 = vmatprep.mubr.msk.bf16.mxu0 %vm1724_vm15, %v1689_v43  ;;  %v2231_v42 = vcombine.low %v2438_v56, %v2439_v38 }
  0xbb   : > { %v1547_v44 = vpop.permute.xlu0 %1546 }
  0xbc   : > { %v1255_v49 = vpop.permute.xlu1 %1254  ;;  %v1691_v57 = vsel %vm1687_vm14, %v1674_v60, %v1547_v44 }
  0xbd   : > { %2330 = vmatmul.mubr.msk.bf16.vlgmr.msra.gmra.mrb[0].mxu0 %vm1724_vm15, %v1691_v57  ;;  %v1572_v20 = vsel %vm1560_vm6, %v2230_v14, %v1255_v49  ;;  %v2232_v49 = vcombine.low %v2861_v52, %v2867_v62 }
  0xbf   : > { %v1293_v50 = vpop.permute.xlu0 %1292 }
  0xc0   : > { %v1295_v17 = vpop.permute.xlu1 %1294  ;;  %v1591_v41 = vsel %vm1585_vm7, %v1569_v8, %v1293_v50 }
  0xc1   : > { %v1593_v7 = vsel %vm1585_vm7, %v1572_v20, %v1295_v17 }
  0xc3   : > { %v1341_v59 = vpop.permute.xlu0 %1340 }
  0xc4   : > { %v1343_v22 = vpop.permute.xlu1 %1342  ;;  %v1608_v4 = vsel %vm1602_vm8, %v1591_v41, %v1341_v59 }
  0xc5   : > { %v1610_v23 = vsel %vm1602_vm8, %v1593_v7, %v1343_v22 }
  0xc8   : > { %v1383_v58 = vpop.permute.xlu1 %1382 }
  0xc9   : > { %v1381_v61 = vpop.permute.xlu0 %1380  ;;  %v1627_v29 = vsel %vm1619_vm9, %v1610_v23, %v1383_v58 }
  0xca   : > { %v1625_v3 = vsel %vm1619_vm9, %v1608_v4, %v1381_v61 }
  0xcc   : > { %v1423_v5 = vpop.permute.xlu1 %1422 }
  0xcd   : > { %v1421_v63 = vpop.permute.xlu0 %1420  ;;  %v1644_v30 = vsel %vm1636_vm10, %v1627_v29, %v1423_v5 }
  0xce   : > { %v1642_v18 = vsel %vm1636_vm10, %v1625_v3, %v1421_v63 }
  0xd0   : > { %v1471_v53 = vpop.permute.xlu1 %1470 }
  0xd1   : > { %v1469_v35 = vpop.permute.xlu0 %1468  ;;  %v1661_v39 = vsel %vm1653_vm11, %v1644_v30, %v1471_v53 }
  0xd2   : > { %v1659_v16 = vsel %vm1653_vm11, %v1642_v18, %v1469_v35 }
  0xd5   : > { %v1511_v10 = vpop.permute.xlu1 %1510 }
  0xd6   : > { %v1509_v1 = vpop.permute.xlu0 %1508  ;;  %v1678_v37 = vsel %vm1670_vm13, %v1661_v39, %v1511_v10 }
  0xd7   : > { %v1676_v27 = vsel %vm1670_vm13, %v1659_v16, %v1509_v1 }
  0xda   : > { %v1549_v13 = vpop.permute.xlu0 %1548 }
  0xdb   : > { %v1257_v32 = vpop.permute.xlu1 %1256  ;;  %v1693_v40 = vsel %vm1687_vm14, %v1676_v27, %v1549_v13 }
  0xdc   : > { %2333 = vmatprep.mubr.msk.bf16.mxu0 %vm1724_vm15, %v1693_v40  ;;  %v1575_v24 = vsel %vm1560_vm6, %v2231_v42, %v1257_v32 }
  0xe0   : > { %v1551_v26 = vpop.permute.xlu0 %1550 }
  0xe1   : > { %v1259_v28 = vpop.permute.xlu1 %1258  ;;  %v1695_v31 = vsel %vm1687_vm14, %v1678_v37, %v1551_v26 }
  0xe2   : > { %2334 = vmatmul.mubr.msk.bf16.gmra.mrb[4].mxu0 %vm1724_vm15, %v1695_v31  ;;  %v1578_v58 = vsel %vm1560_vm6, %v2232_v49, %v1259_v28 }
  0xe4   : > { %v1297_v34 = vpop.permute.xlu0 %1296 }
  0xe5   : > { %v1299_v33 = vpop.permute.xlu1 %1298  ;;  %v1595_v60 = vsel %vm1585_vm7, %v1575_v24, %v1297_v34 }
  0xe6   : > { %v1597_v63 = vsel %vm1585_vm7, %v1578_v58, %v1299_v33 }
  0xe8   : > { %v1345_v48 = vpop.permute.xlu0 %1344 }
  0xe9   : > { %v1347_v54 = vpop.permute.xlu1 %1346  ;;  %v1612_v57 = vsel %vm1602_vm8, %v1595_v60, %v1345_v48 }
  0xea   : > { %v1614_v52 = vsel %vm1602_vm8, %v1597_v63, %v1347_v54 }
  0xed   : > { %v1387_v25 = vpop.permute.xlu1 %1386 }
  0xee   : > { %v1385_v55 = vpop.permute.xlu0 %1384  ;;  %v1631_v62 = vsel %vm1619_vm9, %v1614_v52, %v1387_v25 }
  0xef   : > { %v1629_v17 = vsel %vm1619_vm9, %v1612_v57, %v1385_v55 }
  0xf1   : > { %v1427_v6 = vpop.permute.xlu1 %1426 }
  0xf2   : > { %v1425_v19 = vpop.permute.xlu0 %1424  ;;  %v1648_v51 = vsel %vm1636_vm10, %v1631_v62, %v1427_v6 }
  0xf3   : > { %v1646_v59 = vsel %vm1636_vm10, %v1629_v17, %v1425_v19 }
  0xf5   : > { %v1475_v46 = vpop.permute.xlu1 %1474 }
  0xf6   : > { %v1473_v43 = vpop.permute.xlu0 %1472  ;;  %v1665_v53 = vsel %vm1653_vm11, %v1648_v51, %v1475_v46 }
  0xf7   : > { %v1663_v22 = vsel %vm1653_vm11, %v1646_v59, %v1473_v43 }
  0xfa   : > { %v1515_v44 = vpop.permute.xlu1 %1514 }
  0xfb   : > { %v1513_v50 = vpop.permute.xlu0 %1512  ;;  %v1682_v35 = vsel %vm1670_vm13, %v1665_v53, %v1515_v44 }
  0xfc   : > { %v1680_v61 = vsel %vm1670_vm13, %v1663_v22, %v1513_v50 }
  0xff   : > { %v1553_v5 = vpop.permute.xlu0 %1552 }
 0x100   : > { %v1261_v45 = vpop.permute.xlu1 %1260  ;;  %v1697_v2 = vsel %vm1687_vm14, %v1680_v61, %v1553_v5 }
 0x101   : > { %2337 = vmatprep.mubr.msk.bf16.mxu1 %vm1724_vm15, %v1697_v2  ;;  %v1581_v7 = vsel %vm1560_vm6, %v2233_v0, %v1261_v45 }
 0x105   : > { %v1555_v8 = vpop.permute.xlu0 %1554 }
 0x106   : > { %v1263_v41 = vpop.permute.xlu1 %1262  ;;  %v1699_v10 = vsel %vm1687_vm14, %v1682_v35, %v1555_v8 }
 0x107   : > { %2338 = vmatmul.mubr.msk.bf16.vlgmr.msra.gmra.mrb[0].mxu1 %vm1724_vm15, %v1699_v10  ;;  %v1584_v13 = vsel %vm1560_vm6, %v2234_v36, %v1263_v41 }
 0x109   : > { %v1301_v11 = vpop.permute.xlu0 %1300 }
 0x10a   : > { %v1303_v12 = vpop.permute.xlu1 %1302  ;;  %v1599_v40 = vsel %vm1585_vm7, %v1581_v7, %v1301_v11 }
 0x10b   : > { %v1601_v32 = vsel %vm1585_vm7, %v1584_v13, %v1303_v12 }
 0x10d   : > { %v1349_v14 = vpop.permute.xlu0 %1348 }
 0x10e   : > { %v1351_v4 = vpop.permute.xlu1 %1350  ;;  %v1616_v30 = vsel %vm1602_vm8, %v1599_v40, %v1349_v14 }
 0x10f   : > { %v1618_v23 = vsel %vm1602_vm8, %v1601_v32, %v1351_v4 }
 0x112   : > { %v1391_v1 = vpop.permute.xlu1 %1390 }
 0x113   : > { %v1389_v3 = vpop.permute.xlu0 %1388  ;;  %v1635_v39 = vsel %vm1619_vm9, %v1618_v23, %v1391_v1 }
 0x114   : > { %v1633_v21 = vsel %vm1619_vm9, %v1616_v30, %v1389_v3 }
 0x116   : > { %v1431_v18 = vpop.permute.xlu1 %1430 }
 0x117   : > { %v1429_v16 = vpop.permute.xlu0 %1428  ;;  %v1652_v15 = vsel %vm1636_vm10, %v1635_v39, %v1431_v18 }
 0x118   : > { %v1650_v9 = vsel %vm1636_vm10, %v1633_v21, %v1429_v16 }
 0x11a   : > { %v1479_v20 = vpop.permute.xlu1 %1478 }
 0x11b   : > { %v1477_v27 = vpop.permute.xlu0 %1476  ;;  %v1669_v0 = vsel %vm1653_vm11, %v1652_v15, %v1479_v20 }
 0x11c   : > { %v1667_v36 = vsel %vm1653_vm11, %v1650_v9, %v1477_v27 }
 0x11f   : > { %v1519_v29 = vpop.permute.xlu1 %1518 }
 0x120   : > { %v1517_v47 = vpop.permute.xlu0 %1516  ;;  %v1686_v37 = vsel %vm1670_vm13, %v1669_v0, %v1519_v29 }
 0x121   : > { %v1684_v28 = vsel %vm1670_vm13, %v1667_v36, %v1517_v47 }
 0x123   : > { %v1559_v26 = vpop.permute.xlu1 %1558 }
 0x124   : > { %v1703_v31 = vsel %vm1687_vm14, %v1686_v37, %v1559_v26  ;;  %v1557_v34 = vpop.permute.xlu0 %1556 }
 0x125   : > { %v1701_v33 = vsel %vm1687_vm14, %v1684_v28, %v1557_v34 }
 0x126   : > { %2341 = vmatprep.mubr.msk.bf16.mxu1 %vm1724_vm15, %v1701_v33 }
 0x127   : > { %2342 = vmatmul.mubr.msk.bf16.gmra.mrb[4].mxu1 %vm1724_vm15, %v1703_v31 }
 0x190   : > { %v2331_v48 = vpop.f32.mrb[0].mxu0 }
 0x191   : > { %1844 = vst.msk [vmem:[%s3279_s30 + $0x10] sm:$0xff] %vm1585_vm7, %v2331_v48  ;;  %v1779_v54 = vpop.f32.mrb[1].mxu0  ;;  %v1899_v19 = vmul.f32 %v2331_v48, %v2331_v48  ;;  %v1861_v43 = vsel %vm1585_vm7, %v2331_v48, 0.0 }
 0x192   : > { %1842 = vst.msk [vmem:[%s3279_s30] sm:$0xff] %vm1585_vm7, %v1779_v54  ;;  %v1897_v25 = vmul.f32 %v1779_v54, %v1779_v54  ;;  %v2332_v55 = vpop.f32.mrb[2].mxu0  ;;  %v1858_v56 = vsel %vm1585_vm7, %v1779_v54, 0.0 }
 0x193   : > { %1845 = vst.msk [vmem:[%s3279_s30 + $0x18] sm:$0xff] %vm1585_vm7, %v2332_v55  ;;  %v1782_v6 = vpop.f32.mrb[3].mxu0  ;;  %v1900_v60 = vmul.f32 %v2332_v55, %v2332_v55  ;;  %v1916_v50 = vsel %vm1585_vm7, %v1899_v19, 0.0  ;;  %v1863_v17 = vsel %vm1585_vm7, %v2332_v55, 0.0 }
 0x194   : > { %1843 = vst.msk [vmem:[%s3279_s30 + $0x8] sm:$0xff] %vm1585_vm7, %v1782_v6  ;;  %v1859_v38 = vsel %vm1585_vm7, %v1782_v6, 0.0  ;;  %v1898_v42 = vmul.f32 %v1782_v6, %v1782_v6  ;;  %v1913_v24 = vsel %vm1585_vm7, %v1897_v25, 0.0 }
 0x195   : > { %v1860_v46 = vadd.f32 %v1859_v38, %v1858_v56  ;;  %v1918_v58 = vsel %vm1585_vm7, %v1900_v60, 0.0 }
 0x196   : > { %v1914_v44 = vsel %vm1585_vm7, %v1898_v42, 0.0 }
 0x197   : > { %v1862_v49 = vadd.f32 %v1861_v43, %v1860_v46  ;;  %v1915_v57 = vadd.f32 %v1914_v44, %v1913_v24 }
 0x199   : > { %v1917_v59 = vadd.f32 %v1916_v50, %v1915_v57  ;;  %v1864_v22 = vadd.f32 %v1863_v17, %v1862_v49 }
 0x19b   : > { %v1919_v61 = vadd.f32 %v1918_v58, %v1917_v59 }
 0x1b5   : > { %v2335_v5 = vpop.f32.mrb[4].mxu0 }
 0x1b6   : > { %1848 = vst.msk [vmem:[%s3279_s30 + $0x30] sm:$0xff] %vm1585_vm7, %v2335_v5  ;;  %v1795_v63 = vpop.f32.mrb[5].mxu0  ;;  %v1903_v53 = vmul.f32 %v2335_v5, %v2335_v5  ;;  %v1869_v12 = vsel %vm1585_vm7, %v2335_v5, 0.0 }
 0x1b7   : > { %1846 = vst.msk [vmem:[%s3279_s30 + $0x20] sm:$0xff] %vm1585_vm7, %v1795_v63  ;;  %v1865_v45 = vsel %vm1585_vm7, %v1795_v63, 0.0  ;;  %v1901_v2 = vmul.f32 %v1795_v63, %v1795_v63  ;;  %v2336_v52 = vpop.f32.mrb[6].mxu0 }
 0x1b8   : > { %v1866_v62 = vadd.f32 %v1865_v45, %v1864_v22  ;;  %1849 = vst.msk [vmem:[%s3279_s30 + $0x38] sm:$0xff] %vm1585_vm7, %v2336_v52  ;;  %v1798_v51 = vpop.f32.mrb[7].mxu0  ;;  %v1904_v14 = vmul.f32 %v2336_v52, %v2336_v52  ;;  %v1924_v18 = vsel %vm1585_vm7, %v1903_v53, 0.0  ;;  %v1871_v16 = vsel %vm1585_vm7, %v2336_v52, 0.0 }
 0x1b9   : > { %v1920_v35 = vsel %vm1585_vm7, %v1901_v2, 0.0  ;;  %1847 = vst.msk [vmem:[%s3279_s30 + $0x28] sm:$0xff] %vm1585_vm7, %v1798_v51  ;;  %v1867_v8 = vsel %vm1585_vm7, %v1798_v51, 0.0  ;;  %v1902_v41 = vmul.f32 %v1798_v51, %v1798_v51 }
 0x1ba   : > { %v1921_v10 = vadd.f32 %v1920_v35, %v1919_v61  ;;  %v1868_v11 = vadd.f32 %v1867_v8, %v1866_v62  ;;  %v1926_v13 = vsel %vm1585_vm7, %v1904_v14, 0.0 }
 0x1bb   : > { %v1922_v4 = vsel %vm1585_vm7, %v1902_v41, 0.0 }
 0x1bc   : > { %v1870_v1 = vadd.f32 %v1869_v12, %v1868_v11  ;;  %v1923_v3 = vadd.f32 %v1922_v4, %v1921_v10 }
 0x1be   : > { %v1925_v20 = vadd.f32 %v1924_v18, %v1923_v3  ;;  %v1872_v27 = vadd.f32 %v1871_v16, %v1870_v1 }
 0x1c0   : > { %v1927_v7 = vadd.f32 %v1926_v13, %v1925_v20 }
 0x1da   : > { %v2339_v32 = vpop.f32.mrb[0].mxu1 }
 0x1db   : > { %1852 = vst.msk [vmem:[%s3279_s30 + $0x50] sm:$0xff] %vm1585_vm7, %v2339_v32  ;;  %v1811_v40 = vpop.f32.mrb[1].mxu1  ;;  %v1907_v21 = vmul.f32 %v2339_v32, %v2339_v32  ;;  %v1877_v26 = vsel %vm1585_vm7, %v2339_v32, 0.0 }
 0x1dc   : > { %1850 = vst.msk [vmem:[%s3279_s30 + $0x40] sm:$0xff] %vm1585_vm7, %v1811_v40  ;;  %v1873_v23 = vsel %vm1585_vm7, %v1811_v40, 0.0  ;;  %v1905_v29 = vmul.f32 %v1811_v40, %v1811_v40  ;;  %v2340_v30 = vpop.f32.mrb[2].mxu1 }
 0x1dd   : > { %v1874_v39 = vadd.f32 %v1873_v23, %v1872_v27  ;;  %1853 = vst.msk [vmem:[%s3279_s30 + $0x58] sm:$0xff] %vm1585_vm7, %v2340_v30  ;;  %v1814_v47 = vpop.f32.mrb[3].mxu1  ;;  %v1908_v28 = vmul.f32 %v2340_v30, %v2340_v30  ;;  %v1932_v48 = vsel %vm1585_vm7, %v1907_v21, 0.0  ;;  %v1879_v54 = vsel %vm1585_vm7, %v2340_v30, 0.0 }
 0x1de   : > { %v1928_v15 = vsel %vm1585_vm7, %v1905_v29, 0.0  ;;  %1851 = vst.msk [vmem:[%s3279_s30 + $0x48] sm:$0xff] %vm1585_vm7, %v1814_v47  ;;  %v1875_v9 = vsel %vm1585_vm7, %v1814_v47, 0.0  ;;  %v1906_v0 = vmul.f32 %v1814_v47, %v1814_v47 }
 0x1df   : > { %v1929_v36 = vadd.f32 %v1928_v15, %v1927_v7  ;;  %v1876_v37 = vadd.f32 %v1875_v9, %v1874_v39  ;;  %v1934_v6 = vsel %vm1585_vm7, %v1908_v28, 0.0 }
 0x1e0   : > { %v1930_v31 = vsel %vm1585_vm7, %v1906_v0, 0.0 }
 0x1e1   : > { %v1878_v34 = vadd.f32 %v1877_v26, %v1876_v37  ;;  %v1931_v33 = vadd.f32 %v1930_v31, %v1929_v36 }
 0x1e3   : > { %v1933_v25 = vadd.f32 %v1932_v48, %v1931_v33  ;;  %v1880_v55 = vadd.f32 %v1879_v54, %v1878_v34 }
 0x1e5   : > { %v1935_v19 = vadd.f32 %v1934_v6, %v1933_v25 }
 0x1fa   : > { %v2343_v56 = vpop.f32.mrb[4].mxu1 }
 0x1fb   : > { %1856 = vst.msk [vmem:[%s3279_s30 + $0x70] sm:$0xff] %vm1585_vm7, %v2343_v56  ;;  %v1827_v38 = vpop.f32.mrb[5].mxu1  ;;  %v1911_v44 = vmul.f32 %v2343_v56, %v2343_v56  ;;  %v1885_v22 = vsel %vm1585_vm7, %v2343_v56, 0.0 }
 0x1fc   : > { %1854 = vst.msk [vmem:[%s3279_s30 + $0x60] sm:$0xff] %vm1585_vm7, %v1827_v38  ;;  %v1881_v42 = vsel %vm1585_vm7, %v1827_v38, 0.0  ;;  %v1909_v46 = vmul.f32 %v1827_v38, %v1827_v38  ;;  %v2344_v43 = vpop.f32.mrb[6].mxu1 }
 0x1fd   : > { %v1882_v24 = vadd.f32 %v1881_v42, %v1880_v55  ;;  %1857 = vst.msk [vmem:[%s3279_s30 + $0x78] sm:$0xff] %vm1585_vm7, %v2344_v43  ;;  %v1830_v60 = vpop.f32.mrb[7].mxu1  ;;  %v1912_v58 = vmul.f32 %v2344_v43, %v2344_v43  ;;  %v1940_v45 = vsel %vm1585_vm7, %v1911_v44, 0.0  ;;  %v1887_v2 = vsel %vm1585_vm7, %v2344_v43, 0.0 }
 0x1fe   : > { %v1936_v49 = vsel %vm1585_vm7, %v1909_v46, 0.0  ;;  %1855 = vst.msk [vmem:[%s3279_s30 + $0x68] sm:$0xff] %vm1585_vm7, %v1830_v60  ;;  %v1883_v57 = vsel %vm1585_vm7, %v1830_v60, 0.0  ;;  %v1910_v50 = vmul.f32 %v1830_v60, %v1830_v60 }
 0x1ff   : > { %v1937_v17 = vadd.f32 %v1936_v49, %v1935_v19  ;;  %v1884_v59 = vadd.f32 %v1883_v57, %v1882_v24  ;;  %v1942_v51 = vsel %vm1585_vm7, %v1912_v58, 0.0 }
 0x200   : > { %v1938_v61 = vsel %vm1585_vm7, %v1910_v50, 0.0 }
 0x201   : > { %v1886_v5 = vadd.f32 %v1885_v22, %v1884_v59  ;;  %v1939_v63 = vadd.f32 %v1938_v61, %v1937_v17 }
 0x203   : > { %v1888_v52 = vadd.f32 %v1887_v2, %v1886_v5  ;;  %v1941_v62 = vadd.f32 %v1940_v45, %v1939_v63 }
 0x205   : > { %v1889_v53 = vrot.slane %v1888_v52, 4  ;;  %v1943_v35 = vadd.f32 %v1942_v51, %v1941_v62 }
 0x207   : > { %v1890_v8 = vadd.f32 %v1889_v53, %v1888_v52  ;;  %v1944_v41 = vrot.slane %v1943_v35, 4 }
 0x209   : > { %v1891_v10 = vrot.slane %v1890_v8, 2  ;;  %v1945_v11 = vadd.f32 %v1944_v41, %v1943_v35 }
 0x20b   : > { %v1892_v12 = vadd.f32 %v1891_v10, %v1890_v8  ;;  %v1946_v14 = vrot.slane %v1945_v11, 2 }
 0x20d   : > { %v1893_v4 = vrot.slane %v1892_v12, 1  ;;  %v1947_v1 = vadd.f32 %v1946_v14, %v1945_v11 }
 0x20f   : > { %v1894_v3 = vadd.f32 %v1893_v4, %v1892_v12  ;;  %v1948_v18 = vrot.slane %v1947_v1, 1 }
 0x211   : > { %1896 = vst.msk [vmem:[%s263_s9] sm:$0x1] %vm1895_vm0, %v1894_v3  ;;  %v1949_v16 = vadd.f32 %v1948_v18, %v1947_v1 }
 0x213   : > { %1950 = vst.msk [vmem:[%s270_s12] sm:$0x1] %vm1895_vm0, %v1949_v16 }
 0x214 PF: > { %s15_s19 = sadd.s32 1, %s2478_s19   ;;  %s3377_s15 = smov %s2470_s17 }
 0x215   : > { %p12_p7 = scmp.ge.s32.totalorder %s15_s19, 6   ;;  %s3378_s16 = smov %s2474_s18 }
 0x216   : > { %s3379_s17 = smov %s3382_s20  ;;  %s3380_s18 = smov %s3386_s21 }
 0x217   :  { %14 = sbr.rel (!%p12_p7) target bundleno = 3 (0x3), region = 84 }

// kernel: downsample_forward.6
= control target key start
LH: loop header
LB: loop body
LE: loop exit
PB: predicated region body
PF: predicated region fallthrough
CT: control target
= control target key end

     0   :  { %s2543_s15 = smov 0   ;;  %s2545_s16 = smov 0   ;;  %s3407_s0 = inlined_call_operand.vmem [shape: bf16[2,2,10,18,8], index: 0, kind: input, shape index: {}]   ;;  %s3408_s1 = inlined_call_operand.vmem [shape: bf16[72,8], index: 1, kind: input, shape index: {}]   ;;  %s3409_s2 = inlined_call_operand.vmem [shape: f32[2,2,128,8], index: 2, kind: output, shape index: {0}]   ;;  %s3410_s3 = inlined_call_operand.vmem [shape: f32[2,2,1,8], index: 3, kind: output, shape index: {1}]   ;;  %s3411_s4 = inlined_call_operand.vmem [shape: f32[2,2,1,8], index: 4, kind: output, shape index: {2}]  }
   0x1   :  { %s2547_s17 = smov 0   ;;  %s2549_s18 = smov 0  }
   0x2   :  { %s2551_s19 = smov 0  }
   0x3 LB: > { %s24_s20 = sadd.s32 1, %s2500_s17  ;;  %s27_s21 = sadd.s32 1, %s2504_s18  ;;  %s2508_s19 = sphi %s2551_s19, %s15_s19   ;;  %s2504_s18 = sphi %s2549_s18, %s3419_s18   ;;  %s2500_s17 = sphi %s2547_s17, %s3418_s17   ;;  %s2496_s16 = sphi %s2545_s16, %s3417_s16   ;;  %s2492_s15 = sphi %s2543_s15, %s3416_s15  }
   0x4   : > { %p25_p0 = scmp.ge.s32.totalorder %s24_s20, 2  ;;  %p2148_p1 = scmp.ge.s32.totalorder %s2508_s19, 1 }
   0x5   : > { %p191_p2 = scmp.lt.s32.totalorder %s2508_s19, 5 }
   0x6   : > { %s3421_s20 = smov (%p25_p0, %s24_s20), 0  ;;  %s3423_s21 = smov (!%p25_p0, %s27_s21), %s2504_s18 }
   0x7   : > { %p192_p3 = pnand %p2148_p1, %p191_p2  ;;  %p29_p4 = scmp.ge.s32.totalorder %s3423_s21, 2 }
   0x8   : > { %p239_p5 = scmp.lt.s32.totalorder (!%p192_p3), %s2496_s16, 1  ;;  %p241_p6 = scmp.lt.s32.totalorder (!%p192_p3), %s2492_s15, 1  ;;  %vm523_vm0 = vcmask (!%p192_p3), 1042432   ;;  %vm524_vm1 = vcmask (!%p192_p3), 1046532   ;;  %vm296_vm3 = vsmask.f32 (!%p192_p3), 3328 }
   0x9   : > { %s3425_s21 = smov (%p29_p4, %s3423_s21), 0  ;;  %195 = sbr.rel (%p192_p3) target bundleno = 532 (0x214), region = 28 }
   0xa   : > { %s2510_s29 = smov (!%p192_p3), 24   ;;  %s2511_s30 = smov (!%p192_p3), 48   ;;  %vm2626_vm2 = vmor (!%p192_p3), %vm523_vm0, %vm524_vm1  ;;  %vm297_vm4 = vsmask.f32 (!%p192_p3), 7440  ;;  %vm1560_vm6 = vcmask (!%p192_p3), 64512   ;;  %vm1585_vm7 = vcmask (!%p192_p3), 130048  }
   0xb   : > { %s2512_s5 = smov (!%p192_p3), 40   ;;  %s2513_s6 = smov (!%p192_p3), 16   ;;  %vm2673_vm5 = vmor (!%p192_p3), %vm296_vm3, %vm297_vm4  ;;  %vm1602_vm8 = vcmask (!%p192_p3), 195584   ;;  %vm1619_vm9 = vcmask (!%p192_p3), 261120   ;;  %vm1636_vm10 = vcmask (!%p192_p3), 326656   ;;  %vm1653_vm11 = vcmask (!%p192_p3), 392192  }
   0xc   : > { %s2514_s7 = smov (!%p192_p3), 8   ;;  %s2515_s12 = smov (!%p192_p3), 32   ;;  %vm1757_vm12 = vcmask (!%p192_p3), 1043456   ;;  %vm1670_vm13 = vcmask (!%p192_p3), 457728   ;;  %vm1687_vm14 = vcmask (!%p192_p3), 523264   ;;  %vm1740_vm15 = vcmask (!%p192_p3), 588800  }
   0xd   : > { %vm1911_vm0 = vcmask (!%p192_p3), 57344  }
  0x10   : > { %s3427_s16 = smov (!%p239_p5, %s2496_s16), 1  ;;  %s3429_s15 = smov (!%p241_p6, %s2492_s15), 1 }
  0x11   : > { %s2382_s22 = smul.u32 60, %s3427_s16  ;;  %s2153_s9 = sshll.u32 %s3427_s16, 1 }
  0x12   : > { %s2381_s23 = smul.u32 30, %s3429_s15  ;;  %s262_s10 = sadd.s32 %s2153_s9, %s3429_s15 }
  0x13   : > { %s263_s13 = scalar_lea.vmem %s3410_s3, %s262_s10 }
  0x14   : > { %s245_s24 = sadd.s32 %s2382_s22, %s2381_s23  ;;  %s270_s23 = scalar_lea.vmem %s3411_s4, %s262_s10 }
  0x15   : > { %s2149_s25 = sshll.u32 %s245_s24, 2  ;;  %s2516_s24 = smov 56  }
  0x16   : > { %s2582_s28 = scalar_lea.vmem %s3407_s0, %s2149_s25  ;;  %s2517_s25 = smov 64  }
  0x17   : > { %v2165_v0 = vld [vmem:[%s2582_s28 + $0x18] sm:$0xf]  ;;  %v2586_v1 = vld [vmem:[%s2582_s28 + $0x1c] sm:$0xf]  ;;  %v2163_v2 = vld [vmem:[%s2582_s28 + $0xc] sm:$0xf] }
  0x18   : > { %v641_v3 = vshll.u32 %v2586_v1, 16  ;;  %v645_v4 = vshrl.u32 %v2586_v1, 16  ;;  %v2268_v5 = vcombine.low %v2165_v0, %v2586_v1  ;;  %v632_v6 = vshrl.u32 %v2165_v0, 16  ;;  %v2593_v7 = vld [vmem:[%s2582_s28 + $0x10] sm:$0xf] }
  0x19   : > { %v635_v8 = vshll.u32 %v2165_v0, 16  ;;  %v617_v9 = vshll.u32 %v2593_v7, 16  ;;  %v621_v10 = vshrl.u32 %v2593_v7, 16  ;;  %v2267_v11 = vcombine.low %v2163_v2, %v2593_v7  ;;  %v2205_v12 = vld [vmem:[%s2582_s28 + $0x24] sm:$0xf] }
  0x1a   : > { %v2599_v13 = vrot.slane %v645_v4, 4  ;;  %1338 = vrot.lane.b32.xlu1 %v2268_v5, %s2510_s29  ;;  %v634_v14 = vrot.slane %v632_v6, 4  ;;  %v608_v15 = vshrl.u32 %v2163_v2, 16  ;;  %v611_v16 = vshll.u32 %v2163_v2, 16  ;;  %v2603_v17 = vld [vmem:[%s2582_s28 + $0x28] sm:$0xf] }
  0x1b   : > { %v637_v18 = vrot.slane %v635_v8, 5  ;;  %v2605_v19 = vrot.slane %v621_v10, 4  ;;  %1336 = vrot.lane.b32.xlu0 %v2267_v11, %s2510_s29  ;;  %v937_v20 = vshrl.u32 %v2205_v12, 16  ;;  %v940_v21 = vshll.u32 %v2205_v12, 16  ;;  %v2203_v22 = vld [vmem:[%s2582_s28 + $0x18] sm:$0xf] }
  0x1c   : > { %v610_v23 = vrot.slane %v608_v15, 4  ;;  %v613_v24 = vrot.slane %v611_v16, 5  ;;  %v950_v25 = vshrl.u32 %v2603_v17, 16  ;;  %v2292_v26 = vcombine.low %v2205_v12, %v2603_v17  ;;  %v2612_v27 = vld [vmem:[%s2582_s28 + $0x1c] sm:$0xf] }
  0x1d   : > { %v638_v28 = vor.u32 %v637_v18, %v634_v14  ;;  %v2614_v29 = vrot.slane %v937_v20, 4  ;;  %v2616_v30 = vrot.slane %v940_v21, 5  ;;  %v913_v31 = vshrl.u32 %v2203_v22, 16  ;;  %v2619_v32 = vld [vmem:[%s2582_s28 + $0x14] sm:$0x1] }
  0x1e   : > { %v614_v33 = vor.u32 %v613_v24, %v610_v23  ;;  %1466 = vrot.lane.b32.xlu1 %v2292_v26, %s2511_s30  ;;  %v916_v34 = vshll.u32 %v2203_v22, 16  ;;  %v926_v35 = vshrl.u32 %v2612_v27, 16  ;;  %v2291_v36 = vcombine.low %v2203_v22, %v2612_v27  ;;  %v2187_v38 = vld [vmem:[%s2582_s28 + $0xc] sm:$0xe]  ;;  %v273_v39 = vld [vmem:[%s2582_s28 + $0x4] sm:$0xf] }
  0x1f   : > { %v2632_v40 = vrot.slane %v638_v28, 4  ;;  %v2634_v41 = vrot.slane %v913_v31, 4  ;;  %v2195_v42 = vrot.slane %v2187_v38, 9  ;;  %v833_v43 = vrot.slane %v2593_v7, 5  ;;  %v288_v44 = vld [vmem:[%s2582_s28 + $0x8] sm:$0x1] }
  0x20   : > { %v2638_v45 = vrot.slane %v614_v33, 4  ;;  %v2640_v46 = vrot.slane %v916_v34, 5  ;;  %1464 = vrot.lane.b32.xlu0 %v2291_v36, %s2511_s30  ;;  %v836_v47 = vrot.slane %v2619_v32, 5  ;;  %v491_v48 = vld [vmem:[%s2582_s28] sm:$0xe]  ;;  %v528_v49 = vrot.slane %v273_v39, 5 }
  0x21   : > { %v834_v50 = vsel %vm2626_vm2, %v2195_v42, %v833_v43  ;;  %v835_v51 = vrot.slane %v833_v43, 4  ;;  %v2155_v52 = vrot.slane %v491_v48, 9  ;;  %v531_v53 = vrot.slane %v288_v44, 5  ;;  %v275_v54 = vld [vmem:[%s2582_s28 + $0x10] sm:$0xf] }
  0x22   : > { %v530_v55 = vrot.slane %v528_v49, 4  ;;  %v289_v56 = vld [vmem:[%s2582_s28 + $0x14] sm:$0x1]  ;;  %v492_v57 = vld [vmem:[%s2582_s28 + $0xc] sm:$0xe]  ;;  %v535_v58 = vrot.slane %v275_v54, 5  ;;  %v943_v59 = vor.u32 %v2616_v30, %v2614_v29  ;;  %v919_v60 = vor.u32 %v2640_v46, %v2634_v41 }
  0x23   : > { %v837_v61 = vsel %vm2626_vm2, %v835_v51, %v836_v47  ;;  %v529_v62 = vsel %vm2626_vm2, %v2155_v52, %v528_v49  ;;  %v2156_v63 = vrot.slane %v492_v57, 9  ;;  %v538_v0 = vrot.slane %v289_v56, 5  ;;  %v272_v2 = vld [vmem:[%s2582_s28] sm:$0xf]  ;;  %v2188_v10 = vld [vmem:[%s2582_s28 + $0x18] sm:$0xe] }
  0x24   : > { %v2283_v4 = vcombine.low %v834_v50, %v837_v61  ;;  %v532_v5 = vsel %vm2626_vm2, %v530_v55, %v531_v53  ;;  %v537_v6 = vrot.slane %v535_v58, 4  ;;  %v300_v8 = vshrl.u32 %v272_v2, 16  ;;  %v2180_v16 = vld [vmem:[%s2582_s28 + $0x20] sm:$0x1]  ;;  %v274_v23 = vld [vmem:[%s2582_s28 + $0xc] sm:$0xf] }
  0x25   : > { %v2259_v11 = vcombine.low %v529_v62, %v532_v5  ;;  %v536_v12 = vsel %vm2626_vm2, %v2156_v63, %v535_v58  ;;  %v303_v14 = vshll.u32 %v272_v2, 16  ;;  %v309_v15 = vshll.u32 %v273_v39, 16  ;;  %v2739_v46 = vld [vmem:[%s2582_s28 + $0x1c] sm:$0xf] }
  0x26   : > { %1416 = vrot.lane.b32.xlu0 %v2283_v4, %s2512_s5  ;;  %v539_v18 = vsel %vm2626_vm2, %v537_v6, %v538_v0  ;;  %v302_v20 = vrot.slane %v300_v8, 4  ;;  %v313_v21 = vshrl.u32 %v273_v39, 16  ;;  %v319_v22 = vshll.u32 %v288_v44, 16  ;;  %v2454_v39 = vld [vmem:[%s3408_s1 + $0x20] ss:$0 sps:$4 sm:$0xff]  }
  0x27   : > { %1288 = vrot.lane.b32.xlu1 %v2259_v11, %s2513_s6  ;;  %v2260_v24 = vcombine.low %v536_v12, %v539_v18  ;;  %v305_v26 = vrot.slane %v303_v14, 5  ;;  %v311_v28 = vrot.slane %v309_v15, 5  ;;  %v2196_v31 = vrot.slane %v2188_v10, 9 }
  0x28   : > { %v315_v33 = vrot.slane %v313_v21, 4  ;;  %v321_v34 = vrot.slane %v319_v22, 5  ;;  %v840_v36 = vrot.slane %v2586_v1, 5  ;;  %v843_v38 = vrot.slane %v2180_v16, 5  ;;  %v2700_v21 = vld [vmem:[%s2582_s28 + $0x2c] sm:$0x1] }
  0x29   : > { %v306_v42 = vor.u32 %v305_v26, %v302_v20  ;;  %v324_v43 = vshrl.u32 %v274_v23, 16  ;;  %v327_v47 = vshll.u32 %v274_v23, 16  ;;  %v333_v48 = vshll.u32 %v275_v54, 16  ;;  %v2448_v23 = vld [vmem:[%s3408_s1] sm:$0xff]  }
  0x2a   : > { %v316_v44 = vor.u32 %v315_v33, %v311_v28  ;;  %v841_v49 = vsel %vm2626_vm2, %v2196_v31, %v840_v36  ;;  %v842_v50 = vrot.slane %v840_v36, 4  ;;  %v337_v51 = vshrl.u32 %v275_v54, 16  ;;  %v2720_v26 = vld [vmem:[%s2582_s28 + $0x20] sm:$0x1]  ;;  %2343 = vmatprep.subr.bf16.mxu0 %v2448_v23  ;;  %2369 = vmatprep.subr.bf16.mxu1 %v2448_v23 }
  0x2b   : > { %1290 = vrot.lane.b32.xlu1 %v2260_v24, %s2513_s6  ;;  %v307_v52 = vrot.slane %v306_v42, 4  ;;  %v326_v53 = vrot.slane %v324_v43, 4  ;;  %v329_v55 = vrot.slane %v327_v47, 5  ;;  %v335_v57 = vrot.slane %v333_v48, 5  ;;  %2344 = vmatpush3.bf16.msra.mxu0 %v2448_v23  ;;  %v2451_v48 = vld [vmem:[%s3408_s1 + $0x10] sm:$0xff]  }
  0x2c   : > { %v317_v58 = vrot.slane %v316_v44, 4  ;;  %v844_v61 = vsel %vm2626_vm2, %v842_v50, %v843_v38  ;;  %v339_v62 = vrot.slane %v337_v51, 4  ;;  %v343_v63 = vshll.u32 %v289_v56, 16  ;;  %v2749_v50 = vld [vmem:[%s2582_s28 + $0x20] sm:$0x1]  ;;  %2374 = vmatpush3.bf16.msra.mxu1 %v2448_v23 }
  0x2d   : > { %v312_v0 = vsel %vm2673_vm5, %v307_v52, %v311_v28  ;;  %v2284_v2 = vcombine.low %v841_v49, %v844_v61  ;;  %v330_v4 = vor.u32 %v329_v55, %v326_v53  ;;  %v643_v54 = vrot.slane %v641_v3, 5  ;;  %v276_v28 = vld [vmem:[%s2582_s28 + $0x18] sm:$0xf]  ;;  %v2228_v23 = vld [vmem:[%s2582_s28 + $0x24] sm:$0xe] }
  0x2e   : > { %v322_v5 = vsel %vm2673_vm5, %v317_v58, %v321_v34  ;;  %v340_v6 = vor.u32 %v339_v62, %v335_v57  ;;  %v345_v8 = vrot.slane %v343_v63, 5  ;;  %v651_v10 = vshll.u32 %v2180_v16, 16  ;;  %v2450_v34 = vld [vmem:[%s3408_s1 + $0x8] sm:$0xff]   ;;  %v2227_v58 = vld [vmem:[%s2582_s28 + $0x18] sm:$0xe] }
  0x2f   : > { %v2251_v11 = vcombine.low %v312_v0, %v322_v5  ;;  %1418 = vrot.lane.b32.xlu1 %v2284_v2, %s2512_s5  ;;  %v331_v12 = vrot.slane %v330_v4, 4  ;;  %v644_v56 = vsel %vm2673_vm5, %v2632_v40, %v643_v54  ;;  %v648_v14 = vor.u32 %v2599_v13, %v643_v54  ;;  %2345 = vmatprep.subr.bf16.mxu0 %v2450_v34  ;;  %v278_v2 = vld [vmem:[%s2582_s28 + $0x24] sm:$0xf] }
  0x30   : > { %v341_v15 = vrot.slane %v340_v6, 4  ;;  %v653_v1 = vrot.slane %v651_v10, 5  ;;  %v619_v3 = vrot.slane %v617_v9, 5  ;;  %v627_v18 = vshll.u32 %v2619_v32, 16  ;;  %2370 = vmatprep.subr.bf16.mxu1 %v2450_v34  ;;  %2346 = vmatpush3.bf16.msra.mxu0 %v2450_v34 }
  0x31   : > { %1248 = vrot.lane.b32.xlu0 %v2251_v11, %s2514_s7  ;;  %v336_v16 = vsel %vm2673_vm5, %v331_v12, %v335_v57  ;;  %v649_v20 = vrot.slane %v648_v14, 4  ;;  %v944_v13 = vrot.slane %v943_v59, 4  ;;  %v946_v7 = vshll.u32 %v2603_v17, 16  ;;  %2347 = vmatprep.subr.bf16.mxu0 %v2451_v48 }
  0x32   : > { %v346_v9 = vsel %vm2673_vm5, %v341_v15, %v345_v8  ;;  %v620_v32 = vsel %vm2673_vm5, %v2638_v45, %v619_v3  ;;  %v624_v40 = vor.u32 %v2605_v19, %v619_v3  ;;  %v629_v22 = vrot.slane %v627_v18, 5  ;;  %v2452_v8 = vld [vmem:[%s3408_s1 + $0x18] sm:$0xff]   ;;  %2375 = vmatpush3.bf16.msra.mxu1 %v2450_v34  ;;  %v279_v3 = vld [vmem:[%s2582_s28 + $0x28] sm:$0xf] }
  0x33   : > { %v2252_v24 = vcombine.low %v336_v16, %v346_v9  ;;  %v654_v29 = vsel %vm2673_vm5, %v649_v20, %v653_v1  ;;  %v948_v30 = vrot.slane %v946_v7, 5  ;;  %v952_v59 = vrot.slane %v950_v25, 4  ;;  %2371 = vmatprep.subr.bf16.mxu1 %v2451_v48  ;;  %v291_v7 = vld [vmem:[%s2582_s28 + $0x2c] sm:$0x1] }
  0x34   : > { %v2276_v45 = vcombine.low %v644_v56, %v654_v29  ;;  %v625_v31 = vrot.slane %v624_v40, 4  ;;  %v956_v19 = vshll.u32 %v2700_v21, 16  ;;  %v2727_v33 = vrot.slane %v919_v60, 4  ;;  %2348 = vmatpush3.bf16.msra.mxu0 %v2451_v48 }
  0x35   : > { %1250 = vrot.lane.b32.xlu0 %v2252_v24, %s2514_s7  ;;  %v949_v25 = vsel %vm2673_vm5, %v944_v13, %v948_v30  ;;  %v953_v36 = vor.u32 %v952_v59, %v948_v30  ;;  %v922_v38 = vshll.u32 %v2612_v27, 16  ;;  %v928_v41 = vrot.slane %v926_v35, 4  ;;  %2349 = vmatprep.subr.bf16.mxu0 %v2452_v8 }
  0x36   : > { %1378 = vrot.lane.b32.xlu1 %v2276_v45, %s2515_s12  ;;  %v630_v60 = vsel %vm2673_vm5, %v625_v31, %v629_v22  ;;  %v958_v42 = vrot.slane %v956_v19, 5  ;;  %v932_v43 = vshll.u32 %v2720_v26, 16  ;;  %v348_v47 = vshrl.u32 %v276_v28, 16  ;;  %2376 = vmatpush3.bf16.msra.mxu1 %v2451_v48  ;;  %v494_v19 = vld [vmem:[%s2582_s28 + $0x24] sm:$0xe] }
  0x37   : > { %v2275_v35 = vcombine.low %v620_v32, %v630_v60  ;;  %v954_v44 = vrot.slane %v953_v36, 4  ;;  %v924_v49 = vrot.slane %v922_v38, 5  ;;  %v351_v51 = vshll.u32 %v276_v28, 16  ;;  %2372 = vmatprep.subr.bf16.mxu1 %v2452_v8  ;;  %v493_v38 = vld [vmem:[%s2582_s28 + $0x18] sm:$0xe] }
  0x38   : > { %v934_v52 = vrot.slane %v932_v43, 5  ;;  %v350_v53 = vrot.slane %v348_v47, 4  ;;  %v357_v55 = vshll.u32 %v2739_v46, 16  ;;  %v361_v57 = vshrl.u32 %v2739_v46, 16  ;;  %2350 = vmatpush3.bf16.msra.mxu0 %v2452_v8 }
  0x39   : > { %1376 = vrot.lane.b32.xlu0 %v2275_v35, %s2515_s12  ;;  %v959_v61 = vsel %vm2673_vm5, %v954_v44, %v958_v42  ;;  %v925_v62 = vsel %vm2673_vm5, %v2727_v33, %v924_v49  ;;  %v929_v63 = vor.u32 %v928_v41, %v924_v49  ;;  %v353_v0 = vrot.slane %v351_v51, 5  ;;  %v2788_v49 = vld [vmem:[%s2582_s28 + $0x30] sm:$0xf]  ;;  %2379 = vmatprep.subr.msk.bf16.mxu0 %vm1757_vm12, %v2454_v39 }
  0x3a   : > { %v2300_v4 = vcombine.low %v949_v25, %v959_v61  ;;  %v359_v54 = vrot.slane %v357_v55, 5  ;;  %v363_v5 = vrot.slane %v361_v57, 4  ;;  %v367_v6 = vshll.u32 %v2749_v50, 16  ;;  %2377 = vmatpush3.bf16.msra.mxu1 %v2452_v8  ;;  %v2811_v8 = vld [vmem:[%s2582_s28 + $0x28] sm:$0xf] }
  0x3b   : > { %v930_v10 = vrot.slane %v929_v63, 4  ;;  %v354_v11 = vor.u32 %v353_v0, %v350_v53  ;;  %v2235_v12 = vrot.slane %v2227_v58, 9  ;;  %v1138_v56 = vrot.slane %v2612_v27, 5  ;;  %v2170_v0 = vld [vmem:[%s2582_s28 + $0x34] sm:$0xf]  ;;  %2380 = vmatprep.subr.msk.bf16.mxu1 %vm1757_vm12, %v2454_v39 }
  0x3c   : > { %1506 = vrot.lane.b32.xlu1 %v2300_v4, %s2516_s24  ;;  %v364_v14 = vor.u32 %v363_v5, %v359_v54  ;;  %v369_v15 = vrot.slane %v367_v6, 5  ;;  %v1141_v1 = vrot.slane %v2720_v26, 5  ;;  %v372_v18 = vshrl.u32 %v278_v2, 16  ;;  %v2167_v4 = vld [vmem:[%s2582_s28 + $0x24] sm:$0xf] }
  0x3d   : > { %v935_v16 = vsel %vm2673_vm5, %v930_v10, %v934_v52  ;;  %v355_v20 = vrot.slane %v354_v11, 4  ;;  %v1139_v13 = vsel %vm2626_vm2, %v2235_v12, %v1138_v56  ;;  %v1140_v27 = vrot.slane %v1138_v56, 4 }
  0x3e   : > { %v2299_v9 = vcombine.low %v925_v62, %v935_v16  ;;  %v365_v32 = vrot.slane %v364_v14, 4  ;;  %v374_v40 = vrot.slane %v372_v18, 4  ;;  %v375_v22 = vshll.u32 %v278_v2, 16 }
  0x3f   : > { %v360_v24 = vsel %vm2673_vm5, %v355_v20, %v359_v54  ;;  %v1142_v29 = vsel %vm2626_vm2, %v1140_v27, %v1141_v1  ;;  %v381_v30 = vshll.u32 %v279_v3, 16  ;;  %v385_v59 = vshrl.u32 %v279_v3, 16  ;;  %v2823_v27 = vld [vmem:[%s2582_s28 + $0x2c] sm:$0x1] }
  0x40   : > { %1504 = vrot.lane.b32.xlu0 %v2299_v9, %s2516_s24  ;;  %v370_v26 = vsel %vm2673_vm5, %v365_v32, %v369_v15  ;;  %v2307_v28 = vcombine.low %v1139_v13, %v1142_v29  ;;  %v377_v45 = vrot.slane %v375_v22, 5  ;;  %v391_v31 = vshll.u32 %v291_v7, 16  ;;  %v2190_v22 = vld [vmem:[%s2582_s28 + $0x30] sm:$0xe] }
  0x41   : > { %v2253_v33 = vcombine.low %v360_v24, %v370_v26  ;;  %v383_v34 = vrot.slane %v381_v30, 5  ;;  %v387_v25 = vrot.slane %v385_v59, 4  ;;  %v2236_v36 = vrot.slane %v2228_v23, 9 }
  0x42   : > { %v378_v41 = vor.u32 %v377_v45, %v374_v40  ;;  %v393_v60 = vrot.slane %v391_v31, 5  ;;  %v1145_v42 = vrot.slane %v2603_v17, 5  ;;  %v1148_v43 = vrot.slane %v2700_v21, 5  ;;  %v2189_v31 = vld [vmem:[%s2582_s28 + $0x24] sm:$0xe] }
  0x43   : > { %1252 = vrot.lane.b32.xlu1 %v2253_v33, %s2514_s7  ;;  %v388_v47 = vor.u32 %v387_v25, %v383_v34  ;;  %v2158_v48 = vrot.slane %v494_v19, 9  ;;  %v549_v35 = vrot.slane %v279_v3, 5  ;;  %v552_v44 = vrot.slane %v291_v7, 5  ;;  %v2182_v3 = vld [vmem:[%s2582_s28 + $0x38] sm:$0x1] }
  0x44   : > { %1544 = vrot.lane.b32.xlu0 %v2307_v28, %s2517_s25  ;;  %v379_v51 = vrot.slane %v378_v41, 4  ;;  %v1146_v17 = vsel %vm2626_vm2, %v2236_v36, %v1145_v42  ;;  %v1147_v52 = vrot.slane %v1145_v42, 4  ;;  %v2157_v21 = vrot.slane %v493_v38, 9 }
  0x45   : > { %v389_v53 = vrot.slane %v388_v47, 4  ;;  %v550_v55 = vsel %vm2626_vm2, %v2158_v48, %v549_v35  ;;  %v551_v57 = vrot.slane %v549_v35, 4  ;;  %v542_v58 = vrot.slane %v2739_v46, 5  ;;  %v2832_v35 = vld [vmem:[%s2582_s28 + $0x3c] sm:$0xf] }
  0x46   : > { %v384_v61 = vsel %vm2673_vm5, %v379_v51, %v383_v34  ;;  %v1149_v62 = vsel %vm2626_vm2, %v1147_v52, %v1148_v43  ;;  %v545_v63 = vrot.slane %v2749_v50, 5  ;;  %v680_v2 = vshrl.u32 %v2788_v49, 16 }
  0x47   : > { %v394_v54 = vsel %vm2673_vm5, %v389_v53, %v393_v60  ;;  %v2308_v5 = vcombine.low %v1146_v17, %v1149_v62  ;;  %v553_v46 = vsel %vm2626_vm2, %v551_v57, %v552_v44  ;;  %v543_v6 = vsel %vm2626_vm2, %v2157_v21, %v542_v58 }
  0x48   : > { %v2254_v10 = vcombine.low %v384_v61, %v394_v54  ;;  %v2262_v50 = vcombine.low %v550_v55, %v553_v46  ;;  %v544_v11 = vrot.slane %v542_v58, 4  ;;  %v682_v12 = vrot.slane %v680_v2, 4  ;;  %v2849_v61 = vld [vmem:[%s2582_s28 + $0x40] sm:$0xf]  ;;  %v2859_v46 = vld [vmem:[%s2582_s28 + $0x34] sm:$0xf] }
  0x49   : > { %1546 = vrot.lane.b32.xlu0 %v2308_v5, %s2517_s25  ;;  %v683_v56 = vshll.u32 %v2788_v49, 16  ;;  %v693_v14 = vshrl.u32 %v2170_v0, 16  ;;  %v2270_v15 = vcombine.low %v2788_v49, %v2170_v0  ;;  %v656_v1 = vshrl.u32 %v2167_v4, 16 }
  0x4a   : > { %1254 = vrot.lane.b32.xlu1 %v2254_v10, %s2514_s7  ;;  %v546_v18 = vsel %vm2626_vm2, %v544_v11, %v545_v63  ;;  %v659_v16 = vshll.u32 %v2167_v4, 16  ;;  %v669_v20 = vshrl.u32 %v2811_v8, 16  ;;  %v2269_v13 = vcombine.low %v2167_v4, %v2811_v8 }
  0x4b   : > { %v2261_v7 = vcombine.low %v543_v6, %v546_v18  ;;  %v685_v9 = vrot.slane %v683_v56, 5  ;;  %v658_v32 = vrot.slane %v656_v1, 4  ;;  %v689_v40 = vshll.u32 %v2170_v0, 16 }
  0x4c   : > { %v661_v23 = vrot.slane %v659_v16, 5  ;;  %v695_v24 = vrot.slane %v693_v14, 4  ;;  %v699_v29 = vshll.u32 %v2182_v3, 16  ;;  %v665_v30 = vshll.u32 %v2811_v8, 16 }
  0x4d   : > { %1292 = vrot.lane.b32.xlu0 %v2261_v7, %s2513_s6  ;;  %v686_v59 = vor.u32 %v685_v9, %v682_v12  ;;  %v691_v26 = vrot.slane %v689_v40, 5  ;;  %v671_v28 = vrot.slane %v669_v20, 4  ;;  %v675_v45 = vshll.u32 %v2823_v27, 16  ;;  %v2874_v20 = vld [vmem:[%s2582_s28 + $0x38] sm:$0x1] }
  0x4e   : > { %1294 = vrot.lane.b32.xlu1 %v2262_v50, %s2513_s6  ;;  %v701_v19 = vrot.slane %v699_v29, 5  ;;  %v662_v33 = vor.u32 %v661_v23, %v658_v32  ;;  %v667_v34 = vrot.slane %v665_v30, 5  ;;  %v2198_v25 = vrot.slane %v2190_v22, 9  ;;  %v280_v32 = vld [vmem:[%s2582_s28 + $0x30] sm:$0xf] }
  0x4f   : > { %v687_v36 = vrot.slane %v686_v59, 4  ;;  %v696_v38 = vor.u32 %v695_v24, %v691_v26  ;;  %v677_v41 = vrot.slane %v675_v45, 5  ;;  %v854_v60 = vrot.slane %v2170_v0, 5  ;;  %v2207_v0 = vld [vmem:[%s2582_s28 + $0x30] sm:$0xf] }
  0x50   : > { %v663_v42 = vrot.slane %v662_v33, 4  ;;  %v672_v43 = vor.u32 %v671_v28, %v667_v34  ;;  %v857_v47 = vrot.slane %v2182_v3, 5  ;;  %v2197_v48 = vrot.slane %v2189_v31, 9  ;;  %v2883_v28 = vld [vmem:[%s2582_s28 + $0x34] sm:$0xf] }
  0x51   : > { %1340 = vrot.lane.b32.xlu0 %v2269_v13, %s2510_s29  ;;  %v692_v44 = vsel %vm2673_vm5, %v687_v36, %v691_v26  ;;  %v697_v49 = vrot.slane %v696_v38, 4  ;;  %v855_v51 = vsel %vm2626_vm2, %v2198_v25, %v854_v60  ;;  %v856_v17 = vrot.slane %v854_v60, 4  ;;  %v2229_v60 = vld [vmem:[%s2582_s28 + $0x30] sm:$0xe] }
  0x52   : > { %1342 = vrot.lane.b32.xlu1 %v2270_v15, %s2510_s29  ;;  %v668_v52 = vsel %vm2673_vm5, %v663_v42, %v667_v34  ;;  %v673_v21 = vrot.slane %v672_v43, 4  ;;  %v847_v53 = vrot.slane %v2811_v8, 5  ;;  %v850_v55 = vrot.slane %v2823_v27, 5  ;;  %v2866_v15 = vld [vmem:[%s2582_s28 + $0x44] sm:$0x1] }
  0x53   : > { %v702_v57 = vsel %vm2673_vm5, %v697_v49, %v701_v19  ;;  %v858_v58 = vsel %vm2626_vm2, %v856_v17, %v857_v47  ;;  %v985_v62 = vshrl.u32 %v2832_v35, 16  ;;  %v988_v63 = vshll.u32 %v2832_v35, 16  ;;  %v2887_v19 = vld [vmem:[%s2582_s28 + $0x38] sm:$0x1] }
  0x54   : > { %v2278_v2 = vcombine.low %v692_v44, %v702_v57  ;;  %v678_v4 = vsel %vm2673_vm5, %v673_v21, %v677_v41  ;;  %v2286_v54 = vcombine.low %v855_v51, %v858_v58  ;;  %v848_v5 = vsel %vm2626_vm2, %v2197_v48, %v847_v53 }
  0x55   : > { %v2277_v6 = vcombine.low %v668_v52, %v678_v4  ;;  %v849_v8 = vrot.slane %v847_v53, 4  ;;  %v987_v10 = vrot.slane %v985_v62, 4  ;;  %v990_v50 = vrot.slane %v988_v63, 5 }
  0x56   : > { %1382 = vrot.lane.b32.xlu1 %v2278_v2, %s2515_s12  ;;  %v998_v11 = vshrl.u32 %v2849_v61, 16  ;;  %v2294_v12 = vcombine.low %v2832_v35, %v2849_v61  ;;  %v961_v56 = vshrl.u32 %v2207_v0, 16  ;;  %v964_v14 = vshll.u32 %v2207_v0, 16 }
  0x57   : > { %1380 = vrot.lane.b32.xlu0 %v2277_v6, %s2515_s12  ;;  %v851_v1 = vsel %vm2626_vm2, %v849_v8, %v850_v55  ;;  %v974_v3 = vshrl.u32 %v2859_v46, 16  ;;  %v2293_v18 = vcombine.low %v2207_v0, %v2859_v46  ;;  %v991_v16 = vor.u32 %v990_v50, %v987_v10  ;;  %v2900_v55 = vld [vmem:[%s2582_s28 + $0x3c] sm:$0xf]  ;;  %v2906_v0 = vld [vmem:[%s2582_s28 + $0x40] sm:$0xf] }
  0x58   : > { %v2285_v13 = vcombine.low %v848_v5, %v851_v1  ;;  %v963_v27 = vrot.slane %v961_v56, 4  ;;  %v966_v7 = vrot.slane %v964_v14, 5  ;;  %v994_v9 = vshll.u32 %v2849_v61, 16  ;;  %v293_v6 = vld [vmem:[%s2582_s28 + $0x44] sm:$0x1] }
  0x59   : > { %v992_v40 = vrot.slane %v991_v16, 4  ;;  %v1000_v22 = vrot.slane %v998_v11, 4  ;;  %v1004_v23 = vshll.u32 %v2866_v15, 16  ;;  %v970_v24 = vshll.u32 %v2859_v46, 16  ;;  %v2230_v1 = vld [vmem:[%s2582_s28 + $0x3c] sm:$0xe] }
  0x5a   : > { %1422 = vrot.lane.b32.xlu1 %v2286_v54, %s2512_s5  ;;  %v996_v29 = vrot.slane %v994_v9, 5  ;;  %v967_v30 = vor.u32 %v966_v7, %v963_v27  ;;  %v976_v59 = vrot.slane %v974_v3, 4  ;;  %v980_v26 = vshll.u32 %v2874_v20, 16 }
  0x5b   : > { %1420 = vrot.lane.b32.xlu0 %v2285_v13, %s2512_s5  ;;  %v1006_v45 = vrot.slane %v1004_v23, 5  ;;  %v972_v31 = vrot.slane %v970_v24, 5  ;;  %v396_v33 = vshrl.u32 %v280_v32, 16  ;;  %v399_v34 = vshll.u32 %v280_v32, 16  ;;  %v496_v32 = vld [vmem:[%s2582_s28 + $0x3c] sm:$0xe] }
  0x5c   : > { %v997_v25 = vsel %vm2673_vm5, %v992_v40, %v996_v29  ;;  %v1001_v36 = vor.u32 %v1000_v22, %v996_v29  ;;  %v968_v38 = vrot.slane %v967_v30, 4  ;;  %v982_v41 = vrot.slane %v980_v26, 5  ;;  %v495_v29 = vld [vmem:[%s2582_s28 + $0x30] sm:$0xe] }
  0x5d   : > { %v977_v42 = vor.u32 %v976_v59, %v972_v31  ;;  %v398_v43 = vrot.slane %v396_v33, 4  ;;  %v401_v47 = vrot.slane %v399_v34, 5  ;;  %v405_v48 = vshll.u32 %v2883_v28, 16 }
  0x5e   : > { %1470 = vrot.lane.b32.xlu1 %v2294_v12, %s2511_s30  ;;  %v1002_v35 = vrot.slane %v1001_v36, 4  ;;  %v973_v44 = vsel %vm2673_vm5, %v968_v38, %v972_v31  ;;  %v409_v49 = vshrl.u32 %v2883_v28, 16  ;;  %v415_v51 = vshll.u32 %v2887_v19, 16  ;;  %v2934_v36 = vld [vmem:[%s2582_s28 + $0x48] sm:$0xf] }
  0x5f   : > { %1468 = vrot.lane.b32.xlu0 %v2293_v18, %s2511_s30  ;;  %v978_v17 = vrot.slane %v977_v42, 4  ;;  %v402_v52 = vor.u32 %v401_v47, %v398_v43  ;;  %v407_v21 = vrot.slane %v405_v48, 5  ;;  %v2237_v53 = vrot.slane %v2229_v60, 9 }
  0x60   : > { %v1007_v57 = vsel %vm2673_vm5, %v1002_v35, %v1006_v45  ;;  %v411_v58 = vrot.slane %v409_v49, 4  ;;  %v417_v62 = vrot.slane %v415_v51, 5  ;;  %v1152_v63 = vrot.slane %v2859_v46, 5  ;;  %v2174_v49 = vld [vmem:[%s2582_s28 + $0x4c] sm:$0xf] }
  0x61   : > { %v2302_v2 = vcombine.low %v997_v25, %v1007_v57  ;;  %v983_v4 = vsel %vm2673_vm5, %v978_v17, %v982_v41  ;;  %v403_v54 = vrot.slane %v402_v52, 4  ;;  %v1155_v5 = vrot.slane %v2874_v20, 5  ;;  %v2171_v17 = vld [vmem:[%s2582_s28 + $0x3c] sm:$0xf]  ;;  %v2957_v57 = vld [vmem:[%s2582_s28 + $0x40] sm:$0xf] }
  0x62   : > { %v2301_v8 = vcombine.low %v973_v44, %v983_v4  ;;  %v412_v10 = vor.u32 %v411_v58, %v407_v21  ;;  %v1153_v50 = vsel %vm2626_vm2, %v2237_v53, %v1152_v63  ;;  %v1154_v11 = vrot.slane %v1152_v63, 4 }
  0x63   : > { %1510 = vrot.lane.b32.xlu1 %v2302_v2, %s2516_s24  ;;  %v408_v46 = vsel %vm2673_vm5, %v403_v54, %v407_v21  ;;  %v420_v12 = vshrl.u32 %v2900_v55, 16  ;;  %v423_v56 = vshll.u32 %v2900_v55, 16  ;;  %v429_v14 = vshll.u32 %v2906_v0, 16 }
  0x64   : > { %1508 = vrot.lane.b32.xlu0 %v2301_v8, %s2516_s24  ;;  %v413_v3 = vrot.slane %v412_v10, 4  ;;  %v1156_v18 = vsel %vm2626_vm2, %v1154_v11, %v1155_v5  ;;  %v433_v16 = vshrl.u32 %v2906_v0, 16  ;;  %v439_v20 = vshll.u32 %v293_v6, 16 }
  0x65   : > { %v2309_v13 = vcombine.low %v1153_v50, %v1156_v18  ;;  %v422_v27 = vrot.slane %v420_v12, 4  ;;  %v425_v7 = vrot.slane %v423_v56, 5  ;;  %v431_v9 = vrot.slane %v429_v14, 5 }
  0x66   : > { %v418_v40 = vsel %vm2673_vm5, %v413_v3, %v417_v62  ;;  %v435_v22 = vrot.slane %v433_v16, 4  ;;  %v441_v23 = vrot.slane %v439_v20, 5  ;;  %v2238_v24 = vrot.slane %v2230_v1, 9  ;;  %v2192_v3 = vld [vmem:[%s2582_s28 + $0x48] sm:$0xe] }
  0x67   : > { %v2255_v30 = vcombine.low %v408_v46, %v418_v40  ;;  %v426_v59 = vor.u32 %v425_v7, %v422_v27  ;;  %v1159_v26 = vrot.slane %v2849_v61, 5  ;;  %v1162_v45 = vrot.slane %v2866_v15, 5  ;;  %v2969_v46 = vld [vmem:[%s2582_s28 + $0x44] sm:$0x1]  ;;  %v2191_v40 = vld [vmem:[%s2582_s28 + $0x3c] sm:$0xe] }
  0x68   : > { %1548 = vrot.lane.b32.xlu0 %v2309_v13, %s2517_s25  ;;  %v436_v31 = vor.u32 %v435_v22, %v431_v9  ;;  %v2160_v33 = vrot.slane %v496_v32, 9  ;;  %v563_v34 = vrot.slane %v2906_v0, 5  ;;  %v566_v25 = vrot.slane %v293_v6, 5  ;;  %v2184_v6 = vld [vmem:[%s2582_s28 + $0x50] sm:$0x1] }
  0x69   : > { %1256 = vrot.lane.b32.xlu1 %v2255_v30, %s2514_s7  ;;  %v427_v38 = vrot.slane %v426_v59, 4  ;;  %v1160_v41 = vsel %vm2626_vm2, %v2238_v24, %v1159_v26  ;;  %v1161_v61 = vrot.slane %v1159_v26, 4  ;;  %v2159_v15 = vrot.slane %v495_v29, 9 }
  0x6a   : > { %v437_v60 = vrot.slane %v436_v31, 4  ;;  %v564_v42 = vsel %vm2626_vm2, %v2160_v33, %v563_v34  ;;  %v565_v43 = vrot.slane %v563_v34, 4  ;;  %v556_v47 = vrot.slane %v2883_v28, 5 }
  0x6b   : > { %v432_v48 = vsel %vm2673_vm5, %v427_v38, %v431_v9  ;;  %v1163_v35 = vsel %vm2626_vm2, %v1161_v61, %v1162_v45  ;;  %v559_v44 = vrot.slane %v2887_v19, 5  ;;  %v728_v51 = vshrl.u32 %v2934_v36, 16 }
  0x6c   : > { %v442_v52 = vsel %vm2673_vm5, %v437_v60, %v441_v23  ;;  %v2310_v21 = vcombine.low %v1160_v41, %v1163_v35  ;;  %v567_v28 = vsel %vm2626_vm2, %v565_v43, %v566_v25  ;;  %v557_v53 = vsel %vm2626_vm2, %v2159_v15, %v556_v47 }
  0x6d   : > { %v2256_v58 = vcombine.low %v432_v48, %v442_v52  ;;  %v2264_v19 = vcombine.low %v564_v42, %v567_v28  ;;  %v558_v62 = vrot.slane %v556_v47, 4  ;;  %v730_v63 = vrot.slane %v728_v51, 4 }
  0x6e   : > { %1550 = vrot.lane.b32.xlu0 %v2310_v21, %s2517_s25  ;;  %v731_v2 = vshll.u32 %v2934_v36, 16  ;;  %v741_v4 = vshrl.u32 %v2174_v49, 16  ;;  %v2272_v54 = vcombine.low %v2934_v36, %v2174_v49  ;;  %v704_v5 = vshrl.u32 %v2171_v17, 16  ;;  %v2978_v36 = vld [vmem:[%s2582_s28 + $0x54] sm:$0xf] }
  0x6f   : > { %1258 = vrot.lane.b32.xlu1 %v2256_v58, %s2514_s7  ;;  %v560_v8 = vsel %vm2626_vm2, %v558_v62, %v559_v44  ;;  %v707_v10 = vshll.u32 %v2171_v17, 16  ;;  %v717_v50 = vshrl.u32 %v2957_v57, 16  ;;  %v2271_v11 = vcombine.low %v2171_v17, %v2957_v57  ;;  %v2995_v44 = vld [vmem:[%s2582_s28 + $0x58] sm:$0xf]  ;;  %v2211_v17 = vld [vmem:[%s2582_s28 + $0x48] sm:$0xf] }
  0x70   : > { %v2263_v12 = vcombine.low %v557_v53, %v560_v8  ;;  %v733_v56 = vrot.slane %v731_v2, 5  ;;  %v706_v14 = vrot.slane %v704_v5, 4  ;;  %v737_v1 = vshll.u32 %v2174_v49, 16 }
  0x71   : > { %v709_v18 = vrot.slane %v707_v10, 5  ;;  %v743_v16 = vrot.slane %v741_v4, 4  ;;  %v747_v20 = vshll.u32 %v2184_v6, 16  ;;  %v713_v13 = vshll.u32 %v2957_v57, 16 }
  0x72   : > { %1296 = vrot.lane.b32.xlu0 %v2263_v12, %s2513_s6  ;;  %v734_v27 = vor.u32 %v733_v56, %v730_v63  ;;  %v739_v7 = vrot.slane %v737_v1, 5  ;;  %v719_v9 = vrot.slane %v717_v50, 4  ;;  %v723_v32 = vshll.u32 %v2969_v46, 16 }
  0x73   : > { %1298 = vrot.lane.b32.xlu1 %v2264_v19, %s2513_s6  ;;  %v749_v22 = vrot.slane %v747_v20, 5  ;;  %v710_v23 = vor.u32 %v709_v18, %v706_v14  ;;  %v715_v24 = vrot.slane %v713_v13, 5  ;;  %v2200_v29 = vrot.slane %v2192_v3, 9  ;;  %v3024_v3 = vld [vmem:[%s2582_s28 + $0x48] sm:$0xf] }
  0x74   : > { %v735_v30 = vrot.slane %v734_v27, 4  ;;  %v744_v59 = vor.u32 %v743_v16, %v739_v7  ;;  %v725_v26 = vrot.slane %v723_v32, 5  ;;  %v868_v45 = vrot.slane %v2174_v49, 5 }
  0x75   : > { %v711_v31 = vrot.slane %v710_v23, 4  ;;  %v720_v33 = vor.u32 %v719_v9, %v715_v24  ;;  %v871_v34 = vrot.slane %v2184_v6, 5  ;;  %v2199_v25 = vrot.slane %v2191_v40, 9  ;;  %v3012_v6 = vld [vmem:[%s2582_s28 + $0x5c] sm:$0x1] }
  0x76   : > { %1344 = vrot.lane.b32.xlu0 %v2271_v11, %s2510_s29  ;;  %v740_v38 = vsel %vm2673_vm5, %v735_v30, %v739_v7  ;;  %v745_v41 = vrot.slane %v744_v59, 4  ;;  %v869_v61 = vsel %vm2626_vm2, %v2200_v29, %v868_v45  ;;  %v870_v15 = vrot.slane %v868_v45, 4  ;;  %v3031_v40 = vld [vmem:[%s2582_s28 + $0x4c] sm:$0xf] }
  0x77   : > { %1346 = vrot.lane.b32.xlu1 %v2272_v54, %s2510_s29  ;;  %v716_v60 = vsel %vm2673_vm5, %v711_v31, %v715_v24  ;;  %v721_v42 = vrot.slane %v720_v33, 4  ;;  %v861_v43 = vrot.slane %v2957_v57, 5  ;;  %v864_v47 = vrot.slane %v2969_v46, 5  ;;  %v3005_v57 = vld [vmem:[%s2582_s28 + $0x4c] sm:$0xf] }
  0x78   : > { %v750_v48 = vsel %vm2673_vm5, %v745_v41, %v749_v22  ;;  %v872_v35 = vsel %vm2626_vm2, %v870_v15, %v871_v34  ;;  %v1033_v49 = vshrl.u32 %v2978_v36, 16  ;;  %v1036_v51 = vshll.u32 %v2978_v36, 16  ;;  %v3020_v46 = vld [vmem:[%s2582_s28 + $0x50] sm:$0x1]  ;;  %v2231_v33 = vld [vmem:[%s2582_s28 + $0x48] sm:$0xe] }
  0x79   : > { %v2280_v52 = vcombine.low %v740_v38, %v750_v48  ;;  %v726_v21 = vsel %vm2673_vm5, %v721_v42, %v725_v26  ;;  %v2288_v28 = vcombine.low %v869_v61, %v872_v35  ;;  %v862_v53 = vsel %vm2626_vm2, %v2199_v25, %v861_v43  ;;  %v3035_v24 = vld [vmem:[%s2582_s28 + $0x50] sm:$0x1]  ;;  %v3050_v35 = vld [vmem:[%s2582_s28 + $0x54] sm:$0xf] }
  0x7a   : > { %v2279_v58 = vcombine.low %v716_v60, %v726_v21  ;;  %v863_v19 = vrot.slane %v861_v43, 4  ;;  %v1035_v62 = vrot.slane %v1033_v49, 4  ;;  %v1038_v63 = vrot.slane %v1036_v51, 5  ;;  %v3056_v21 = vld [vmem:[%s2582_s28 + $0x58] sm:$0xf] }
  0x7b   : > { %1386 = vrot.lane.b32.xlu1 %v2280_v52, %s2515_s12  ;;  %v1046_v2 = vshrl.u32 %v2995_v44, 16  ;;  %v2296_v4 = vcombine.low %v2978_v36, %v2995_v44  ;;  %v1009_v54 = vshrl.u32 %v2211_v17, 16  ;;  %v1012_v5 = vshll.u32 %v2211_v17, 16 }
  0x7c   : > { %1384 = vrot.lane.b32.xlu0 %v2279_v58, %s2515_s12  ;;  %v865_v8 = vsel %vm2626_vm2, %v863_v19, %v864_v47  ;;  %v1022_v10 = vshrl.u32 %v3005_v57, 16  ;;  %v2295_v50 = vcombine.low %v2211_v17, %v3005_v57  ;;  %v1039_v11 = vor.u32 %v1038_v63, %v1035_v62  ;;  %v295_v62 = vld [vmem:[%s2582_s28 + $0x5c] sm:$0x1] }
  0x7d   : > { %v2287_v12 = vcombine.low %v862_v53, %v865_v8  ;;  %v1011_v56 = vrot.slane %v1009_v54, 4  ;;  %v1014_v14 = vrot.slane %v1012_v5, 5  ;;  %v1042_v1 = vshll.u32 %v2995_v44, 16 }
  0x7e   : > { %v1040_v18 = vrot.slane %v1039_v11, 4  ;;  %v1048_v16 = vrot.slane %v1046_v2, 4  ;;  %v1052_v20 = vshll.u32 %v3012_v6, 16  ;;  %v1018_v13 = vshll.u32 %v3005_v57, 16 }
  0x7f   : > { %1426 = vrot.lane.b32.xlu1 %v2288_v28, %s2512_s5  ;;  %v1044_v27 = vrot.slane %v1042_v1, 5  ;;  %v1015_v7 = vor.u32 %v1014_v14, %v1011_v56  ;;  %v1024_v9 = vrot.slane %v1022_v10, 4  ;;  %v1028_v32 = vshll.u32 %v3020_v46, 16 }
  0x80   : > { %1424 = vrot.lane.b32.xlu0 %v2287_v12, %s2512_s5  ;;  %v1054_v22 = vrot.slane %v1052_v20, 5  ;;  %v1020_v23 = vrot.slane %v1018_v13, 5  ;;  %v444_v29 = vshrl.u32 %v3024_v3, 16  ;;  %v447_v30 = vshll.u32 %v3024_v3, 16  ;;  %v498_v20 = vld [vmem:[%s2582_s28 + $0x54] sm:$0xe] }
  0x81   : > { %v1045_v59 = vsel %vm2673_vm5, %v1040_v18, %v1044_v27  ;;  %v1049_v26 = vor.u32 %v1048_v16, %v1044_v27  ;;  %v1016_v45 = vrot.slane %v1015_v7, 4  ;;  %v1030_v31 = vrot.slane %v1028_v32, 5  ;;  %v497_v32 = vld [vmem:[%s2582_s28 + $0x48] sm:$0xe] }
  0x82   : > { %v1025_v34 = vor.u32 %v1024_v9, %v1020_v23  ;;  %v446_v25 = vrot.slane %v444_v29, 4  ;;  %v449_v36 = vrot.slane %v447_v30, 5  ;;  %v453_v38 = vshll.u32 %v3031_v40, 16 }
  0x83   : > { %1474 = vrot.lane.b32.xlu1 %v2296_v4, %s2511_s30  ;;  %v1050_v41 = vrot.slane %v1049_v26, 4  ;;  %v1021_v61 = vsel %vm2673_vm5, %v1016_v45, %v1020_v23  ;;  %v457_v15 = vshrl.u32 %v3031_v40, 16  ;;  %v463_v60 = vshll.u32 %v3035_v24, 16 }
  0x84   : > { %1472 = vrot.lane.b32.xlu0 %v2295_v50, %s2511_s30  ;;  %v1026_v42 = vrot.slane %v1025_v34, 4  ;;  %v450_v43 = vor.u32 %v449_v36, %v446_v25  ;;  %v455_v47 = vrot.slane %v453_v38, 5  ;;  %v2239_v48 = vrot.slane %v2231_v33, 9  ;;  %v2232_v50 = vld [vmem:[%s2582_s28 + $0x54] sm:$0xe] }
  0x85   : > { %v1055_v49 = vsel %vm2673_vm5, %v1050_v41, %v1054_v22  ;;  %v459_v51 = vrot.slane %v457_v15, 4  ;;  %v465_v17 = vrot.slane %v463_v60, 5  ;;  %v1166_v52 = vrot.slane %v3005_v57, 5  ;;  %v3084_v33 = vld [vmem:[%s2582_s28 + $0x60] sm:$0xf] }
  0x86   : > { %v2304_v28 = vcombine.low %v1045_v59, %v1055_v49  ;;  %v1031_v53 = vsel %vm2673_vm5, %v1026_v42, %v1030_v31  ;;  %v451_v58 = vrot.slane %v450_v43, 4  ;;  %v1169_v19 = vrot.slane %v3020_v46, 5  ;;  %v2175_v49 = vld [vmem:[%s2582_s28 + $0x54] sm:$0xf] }
  0x87   : > { %v2303_v63 = vcombine.low %v1021_v61, %v1031_v53  ;;  %v460_v2 = vor.u32 %v459_v51, %v455_v47  ;;  %v1167_v4 = vsel %vm2626_vm2, %v2239_v48, %v1166_v52  ;;  %v1168_v54 = vrot.slane %v1166_v52, 4  ;;  %v3109_v53 = vld [vmem:[%s2582_s28 + $0x58] sm:$0xf] }
  0x88   : > { %1514 = vrot.lane.b32.xlu1 %v2304_v28, %s2516_s24  ;;  %v456_v57 = vsel %vm2673_vm5, %v451_v58, %v455_v47  ;;  %v468_v5 = vshrl.u32 %v3050_v35, 16  ;;  %v471_v8 = vshll.u32 %v3050_v35, 16  ;;  %v477_v10 = vshll.u32 %v3056_v21, 16  ;;  %v2178_v47 = vld [vmem:[%s2582_s28 + $0x64] sm:$0xf] }
  0x89   : > { %1512 = vrot.lane.b32.xlu0 %v2303_v63, %s2516_s24  ;;  %v461_v11 = vrot.slane %v460_v2, 4  ;;  %v1170_v46 = vsel %vm2626_vm2, %v1168_v54, %v1169_v19  ;;  %v481_v12 = vshrl.u32 %v3056_v21, 16  ;;  %v487_v56 = vshll.u32 %v295_v62, 16 }
  0x8a   : > { %v2311_v14 = vcombine.low %v1167_v4, %v1170_v46  ;;  %v470_v1 = vrot.slane %v468_v5, 4  ;;  %v473_v18 = vrot.slane %v471_v8, 5  ;;  %v479_v16 = vrot.slane %v477_v10, 5  ;;  %v2186_v5 = vld [vmem:[%s2582_s28 + $0x68] sm:$0x1] }
  0x8b   : > { %v466_v13 = vsel %vm2673_vm5, %v461_v11, %v465_v17  ;;  %v483_v27 = vrot.slane %v481_v12, 4  ;;  %v489_v7 = vrot.slane %v487_v56, 5  ;;  %v2240_v9 = vrot.slane %v2232_v50, 9  ;;  %v3125_v12 = vld [vmem:[%s2582_s28 + $0x5c] sm:$0x1] }
  0x8c   : > { %v2257_v22 = vcombine.low %v456_v57, %v466_v13  ;;  %v474_v23 = vor.u32 %v473_v18, %v470_v1  ;;  %v1173_v29 = vrot.slane %v2995_v44, 5  ;;  %v1176_v30 = vrot.slane %v3012_v6, 5  ;;  %v3086_v34 = vpop.permute.xlu1 %1338 }
  0x8d   : > { %1552 = vrot.lane.b32.xlu0 %v2311_v14, %s2517_s25  ;;  %v484_v59 = vor.u32 %v483_v27, %v479_v16  ;;  %v2162_v26 = vrot.slane %v498_v20, 9  ;;  %v577_v45 = vrot.slane %v3056_v21, 5  ;;  %v580_v31 = vrot.slane %v295_v62, 5  ;;  %v3111_v58 = vpop.permute.xlu0 %1336 }
  0x8e   : > { %1260 = vrot.lane.b32.xlu1 %v2257_v22, %s2514_s7  ;;  %v475_v25 = vrot.slane %v474_v23, 4  ;;  %v1174_v44 = vsel %vm2626_vm2, %v2240_v9, %v1173_v29  ;;  %v1175_v6 = vrot.slane %v1173_v29, 4  ;;  %v2161_v36 = vrot.slane %v497_v32, 9  ;;  %v2193_v29 = vld [vmem:[%s2582_s28 + $0x54] sm:$0xe] }
  0x8f   : > { %v485_v38 = vrot.slane %v484_v59, 4  ;;  %v578_v41 = vsel %vm2626_vm2, %v2162_v26, %v577_v45  ;;  %v579_v61 = vrot.slane %v577_v45, 4  ;;  %v570_v15 = vrot.slane %v3031_v40, 5 }
  0x90   : > { %v480_v60 = vsel %vm2673_vm5, %v475_v25, %v479_v16  ;;  %v1177_v42 = vsel %vm2626_vm2, %v1175_v6, %v1176_v30  ;;  %v573_v43 = vrot.slane %v3035_v24, 5  ;;  %v776_v48 = vshrl.u32 %v3084_v33, 16  ;;  %v3117_v8 = vpop.permute.xlu1 %1466  ;;  %v2194_v16 = vld [vmem:[%s2582_s28 + $0x60] sm:$0xe] }
  0x91   : > { %v490_v51 = vsel %vm2673_vm5, %v485_v38, %v489_v7  ;;  %v2312_v17 = vcombine.low %v1174_v44, %v1177_v42  ;;  %v581_v52 = vsel %vm2626_vm2, %v579_v61, %v580_v31  ;;  %v571_v28 = vsel %vm2626_vm2, %v2161_v36, %v570_v15 }
  0x92   : > { %v2258_v24 = vcombine.low %v480_v60, %v490_v51  ;;  %v2266_v19 = vcombine.low %v578_v41, %v581_v52  ;;  %v572_v62 = vrot.slane %v570_v15, 4  ;;  %v778_v63 = vrot.slane %v776_v48, 4  ;;  %v3132_v30 = vpop.permute.xlu0 %1464  ;;  %v3138_v60 = vld [vmem:[%s2582_s28 + $0x6c] sm:$0xf] }
  0x93   : > { %1554 = vrot.lane.b32.xlu0 %v2312_v17, %s2517_s25  ;;  %v779_v2 = vshll.u32 %v3084_v33, 16  ;;  %v789_v4 = vshrl.u32 %v2178_v47, 16  ;;  %v2274_v54 = vcombine.low %v3084_v33, %v2178_v47  ;;  %v752_v57 = vshrl.u32 %v2175_v49, 16 }
  0x94   : > { %1262 = vrot.lane.b32.xlu1 %v2258_v24, %s2514_s7  ;;  %v574_v10 = vsel %vm2626_vm2, %v572_v62, %v573_v43  ;;  %v755_v50 = vshll.u32 %v2175_v49, 16  ;;  %v765_v11 = vshrl.u32 %v3109_v53, 16  ;;  %v2273_v46 = vcombine.low %v2175_v49, %v3109_v53 }
  0x95   : > { %v2265_v56 = vcombine.low %v571_v28, %v574_v10  ;;  %v781_v14 = vrot.slane %v779_v2, 5  ;;  %v754_v1 = vrot.slane %v752_v57, 4  ;;  %v785_v18 = vshll.u32 %v2178_v47, 16  ;;  %v2215_v2 = vld [vmem:[%s2582_s28 + $0x60] sm:$0xf] }
  0x96   : > { %v757_v20 = vrot.slane %v755_v50, 5  ;;  %v791_v13 = vrot.slane %v789_v4, 4  ;;  %v795_v27 = vshll.u32 %v2186_v5, 16  ;;  %v761_v7 = vshll.u32 %v3109_v53, 16 }
  0x97   : > { %1300 = vrot.lane.b32.xlu0 %v2265_v56, %s2513_s6  ;;  %v782_v9 = vor.u32 %v781_v14, %v778_v63  ;;  %v787_v32 = vrot.slane %v785_v18, 5  ;;  %v767_v22 = vrot.slane %v765_v11, 4  ;;  %v771_v23 = vshll.u32 %v3125_v12, 16 }
  0x98   : > { %1302 = vrot.lane.b32.xlu1 %v2266_v19, %s2513_s6  ;;  %v797_v59 = vrot.slane %v795_v27, 5  ;;  %v758_v26 = vor.u32 %v757_v20, %v754_v1  ;;  %v763_v45 = vrot.slane %v761_v7, 5  ;;  %v2202_v31 = vrot.slane %v2194_v16, 9  ;;  %v2218_v19 = vld [vmem:[%s2582_s28 + $0x70] sm:$0xf]  ;;  %v3158_v4 = vpop.permute.xlu0 %1416 }
  0x99   : > { %v783_v33 = vrot.slane %v782_v9, 4  ;;  %v792_v25 = vor.u32 %v791_v13, %v787_v32  ;;  %v773_v44 = vrot.slane %v771_v23, 5  ;;  %v882_v6 = vrot.slane %v2178_v47, 5  ;;  %v3135_v36 = vpop.permute.xlu1 %1288  ;;  %v2226_v16 = vld [vmem:[%s2582_s28 + $0x74] sm:$0x1] }
  0x9a   : > { %v759_v38 = vrot.slane %v758_v26, 4  ;;  %v768_v41 = vor.u32 %v767_v22, %v763_v45  ;;  %v885_v61 = vrot.slane %v2186_v5, 5  ;;  %v2201_v15 = vrot.slane %v2193_v29, 9  ;;  %v3165_v5 = vld [vmem:[%s2582_s28 + $0x64] sm:$0xf] }
  0x9b   : > { %1348 = vrot.lane.b32.xlu0 %v2273_v46, %s2510_s29  ;;  %v788_v42 = vsel %vm2673_vm5, %v783_v33, %v787_v32  ;;  %v793_v43 = vrot.slane %v792_v25, 4  ;;  %v883_v48 = vsel %vm2626_vm2, %v2202_v31, %v882_v6  ;;  %v884_v47 = vrot.slane %v882_v6, 4  ;;  %v2225_v9 = vld [vmem:[%s2582_s28 + $0x68] sm:$0x1] }
  0x9c   : > { %1350 = vrot.lane.b32.xlu1 %v2274_v54, %s2510_s29  ;;  %v764_v49 = vsel %vm2673_vm5, %v759_v38, %v763_v45  ;;  %v769_v51 = vrot.slane %v768_v41, 4  ;;  %v875_v17 = vrot.slane %v3109_v53, 5  ;;  %v878_v52 = vrot.slane %v3125_v12, 5  ;;  %s2151_s29 = sshll.u32 %s3427_s16, 5 }
  0x9d   : > { %v798_v28 = vsel %vm2673_vm5, %v793_v43, %v797_v59  ;;  %v886_v24 = vsel %vm2626_vm2, %v884_v47, %v885_v61  ;;  %v1081_v62 = vshrl.u32 %v3138_v60, 16  ;;  %v1084_v63 = vshll.u32 %v3138_v60, 16  ;;  %v3167_v10 = vpop.permute.xlu1 %1290  ;;  %v2234_v59 = vld [vmem:[%s2582_s28 + $0x6c] sm:$0xe] }
  0x9e   : > { %v2282_v54 = vcombine.low %v788_v42, %v798_v28  ;;  %v774_v53 = vsel %vm2673_vm5, %v769_v51, %v773_v44  ;;  %v876_v57 = vsel %vm2626_vm2, %v2201_v15, %v875_v17  ;;  %v877_v11 = vrot.slane %v875_v17, 4 }
  0x9f   : > { %v2281_v50 = vcombine.low %v764_v49, %v774_v53  ;;  %v1083_v46 = vrot.slane %v1081_v62, 4  ;;  %v1086_v12 = vrot.slane %v1084_v63, 5  ;;  %v2290_v56 = vcombine.low %v883_v48, %v886_v24  ;;  %v2233_v48 = vld [vmem:[%s2582_s28 + $0x60] sm:$0xe] }
  0xa0   : > { %1390 = vrot.lane.b32.xlu1 %v2282_v54, %s2515_s12  ;;  %v1094_v14 = vshrl.u32 %v2218_v19, 16  ;;  %v1057_v1 = vshrl.u32 %v2215_v2, 16  ;;  %v1060_v18 = vshll.u32 %v2215_v2, 16  ;;  %v879_v20 = vsel %vm2626_vm2, %v877_v11, %v878_v52 }
  0xa1   : > { %1388 = vrot.lane.b32.xlu0 %v2281_v50, %s2515_s12  ;;  %v2298_v13 = vcombine.low %v3138_v60, %v2218_v19  ;;  %v1070_v27 = vshrl.u32 %v3165_v5, 16  ;;  %v1087_v7 = vor.u32 %v1086_v12, %v1083_v46  ;;  %v2289_v32 = vcombine.low %v876_v57, %v879_v20  ;;  %v3180_v61 = vpop.permute.xlu1 %1418  ;;  %v2460_v46 = vld [vmem:[%s2582_s28 + $0x4] sm:$0xf]  ;;  %v2461_v12 = vld [vmem:[%s2582_s28] sm:$0xf] }
  0xa2   : > { %v1059_v22 = vrot.slane %v1057_v1, 4  ;;  %v1062_v23 = vrot.slane %v1060_v18, 5  ;;  %v1090_v29 = vshll.u32 %v2218_v19, 16  ;;  %v1096_v45 = vrot.slane %v1094_v14, 4 }
  0xa3   : > { %v1088_v26 = vrot.slane %v1087_v7, 4  ;;  %v1100_v31 = vshll.u32 %v2226_v16, 16  ;;  %v1066_v33 = vshll.u32 %v3165_v5, 16  ;;  %v1249_v25 = vpop.permute.xlu0 %1248  ;;  %v1072_v38 = vrot.slane %v1070_v27, 4 }
  0xa4   : > { %1430 = vrot.lane.b32.xlu1 %v2290_v56, %s2512_s5  ;;  %v1092_v44 = vrot.slane %v1090_v29, 5  ;;  %v1063_v6 = vor.u32 %v1062_v23, %v1059_v22  ;;  %v1076_v41 = vshll.u32 %v2225_v9, 16  ;;  %v2297_v15 = vcombine.low %v2215_v2, %v3165_v5  ;;  %v2463_v22 = vld [vmem:[%s2582_s28 + $0xc] sm:$0xf] }
  0xa5   : > { %1428 = vrot.lane.b32.xlu0 %v2289_v32, %s2512_s5  ;;  %v1068_v60 = vrot.slane %v1066_v33, 5  ;;  %v2242_v42 = vrot.slane %v2234_v59, 9  ;;  %v1187_v43 = vrot.slane %v2218_v19, 5  ;;  %v1102_v51 = vrot.slane %v1100_v31, 5  ;;  %v2462_v32 = vld [vmem:[%s2582_s28 + $0x10] sm:$0xf] }
  0xa6   : > { %v1093_v47 = vsel %vm2673_vm5, %v1088_v26, %v1092_v44  ;;  %v1097_v49 = vor.u32 %v1096_v45, %v1092_v44  ;;  %v1064_v17 = vrot.slane %v1063_v6, 4  ;;  %v1078_v28 = vrot.slane %v1076_v41, 5 }
  0xa7   : > { %v1073_v52 = vor.u32 %v1072_v38, %v1068_v60  ;;  %v1189_v24 = vrot.slane %v1187_v43, 4  ;;  %v1190_v62 = vrot.slane %v2226_v16, 5  ;;  %v1251_v63 = vpop.permute.xlu0 %1250  ;;  %v1188_v19 = vsel %vm2626_vm2, %v2242_v42, %v1187_v43 }
  0xa8   : > { %1478 = vrot.lane.b32.xlu1 %v2298_v13, %s2511_s30  ;;  %v1098_v2 = vrot.slane %v1097_v49, 4  ;;  %v2241_v54 = vrot.slane %v2233_v48, 9  ;;  %v1180_v53 = vrot.slane %v3165_v5, 5  ;;  %v1069_v57 = vsel %vm2673_vm5, %v1064_v17, %v1068_v60  ;;  %v1379_v16 = vpop.permute.xlu1 %1378 }
  0xa9   : > { %1476 = vrot.lane.b32.xlu0 %v2297_v15, %s2511_s30  ;;  %v1074_v50 = vrot.slane %v1073_v52, 4  ;;  %v1183_v11 = vrot.slane %v2225_v9, 5  ;;  %v2243_v56 = vcombine.low %v2461_v12, %v2460_v46  ;;  %v1191_v1 = vsel %vm2626_vm2, %v1189_v24, %v1190_v62 }
  0xaa   : > { %v1103_v14 = vsel %vm2673_vm5, %v1098_v2, %v1102_v51  ;;  %v1181_v5 = vsel %vm2626_vm2, %v2241_v54, %v1180_v53  ;;  %v1182_v18 = vrot.slane %v1180_v53, 4  ;;  %v2244_v23 = vcombine.low %v2463_v22, %v2462_v32  ;;  %v2465_v54 = vld [vmem:[%s2582_s28 + $0x1c] sm:$0xf] }
  0xab   : > { %v2306_v20 = vcombine.low %v1093_v47, %v1103_v14  ;;  %v1079_v13 = vsel %vm2673_vm5, %v1074_v50, %v1078_v28  ;;  %v1563_v9 = vsel %vm1560_vm6, %v2243_v56, %v1249_v25  ;;  %v1377_v29 = vpop.permute.xlu0 %1376  ;;  %v2314_v59 = vcombine.low %v1188_v19, %v1191_v1  ;;  %v2464_v19 = vld [vmem:[%s2582_s28 + $0x18] sm:$0xf]  ;;  %v2466_v56 = vld [vmem:[%s2582_s28 + $0x24] sm:$0xf]  ;;  %v2467_v14 = vld [vmem:[%s2582_s28 + $0x28] sm:$0xf] }
  0xac   : > { %v2305_v27 = vcombine.low %v1069_v57, %v1079_v13  ;;  %v1184_v7 = vsel %vm2626_vm2, %v1182_v18, %v1183_v11  ;;  %v1587_v26 = vsel %vm1585_vm7, %v1563_v9, %v3135_v36  ;;  %v1566_v45 = vsel %vm1560_vm6, %v2244_v23, %v1251_v63 }
  0xad   : > { %1518 = vrot.lane.b32.xlu1 %v2306_v20, %s2516_s24  ;;  %v2313_v37 = vcombine.low %v1181_v5, %v1184_v7  ;;  %v1604_v31 = vsel %vm1602_vm8, %v1587_v26, %v3111_v58  ;;  %v1589_v33 = vsel %vm1585_vm7, %v1566_v45, %v3167_v10  ;;  %v1759_v38 = vsel %vm1757_vm12, %v2454_v39, 0 }
  0xae   : > { %1516 = vrot.lane.b32.xlu0 %v2305_v27, %s2516_s24  ;;  %v1621_v36 = vsel %vm1619_vm9, %v1604_v31, %v1377_v29  ;;  %v1606_v25 = vsel %vm1602_vm8, %v1589_v33, %v3086_v34  ;;  %v1507_v6 = vpop.permute.xlu1 %1506  ;;  %2352 = vmatpush3.bf16.msra.mxu0 %v1759_v38  ;;  %v2250_v41 = vcombine.low %v3050_v35, %v3056_v21 }
  0xaf   : > { %v1638_v44 = vsel %vm1636_vm10, %v1621_v36, %v3158_v4  ;;  %v1623_v58 = vsel %vm1619_vm9, %v1606_v25, %v1379_v16  ;;  %v2249_v4 = vcombine.low %v3024_v3, %v3031_v40  ;;  %2378 = vmatpush3.bf16.msra.mxu1 %v1759_v38  ;;  %v2245_v53 = vcombine.low %v2464_v19, %v2465_v54 }
  0xb0   : > { %v1655_v34 = vsel %vm1653_vm11, %v1638_v44, %v3132_v30  ;;  %v1640_v15 = vsel %vm1636_vm10, %v1623_v58, %v3180_v61  ;;  %v2246_v1 = vcombine.low %v2466_v56, %v2467_v14 }
  0xb1   : > { %1558 = vrot.lane.b32.xlu1 %v2314_v59, %s2517_s25  ;;  %v1657_v30 = vsel %vm1653_vm11, %v1640_v15, %v3117_v8  ;;  %v2468_v15 = vld [vmem:[%s2582_s28 + $0x30] sm:$0xf] }
  0xb2   : > { %1556 = vrot.lane.b32.xlu0 %v2313_v37, %s2517_s25  ;;  %v1505_v10 = vpop.permute.xlu0 %1504  ;;  %v1674_v47 = vsel %vm1670_vm13, %v1657_v30, %v1507_v6 }
  0xb3   : > { %v1672_v60 = vsel %vm1670_vm13, %v1655_v34, %v1505_v10 }
  0xb5   : > { %v1253_v42 = vpop.permute.xlu1 %1252 }
  0xb6   : > { %v1545_v43 = vpop.permute.xlu0 %1544  ;;  %v1569_v11 = vsel %vm1560_vm6, %v2245_v53, %v1253_v42 }
  0xb7   : > { %v1689_v48 = vsel %vm1687_vm14, %v1672_v60, %v1545_v43  ;;  %v2469_v60 = vld [vmem:[%s2582_s28 + $0x34] sm:$0xf]  ;;  %s2150_s28 = sshll.u32 %s3429_s15, 4 }
  0xb8   : > { %2353 = vmatprep.mubr.msk.bf16.mxu0 %vm1740_vm15, %v1689_v48  ;;  %v2247_v42 = vcombine.low %v2468_v15, %v2469_v60  ;;  %s254_s30 = sadd.s32 %s2151_s29, %s2150_s28 }
  0xb9   : > { %s2152_s5 = sshll.u32 %s254_s30, 3 }
  0xba   : > { %s3318_s8 = scalar_lea.vmem %s3409_s2, %s2152_s5 }
  0xbb   : > { %v1547_v49 = vpop.permute.xlu0 %1546 }
  0xbc   : > { %v1255_v51 = vpop.permute.xlu1 %1254  ;;  %v1691_v61 = vsel %vm1687_vm14, %v1674_v47, %v1547_v49 }
  0xbd   : > { %2354 = vmatmul.mubr.msk.bf16.vlgmr.msra.gmra.mrb[0].mxu0 %vm1740_vm15, %v1691_v61  ;;  %v1572_v27 = vsel %vm1560_vm6, %v2246_v1, %v1255_v51  ;;  %v2248_v51 = vcombine.low %v2900_v55, %v2906_v0 }
  0xbf   : > { %v1293_v17 = vpop.permute.xlu0 %1292 }
  0xc0   : > { %v1295_v52 = vpop.permute.xlu1 %1294  ;;  %v1591_v46 = vsel %vm1585_vm7, %v1569_v11, %v1293_v17 }
  0xc1   : > { %v1593_v32 = vsel %vm1585_vm7, %v1572_v27, %v1295_v52 }
  0xc3   : > { %v1341_v28 = vpop.permute.xlu0 %1340 }
  0xc4   : > { %v1343_v24 = vpop.permute.xlu1 %1342  ;;  %v1608_v5 = vsel %vm1602_vm8, %v1591_v46, %v1341_v28 }
  0xc5   : > { %v1610_v29 = vsel %vm1602_vm8, %v1593_v32, %v1343_v24 }
  0xc8   : > { %v1383_v62 = vpop.permute.xlu1 %1382 }
  0xc9   : > { %v1381_v63 = vpop.permute.xlu0 %1380  ;;  %v1627_v59 = vsel %vm1619_vm9, %v1610_v29, %v1383_v62 }
  0xca   : > { %v1625_v16 = vsel %vm1619_vm9, %v1608_v5, %v1381_v63 }
  0xcc   : > { %v1423_v8 = vpop.permute.xlu1 %1422 }
  0xcd   : > { %v1421_v2 = vpop.permute.xlu0 %1420  ;;  %v1644_v26 = vsel %vm1636_vm10, %v1627_v59, %v1423_v8 }
  0xce   : > { %v1642_v20 = vsel %vm1636_vm10, %v1625_v16, %v1421_v2 }
  0xd0   : > { %v1471_v57 = vpop.permute.xlu1 %1470 }
  0xd1   : > { %v1469_v50 = vpop.permute.xlu0 %1468  ;;  %v1661_v39 = vsel %vm1653_vm11, %v1644_v26, %v1471_v57 }
  0xd2   : > { %v1659_v13 = vsel %vm1653_vm11, %v1642_v20, %v1469_v50 }
  0xd5   : > { %v1511_v12 = vpop.permute.xlu1 %1510 }
  0xd6   : > { %v1509_v18 = vpop.permute.xlu0 %1508  ;;  %v1678_v37 = vsel %vm1670_vm13, %v1661_v39, %v1511_v12 }
  0xd7   : > { %v1676_v7 = vsel %vm1670_vm13, %v1659_v13, %v1509_v18 }
  0xda   : > { %v1549_v9 = vpop.permute.xlu0 %1548 }
  0xdb   : > { %v1257_v22 = vpop.permute.xlu1 %1256  ;;  %v1693_v23 = vsel %vm1687_vm14, %v1676_v7, %v1549_v9 }
  0xdc   : > { %2357 = vmatprep.mubr.msk.bf16.mxu0 %vm1740_vm15, %v1693_v23  ;;  %v1575_v30 = vsel %vm1560_vm6, %v2247_v42, %v1257_v22 }
  0xe0   : > { %v1551_v45 = vpop.permute.xlu0 %1550 }
  0xe1   : > { %v1259_v31 = vpop.permute.xlu1 %1258  ;;  %v1695_v33 = vsel %vm1687_vm14, %v1678_v37, %v1551_v45 }
  0xe2   : > { %2358 = vmatmul.mubr.msk.bf16.gmra.mrb[4].mxu0 %vm1740_vm15, %v1695_v33  ;;  %v1578_v62 = vsel %vm1560_vm6, %v2248_v51, %v1259_v31 }
  0xe4   : > { %v1297_v36 = vpop.permute.xlu0 %1296 }
  0xe5   : > { %v1299_v25 = vpop.permute.xlu1 %1298  ;;  %v1595_v47 = vsel %vm1585_vm7, %v1575_v30, %v1297_v36 }
  0xe6   : > { %v1597_v2 = vsel %vm1585_vm7, %v1578_v62, %v1299_v25 }
  0xe8   : > { %v1345_v44 = vpop.permute.xlu0 %1344 }
  0xe9   : > { %v1347_v6 = vpop.permute.xlu1 %1346  ;;  %v1612_v61 = vsel %vm1602_vm8, %v1595_v47, %v1345_v44 }
  0xea   : > { %v1614_v55 = vsel %vm1602_vm8, %v1597_v2, %v1347_v6 }
  0xed   : > { %v1387_v38 = vpop.permute.xlu1 %1386 }
  0xee   : > { %v1385_v58 = vpop.permute.xlu0 %1384  ;;  %v1631_v0 = vsel %vm1619_vm9, %v1614_v55, %v1387_v38 }
  0xef   : > { %v1629_v52 = vsel %vm1619_vm9, %v1612_v61, %v1385_v58 }
  0xf1   : > { %v1427_v10 = vpop.permute.xlu1 %1426 }
  0xf2   : > { %v1425_v34 = vpop.permute.xlu0 %1424  ;;  %v1648_v53 = vsel %vm1636_vm10, %v1631_v0, %v1427_v10 }
  0xf3   : > { %v1646_v28 = vsel %vm1636_vm10, %v1629_v52, %v1425_v34 }
  0xf5   : > { %v1475_v43 = vpop.permute.xlu1 %1474 }
  0xf6   : > { %v1473_v48 = vpop.permute.xlu0 %1472  ;;  %v1665_v57 = vsel %vm1653_vm11, %v1648_v53, %v1475_v43 }
  0xf7   : > { %v1663_v24 = vsel %vm1653_vm11, %v1646_v28, %v1473_v48 }
  0xfa   : > { %v1515_v49 = vpop.permute.xlu1 %1514 }
  0xfb   : > { %v1513_v17 = vpop.permute.xlu0 %1512  ;;  %v1682_v50 = vsel %vm1670_vm13, %v1665_v57, %v1515_v49 }
  0xfc   : > { %v1680_v63 = vsel %vm1670_vm13, %v1663_v24, %v1513_v17 }
  0xff   : > { %v1553_v8 = vpop.permute.xlu0 %1552 }
 0x100   : > { %v1261_v19 = vpop.permute.xlu1 %1260  ;;  %v1697_v54 = vsel %vm1687_vm14, %v1680_v63, %v1553_v8 }
 0x101   : > { %2361 = vmatprep.mubr.msk.bf16.mxu1 %vm1740_vm15, %v1697_v54  ;;  %v1581_v32 = vsel %vm1560_vm6, %v2249_v4, %v1261_v19 }
 0x105   : > { %v1555_v11 = vpop.permute.xlu0 %1554 }
 0x106   : > { %v1263_v46 = vpop.permute.xlu1 %1262  ;;  %v1699_v12 = vsel %vm1687_vm14, %v1682_v50, %v1555_v11 }
 0x107   : > { %2362 = vmatmul.mubr.msk.bf16.vlgmr.msra.gmra.mrb[0].mxu1 %vm1740_vm15, %v1699_v12  ;;  %v1584_v9 = vsel %vm1560_vm6, %v2250_v41, %v1263_v46 }
 0x109   : > { %v1301_v56 = vpop.permute.xlu0 %1300 }
 0x10a   : > { %v1303_v14 = vpop.permute.xlu1 %1302  ;;  %v1599_v23 = vsel %vm1585_vm7, %v1581_v32, %v1301_v56 }
 0x10b   : > { %v1601_v22 = vsel %vm1585_vm7, %v1584_v9, %v1303_v14 }
 0x10d   : > { %v1349_v1 = vpop.permute.xlu0 %1348 }
 0x10e   : > { %v1351_v5 = vpop.permute.xlu1 %1350  ;;  %v1616_v26 = vsel %vm1602_vm8, %v1599_v23, %v1349_v1 }
 0x10f   : > { %v1618_v29 = vsel %vm1602_vm8, %v1601_v22, %v1351_v5 }
 0x112   : > { %v1391_v18 = vpop.permute.xlu1 %1390 }
 0x113   : > { %v1389_v16 = vpop.permute.xlu0 %1388  ;;  %v1635_v39 = vsel %vm1619_vm9, %v1618_v29, %v1391_v18 }
 0x114   : > { %v1633_v21 = vsel %vm1619_vm9, %v1616_v26, %v1389_v16 }
 0x116   : > { %v1431_v20 = vpop.permute.xlu1 %1430 }
 0x117   : > { %v1429_v13 = vpop.permute.xlu0 %1428  ;;  %v1652_v3 = vsel %vm1636_vm10, %v1635_v39, %v1431_v20 }
 0x118   : > { %v1650_v40 = vsel %vm1636_vm10, %v1633_v21, %v1429_v13 }
 0x11a   : > { %v1479_v27 = vpop.permute.xlu1 %1478 }
 0x11b   : > { %v1477_v7 = vpop.permute.xlu0 %1476  ;;  %v1669_v4 = vsel %vm1653_vm11, %v1652_v3, %v1479_v27 }
 0x11c   : > { %v1667_v41 = vsel %vm1653_vm11, %v1650_v40, %v1477_v7 }
 0x11f   : > { %v1519_v59 = vpop.permute.xlu1 %1518 }
 0x120   : > { %v1517_v35 = vpop.permute.xlu0 %1516  ;;  %v1686_v37 = vsel %vm1670_vm13, %v1669_v4, %v1519_v59 }
 0x121   : > { %v1684_v31 = vsel %vm1670_vm13, %v1667_v41, %v1517_v35 }
 0x123   : > { %v1559_v45 = vpop.permute.xlu1 %1558 }
 0x124   : > { %v1703_v33 = vsel %vm1687_vm14, %v1686_v37, %v1559_v45  ;;  %v1557_v36 = vpop.permute.xlu0 %1556 }
 0x125   : > { %v1701_v25 = vsel %vm1687_vm14, %v1684_v31, %v1557_v36 }
 0x126   : > { %2365 = vmatprep.mubr.msk.bf16.mxu1 %vm1740_vm15, %v1701_v25 }
 0x127   : > { %2366 = vmatmul.mubr.msk.bf16.gmra.mrb[4].mxu1 %vm1740_vm15, %v1703_v33 }
 0x190   : > { %v2355_v44 = vpop.f32.mrb[0].mxu0 }
 0x191   : > { %1860 = vst.msk [vmem:[%s3318_s8 + $0x10] sm:$0xff] %vm1560_vm6, %v2355_v44  ;;  %v1795_v6 = vpop.f32.mrb[1].mxu0  ;;  %v1915_v34 = vmul.f32 %v2355_v44, %v2355_v44  ;;  %v1877_v48 = vsel %vm1560_vm6, %v2355_v44, 0.0 }
 0x192   : > { %1858 = vst.msk [vmem:[%s3318_s8] sm:$0xff] %vm1560_vm6, %v1795_v6  ;;  %v1913_v38 = vmul.f32 %v1795_v6, %v1795_v6  ;;  %v2356_v58 = vpop.f32.mrb[2].mxu0  ;;  %v1874_v15 = vsel %vm1560_vm6, %v1795_v6, 0.0 }
 0x193   : > { %1861 = vst.msk [vmem:[%s3318_s8 + $0x18] sm:$0xff] %vm1560_vm6, %v2356_v58  ;;  %v1798_v10 = vpop.f32.mrb[3].mxu0  ;;  %v1916_v47 = vmul.f32 %v2356_v58, %v2356_v58  ;;  %v1932_v17 = vsel %vm1560_vm6, %v1915_v34, 0.0  ;;  %v1879_v52 = vsel %vm1560_vm6, %v2356_v58, 0.0 }
 0x194   : > { %1859 = vst.msk [vmem:[%s3318_s8 + $0x8] sm:$0xff] %vm1560_vm6, %v1798_v10  ;;  %v1875_v60 = vsel %vm1560_vm6, %v1798_v10, 0.0  ;;  %v1914_v42 = vmul.f32 %v1798_v10, %v1798_v10  ;;  %v1929_v30 = vsel %vm1560_vm6, %v1913_v38, 0.0 }
 0x195   : > { %v1876_v43 = vadd.f32 %v1875_v60, %v1874_v15  ;;  %v1934_v62 = vsel %vm1560_vm6, %v1916_v47, 0.0 }
 0x196   : > { %v1930_v49 = vsel %vm1560_vm6, %v1914_v42, 0.0 }
 0x197   : > { %v1878_v51 = vadd.f32 %v1877_v48, %v1876_v43  ;;  %v1931_v61 = vadd.f32 %v1930_v49, %v1929_v30 }
 0x199   : > { %v1933_v28 = vadd.f32 %v1932_v17, %v1931_v61  ;;  %v1880_v24 = vadd.f32 %v1879_v52, %v1878_v51 }
 0x19b   : > { %v1935_v63 = vadd.f32 %v1934_v62, %v1933_v28 }
 0x1b5   : > { %v2359_v8 = vpop.f32.mrb[4].mxu0 }
 0x1b6   : > { %1864 = vst.msk [vmem:[%s3318_s8 + $0x30] sm:$0xff] %vm1560_vm6, %v2359_v8  ;;  %v1811_v2 = vpop.f32.mrb[5].mxu0  ;;  %v1919_v57 = vmul.f32 %v2359_v8, %v2359_v8  ;;  %v1885_v14 = vsel %vm1560_vm6, %v2359_v8, 0.0 }
 0x1b7   : > { %1862 = vst.msk [vmem:[%s3318_s8 + $0x20] sm:$0xff] %vm1560_vm6, %v1811_v2  ;;  %v1881_v19 = vsel %vm1560_vm6, %v1811_v2, 0.0  ;;  %v1917_v54 = vmul.f32 %v1811_v2, %v1811_v2  ;;  %v2360_v55 = vpop.f32.mrb[6].mxu0 }
 0x1b8   : > { %v1882_v0 = vadd.f32 %v1881_v19, %v1880_v24  ;;  %1865 = vst.msk [vmem:[%s3318_s8 + $0x38] sm:$0xff] %vm1560_vm6, %v2360_v55  ;;  %v1814_v53 = vpop.f32.mrb[7].mxu0  ;;  %v1920_v1 = vmul.f32 %v2360_v55, %v2360_v55  ;;  %v1940_v20 = vsel %vm1560_vm6, %v1919_v57, 0.0  ;;  %v1887_v13 = vsel %vm1560_vm6, %v2360_v55, 0.0 }
 0x1b9   : > { %v1936_v50 = vsel %vm1560_vm6, %v1917_v54, 0.0  ;;  %1863 = vst.msk [vmem:[%s3318_s8 + $0x28] sm:$0xff] %vm1560_vm6, %v1814_v53  ;;  %v1883_v11 = vsel %vm1560_vm6, %v1814_v53, 0.0  ;;  %v1918_v46 = vmul.f32 %v1814_v53, %v1814_v53 }
 0x1ba   : > { %v1937_v12 = vadd.f32 %v1936_v50, %v1935_v63  ;;  %v1884_v56 = vadd.f32 %v1883_v11, %v1882_v0  ;;  %v1942_v9 = vsel %vm1560_vm6, %v1920_v1, 0.0 }
 0x1bb   : > { %v1938_v5 = vsel %vm1560_vm6, %v1918_v46, 0.0 }
 0x1bc   : > { %v1886_v18 = vadd.f32 %v1885_v14, %v1884_v56  ;;  %v1939_v16 = vadd.f32 %v1938_v5, %v1937_v12 }
 0x1be   : > { %v1941_v27 = vadd.f32 %v1940_v20, %v1939_v16  ;;  %v1888_v7 = vadd.f32 %v1887_v13, %v1886_v18 }
 0x1c0   : > { %v1943_v32 = vadd.f32 %v1942_v9, %v1941_v27 }
 0x1da   : > { %v2363_v22 = vpop.f32.mrb[0].mxu1 }
 0x1db   : > { %1868 = vst.msk [vmem:[%s3318_s8 + $0x50] sm:$0xff] %vm1560_vm6, %v2363_v22  ;;  %v1827_v23 = vpop.f32.mrb[1].mxu1  ;;  %v1923_v21 = vmul.f32 %v2363_v22, %v2363_v22  ;;  %v1893_v45 = vsel %vm1560_vm6, %v2363_v22, 0.0 }
 0x1dc   : > { %1866 = vst.msk [vmem:[%s3318_s8 + $0x40] sm:$0xff] %vm1560_vm6, %v1827_v23  ;;  %v1889_v29 = vsel %vm1560_vm6, %v1827_v23, 0.0  ;;  %v1921_v59 = vmul.f32 %v1827_v23, %v1827_v23  ;;  %v2364_v26 = vpop.f32.mrb[2].mxu1 }
 0x1dd   : > { %v1890_v39 = vadd.f32 %v1889_v29, %v1888_v7  ;;  %1869 = vst.msk [vmem:[%s3318_s8 + $0x58] sm:$0xff] %vm1560_vm6, %v2364_v26  ;;  %v1830_v35 = vpop.f32.mrb[3].mxu1  ;;  %v1924_v31 = vmul.f32 %v2364_v26, %v2364_v26  ;;  %v1948_v44 = vsel %vm1560_vm6, %v1923_v21, 0.0  ;;  %v1895_v6 = vsel %vm1560_vm6, %v2364_v26, 0.0 }
 0x1de   : > { %v1944_v3 = vsel %vm1560_vm6, %v1921_v59, 0.0  ;;  %1867 = vst.msk [vmem:[%s3318_s8 + $0x48] sm:$0xff] %vm1560_vm6, %v1830_v35  ;;  %v1891_v40 = vsel %vm1560_vm6, %v1830_v35, 0.0  ;;  %v1922_v4 = vmul.f32 %v1830_v35, %v1830_v35 }
 0x1df   : > { %v1945_v41 = vadd.f32 %v1944_v3, %v1943_v32  ;;  %v1892_v37 = vadd.f32 %v1891_v40, %v1890_v39  ;;  %v1950_v10 = vsel %vm1560_vm6, %v1924_v31, 0.0 }
 0x1e0   : > { %v1946_v33 = vsel %vm1560_vm6, %v1922_v4, 0.0 }
 0x1e1   : > { %v1894_v36 = vadd.f32 %v1893_v45, %v1892_v37  ;;  %v1947_v25 = vadd.f32 %v1946_v33, %v1945_v41 }
 0x1e3   : > { %v1949_v38 = vadd.f32 %v1948_v44, %v1947_v25  ;;  %v1896_v58 = vadd.f32 %v1895_v6, %v1894_v36 }
 0x1e5   : > { %v1951_v34 = vadd.f32 %v1950_v10, %v1949_v38 }
 0x1fa   : > { %v2367_v15 = vpop.f32.mrb[4].mxu1 }
 0x1fb   : > { %1872 = vst.msk [vmem:[%s3318_s8 + $0x70] sm:$0xff] %vm1560_vm6, %v2367_v15  ;;  %v1843_v60 = vpop.f32.mrb[5].mxu1  ;;  %v1927_v49 = vmul.f32 %v2367_v15, %v2367_v15  ;;  %v1901_v24 = vsel %vm1560_vm6, %v2367_v15, 0.0 }
 0x1fc   : > { %1870 = vst.msk [vmem:[%s3318_s8 + $0x60] sm:$0xff] %vm1560_vm6, %v1843_v60  ;;  %v1897_v42 = vsel %vm1560_vm6, %v1843_v60, 0.0  ;;  %v1925_v43 = vmul.f32 %v1843_v60, %v1843_v60  ;;  %v2368_v48 = vpop.f32.mrb[6].mxu1 }
 0x1fd   : > { %v1898_v30 = vadd.f32 %v1897_v42, %v1896_v58  ;;  %1873 = vst.msk [vmem:[%s3318_s8 + $0x78] sm:$0xff] %vm1560_vm6, %v2368_v48  ;;  %v1846_v47 = vpop.f32.mrb[7].mxu1  ;;  %v1928_v62 = vmul.f32 %v2368_v48, %v2368_v48  ;;  %v1956_v19 = vsel %vm1560_vm6, %v1927_v49, 0.0  ;;  %v1903_v54 = vsel %vm1560_vm6, %v2368_v48, 0.0 }
 0x1fe   : > { %v1952_v51 = vsel %vm1560_vm6, %v1925_v43, 0.0  ;;  %1871 = vst.msk [vmem:[%s3318_s8 + $0x68] sm:$0xff] %vm1560_vm6, %v1846_v47  ;;  %v1899_v61 = vsel %vm1560_vm6, %v1846_v47, 0.0  ;;  %v1926_v17 = vmul.f32 %v1846_v47, %v1846_v47 }
 0x1ff   : > { %v1953_v52 = vadd.f32 %v1952_v51, %v1951_v34  ;;  %v1900_v28 = vadd.f32 %v1899_v61, %v1898_v30  ;;  %v1958_v53 = vsel %vm1560_vm6, %v1928_v62, 0.0 }
 0x200   : > { %v1954_v63 = vsel %vm1560_vm6, %v1926_v17, 0.0 }
 0x201   : > { %v1902_v8 = vadd.f32 %v1901_v24, %v1900_v28  ;;  %v1955_v2 = vadd.f32 %v1954_v63, %v1953_v52 }
 0x203   : > { %v1904_v55 = vadd.f32 %v1903_v54, %v1902_v8  ;;  %v1957_v0 = vadd.f32 %v1956_v19, %v1955_v2 }
 0x205   : > { %v1905_v57 = vrot.slane %v1904_v55, 4  ;;  %v1959_v50 = vadd.f32 %v1958_v53, %v1957_v0 }
 0x207   : > { %v1906_v11 = vadd.f32 %v1905_v57, %v1904_v55  ;;  %v1960_v46 = vrot.slane %v1959_v50, 4 }
 0x209   : > { %v1907_v12 = vrot.slane %v1906_v11, 2  ;;  %v1961_v56 = vadd.f32 %v1960_v46, %v1959_v50 }
 0x20b   : > { %v1908_v14 = vadd.f32 %v1907_v12, %v1906_v11  ;;  %v1962_v1 = vrot.slane %v1961_v56, 2 }
 0x20d   : > { %v1909_v5 = vrot.slane %v1908_v14, 1  ;;  %v1963_v18 = vadd.f32 %v1962_v1, %v1961_v56 }
 0x20f   : > { %v1910_v16 = vadd.f32 %v1909_v5, %v1908_v14  ;;  %v1964_v20 = vrot.slane %v1963_v18, 1 }
 0x211   : > { %1912 = vst.msk [vmem:[%s263_s13] sm:$0x1] %vm1911_vm0, %v1910_v16  ;;  %v1965_v13 = vadd.f32 %v1964_v20, %v1963_v18 }
 0x213   : > { %1966 = vst.msk [vmem:[%s270_s23] sm:$0x1] %vm1911_vm0, %v1965_v13 }
 0x214 PF: > { %s15_s19 = sadd.s32 1, %s2508_s19   ;;  %s3416_s15 = smov %s2500_s17 }
 0x215   : > { %p12_p7 = scmp.ge.s32.totalorder %s15_s19, 6   ;;  %s3417_s16 = smov %s2504_s18 }
 0x216   : > { %s3418_s17 = smov %s3421_s20  ;;  %s3419_s18 = smov %s3425_s21 }
 0x217   :  { %14 = sbr.rel (!%p12_p7) target bundleno = 3 (0x3), region = 84 }

</bundles_post_ra>
